<compile_context>
chip_gen: v5e
topology: v5e:2x2
jax: 0.10.0
libtpu: 0.0.40
codegen_flags: <defaults>
</compile_context>

<pallas_src>
import numpy as np
import jax
import jax.numpy as jnp
from jax import lax
from jax.experimental import pallas as pl
from jax.experimental.pallas import tpu as pltpu

# Fixed LeNet geometry implied by fc1 = Linear(16*4*4, 120)  (28x28x1 input).
K = 5
HIN, WIN = 28, 28
C1, H1, W1 = 6, 24, 24       # conv1 output
H1P, W1P = 12, 12            # pool1 output
C2, H2, W2 = 16, 8, 8        # conv2 output
H2P, W2P = 4, 4              # pool2 output
NFC, NPAD = 120, 128         # fc output (lane-padded to 128)


def _dot(a, b):
    # exact-ish f32 MXU matmul (f32 accumulate, highest precision passes)
    return jnp.dot(a, b, preferred_element_type=jnp.float32,
                   precision=lax.Precision.HIGHEST)


# ------------------------------ fused kernel ------------------------------- #

def _f1_fused_kernel(x_ref, w1_ref, b1_ref, e1_ref, d1_ref,
                     w2_ref, b2_ref, e2_ref, d2_ref,
                     wfc_ref, bfc_ref, o_ref):
    x = x_ref[0]                                        # [28, 28]

    # conv1 (1->6, k5) + bias + relu : 5 banded matmuls -> [24, 6*24=144]
    y1 = _dot(x[0:H1, :], w1_ref[0])
    for di in range(1, K):
        y1 = y1 + _dot(x[di:di + H1, :], w1_ref[di])
    y1 = jnp.maximum(y1 + b1_ref[...], 0.0)

    # maxpool 2x2 via exact 0/1 selection matmuls -> [12, 6*12=72]
    rp = jnp.maximum(_dot(e1_ref[0], y1), _dot(e1_ref[1], y1))
    p1 = jnp.maximum(_dot(rp, d1_ref[0]), _dot(rp, d1_ref[1]))

    # conv2 (6->16, k5) + bias + relu -> [8, 16*8=128]  (exactly 128 lanes)
    y2 = _dot(p1[0:H2, :], w2_ref[0])
    for di in range(1, K):
        y2 = y2 + _dot(p1[di:di + H2, :], w2_ref[di])
    y2 = jnp.maximum(y2 + b2_ref[...], 0.0)

    # maxpool 2x2 -> [4, 16*4=64]
    rp2 = jnp.maximum(_dot(e2_ref[0], y2), _dot(e2_ref[1], y2))
    p2 = jnp.maximum(_dot(rp2, d2_ref[0]), _dot(rp2, d2_ref[1]))

    # fc (256 -> 120, lane-padded to 128) + relu.  PyTorch's NCHW .view flatten
    # order is folded into the packed fc weight (one matmul per pooled row).
    acc = _dot(p2[0:1, :], wfc_ref[0])
    for h in range(1, H2P):
        acc = acc + _dot(p2[h:h + 1, :], wfc_ref[h])
    out = jnp.maximum(acc + bfc_ref[...], 0.0)          # [1, 128]

    # dense (8,128) output tile (padding rows/lanes are sliced off by the wrapper)
    o_ref[0] = jnp.broadcast_to(out, (8, NPAD))


# --------------------------- one-time weight pack --------------------------- #

def pack_params(params):
    w1 = np.asarray(params["w1"], np.float32)           # [6,1,5,5]
    b1 = np.asarray(params["b1"], np.float32)
    w2 = np.asarray(params["w2"], np.float32)           # [16,6,5,5]
    b2 = np.asarray(params["b2"], np.float32)
    wfc = np.asarray(params["w_fc"], np.float32)         # [120,256]
    bfc = np.asarray(params["b_fc"], np.float32)

    # conv1 bands: y1[h, co*W1+w] = sum_di (x[h+di,:] @ w1b[di])[co*W1+w]
    w1b = np.zeros((K, WIN, C1 * W1), np.float32)
    for di in range(K):
        for co in range(C1):
            for w in range(W1):
                w1b[di, w:w + K, co * W1 + w] = w1[co, 0, di, :]
    b1c = np.repeat(b1, W1)[None, :]                      # [1, 144]

    # pool1 selection matrices (row pairs / per-channel column pairs)
    e1 = np.zeros((2, H1P, H1), np.float32)
    e1[0, np.arange(H1P), 2 * np.arange(H1P)] = 1.0
    e1[1, np.arange(H1P), 2 * np.arange(H1P) + 1] = 1.0
    d1 = np.zeros((2, C1 * W1, C1 * W1P), np.float32)
    for co in range(C1):
        for w in range(W1P):
            d1[0, co * W1 + 2 * w,     co * W1P + w] = 1.0
            d1[1, co * W1 + 2 * w + 1, co * W1P + w] = 1.0

    # conv2 bands: y2[h, co*W2+w] = sum_di (p1[h+di,:] @ w2b[di])[co*W2+w]
    w2b = np.zeros((K, C1 * W1P, C2 * W2), np.float32)
    for di in range(K):
        for co in range(C2):
            for ci in range(C1):
                for w in range(W2):
                    w2b[di, ci * W1P + w: ci * W1P + w + K, co * W2 + w] = w2[co, ci, di, :]
    b2c = np.repeat(b2, W2)[None, :]                      # [1, 128]

    # pool2 selection matrices
    e2 = np.zeros((2, H2P, H2), np.float32)
    e2[0, np.arange(H2P), 2 * np.arange(H2P)] = 1.0
    e2[1, np.arange(H2P), 2 * np.arange(H2P) + 1] = 1.0
    d2 = np.zeros((2, C2 * W2, C2 * W2P), np.float32)
    for co in range(C2):
        for w in range(W2P):
            d2[0, co * W2 + 2 * w,     co * W2P + w] = 1.0
            d2[1, co * W2 + 2 * w + 1, co * W2P + w] = 1.0

    # fc: out[n] = sum_h sum_{co*W2P+w} p2[h, co*W2P+w] * wfcr[h, co*W2P+w, n]
    # where p2[h, co*W2P+w] corresponds to PyTorch flat index co*16 + h*4 + w.
    wfcr = np.zeros((H2P, C2 * W2P, NPAD), np.float32)
    for h in range(H2P):
        for co in range(C2):
            for w in range(W2P):
                wfcr[h, co * W2P + w, :NFC] = wfc[:, co * (H2P * W2P) + h * W2P + w]
    bfcp = np.zeros((1, NPAD), np.float32)
    bfcp[0, :NFC] = bfc

    return tuple(jnp.asarray(a) for a in
                 (w1b, b1c, e1, d1, w2b, b2c, e2, d2, wfcr, bfcp))


# --------------------------------- wrapper ---------------------------------- #

def f1_forward(x_nchw, packed):
    (w1b, b1c, e1, d1, w2b, b2c, e2, d2, wfcr, bfcp) = packed
    B = x_nchw.shape[0]
    x2 = x_nchw[:, 0, :, :].astype(jnp.float32)          # [B, 28, 28]

    const3 = lambda b: (0, 0, 0)
    const2 = lambda b: (0, 0)

    out = pl.pallas_call(
        _f1_fused_kernel,
        out_shape=jax.ShapeDtypeStruct((B, 8, NPAD), jnp.float32),
        grid=(B,),
        in_specs=[
            pl.BlockSpec((1, HIN, WIN), lambda b: (b, 0, 0)),
            pl.BlockSpec(w1b.shape, const3),
            pl.BlockSpec(b1c.shape, const2),
            pl.BlockSpec(e1.shape, const3),
            pl.BlockSpec(d1.shape, const3),
            pl.BlockSpec(w2b.shape, const3),
            pl.BlockSpec(b2c.shape, const2),
            pl.BlockSpec(e2.shape, const3),
            pl.BlockSpec(d2.shape, const3),
            pl.BlockSpec(wfcr.shape, const3),
            pl.BlockSpec(bfcp.shape, const2),
        ],
        out_specs=pl.BlockSpec((1, 8, NPAD), lambda b: (b, 0, 0)),
        compiler_params=pltpu.CompilerParams(
            dimension_semantics=("parallel",)),
    )(x2, w1b, b1c, e1, d1, w2b, b2c, e2, d2, wfcr, bfcp)

    return out[:, 0, :NFC]                                # [B, 120]


f1_forward_jit = jax.jit(f1_forward)


# ---------------------------- pure-JAX reference ---------------------------- #

def _maxpool_ref(x):
    return lax.reduce_window(x, -jnp.inf, lax.max, (1, 1, 2, 2), (1, 1, 2, 2), "VALID")


def f1_reference(x, params):
    hp = lax.Precision.HIGHEST
    dn = ("NCHW", "OIHW", "NCHW")
    y = lax.conv_general_dilated(x, params["w1"], (1, 1), "VALID",
                                 dimension_numbers=dn, precision=hp)
    y = _maxpool_ref(jnp.maximum(y + params["b1"][None, :, None, None], 0.0))
    y = lax.conv_general_dilated(y, params["w2"], (1, 1), "VALID",
                                 dimension_numbers=dn, precision=hp)
    y = _maxpool_ref(jnp.maximum(y + params["b2"][None, :, None, None], 0.0))
    y = y.reshape(y.shape[0], -1)                         # PyTorch NCHW .view order
    return jnp.maximum(jnp.dot(y, params["w_fc"].T, precision=hp)
                       + params["b_fc"][None, :], 0.0)


def init_params(key):
    k1, k2, k3, k4, k5, k6 = jax.random.split(key, 6)
    return {
        "w1":   jax.random.normal(k1, (6, 1, 5, 5), jnp.float32) * 0.20,
        "b1":   jax.random.normal(k2, (6,),          jnp.float32) * 0.10,
        "w2":   jax.random.normal(k3, (16, 6, 5, 5), jnp.float32) * 0.08,
        "b2":   jax.random.normal(k4, (16,),         jnp.float32) * 0.10,
        "w_fc": jax.random.normal(k5, (120, 256),    jnp.float32) * 0.06,
        "b_fc": jax.random.normal(k6, (120,),        jnp.float32) * 0.10,
    }


if __name__ == "__main__":
    key = jax.random.PRNGKey(0)
    pkey, xkey = jax.random.split(key)
    params = init_params(pkey)
    packed = pack_params(params)                          # one-time weight packing

    # LeNet-style module implies 28x28 single-channel input (16*4*4 after conv+pool x2).
    x = jax.random.normal(xkey, (2, 1, 28, 28), jnp.float32)

    out = f1_forward_jit(x, packed)
    out = jax.block_until_ready(out)

    assert out.shape == (2, 120), out.shape
    assert bool(jnp.all(out >= 0.0))                      # final relu

    ref = f1_reference(x, params)
    max_diff = float(jnp.max(jnp.abs(out - ref)))
    assert max_diff < 2e-3, f"mismatch vs reference: max abs diff = {max_diff}"

    print("KERNEL_OK")
</pallas_src>

<mosaic_0001>
module attributes {stable_mosaic.version = 11 : i64} {
  func.func @_f1_fused_kernel(%arg0: i32, %arg1: memref<1x28x28xf32, #tpu.memory_space<vmem>>, %arg2: memref<5x28x144xf32, #tpu.memory_space<vmem>>, %arg3: memref<1x144xf32, #tpu.memory_space<vmem>>, %arg4: memref<2x12x24xf32, #tpu.memory_space<vmem>>, %arg5: memref<2x144x72xf32, #tpu.memory_space<vmem>>, %arg6: memref<5x72x128xf32, #tpu.memory_space<vmem>>, %arg7: memref<1x128xf32, #tpu.memory_space<vmem>>, %arg8: memref<2x4x8xf32, #tpu.memory_space<vmem>>, %arg9: memref<2x128x64xf32, #tpu.memory_space<vmem>>, %arg10: memref<4x64x128xf32, #tpu.memory_space<vmem>>, %arg11: memref<1x128xf32, #tpu.memory_space<vmem>>, %arg12: memref<1x8x128xf32, #tpu.memory_space<vmem>>) attributes {dimension_semantics = [#tpu.dimension_semantics<parallel>], iteration_bounds = array<i64: 2>, scalar_prefetch = 0 : i64, scratch_operands = 0 : i64, tpu.core_type = #tpu.core_type<tc>, window_params = [{transform_indices = @transform_0, window_bounds = array<i64: 1, 28, 28>}, {pipeline_mode = #tpu.pipeline_mode<synchronous>, transform_indices = @transform_1, window_bounds = array<i64: 5, 28, 144>}, {pipeline_mode = #tpu.pipeline_mode<synchronous>, transform_indices = @transform_2, window_bounds = array<i64: 1, 144>}, {pipeline_mode = #tpu.pipeline_mode<synchronous>, transform_indices = @transform_3, window_bounds = array<i64: 2, 12, 24>}, {pipeline_mode = #tpu.pipeline_mode<synchronous>, transform_indices = @transform_4, window_bounds = array<i64: 2, 144, 72>}, {pipeline_mode = #tpu.pipeline_mode<synchronous>, transform_indices = @transform_5, window_bounds = array<i64: 5, 72, 128>}, {pipeline_mode = #tpu.pipeline_mode<synchronous>, transform_indices = @transform_6, window_bounds = array<i64: 1, 128>}, {pipeline_mode = #tpu.pipeline_mode<synchronous>, transform_indices = @transform_7, window_bounds = array<i64: 2, 4, 8>}, {pipeline_mode = #tpu.pipeline_mode<synchronous>, transform_indices = @transform_8, window_bounds = array<i64: 2, 128, 64>}, {pipeline_mode = #tpu.pipeline_mode<synchronous>, transform_indices = @transform_9, window_bounds = array<i64: 4, 64, 128>}, {pipeline_mode = #tpu.pipeline_mode<synchronous>, transform_indices = @transform_10, window_bounds = array<i64: 1, 128>}, {transform_indices = @transform_11, window_bounds = array<i64: 1, 8, 128>}]} {
    %c0 = arith.constant 0 : index
    %c0_0 = arith.constant 0 : index
    %c0_1 = arith.constant 0 : index
    %0 = vector.load %arg1[%c0, %c0_0, %c0_1] : memref<1x28x28xf32, #tpu.memory_space<vmem>>, vector<1x28x28xf32>
    %1 = vector.shape_cast %0 : vector<1x28x28xf32> to vector<28x28xf32>
    %2 = vector.extract_strided_slice %1 {offsets = [0, 0], sizes = [24, 28], strides = [1, 1]} : vector<28x28xf32> to vector<24x28xf32>
    %c0_2 = arith.constant 0 : index
    %c0_3 = arith.constant 0 : index
    %c0_4 = arith.constant 0 : index
    %3 = vector.load %arg2[%c0_2, %c0_3, %c0_4] : memref<5x28x144xf32, #tpu.memory_space<vmem>>, vector<1x28x144xf32>
    %4 = vector.shape_cast %3 : vector<1x28x144xf32> to vector<28x144xf32>
    %cst = arith.constant dense<0.000000e+00> : vector<24x144xf32>
    %5 = tpu.matmul %2, %4, %cst {dimension_numbers = #tpu.dot_dimension_numbers<[1], [0], [0], [1], [0, 0, 1, 1], [], []>, precision = #tpu.contract_precision<fp32>} : vector<24x28xf32>, vector<28x144xf32>, vector<24x144xf32> -> vector<24x144xf32>
    %6 = vector.extract_strided_slice %1 {offsets = [1, 0], sizes = [24, 28], strides = [1, 1]} : vector<28x28xf32> to vector<24x28xf32>
    %c1 = arith.constant 1 : index
    %c0_5 = arith.constant 0 : index
    %c0_6 = arith.constant 0 : index
    %7 = vector.load %arg2[%c1, %c0_5, %c0_6] : memref<5x28x144xf32, #tpu.memory_space<vmem>>, vector<1x28x144xf32>
    %8 = vector.shape_cast %7 : vector<1x28x144xf32> to vector<28x144xf32>
    %cst_7 = arith.constant dense<0.000000e+00> : vector<24x144xf32>
    %9 = tpu.matmul %6, %8, %cst_7 {dimension_numbers = #tpu.dot_dimension_numbers<[1], [0], [0], [1], [0, 0, 1, 1], [], []>, precision = #tpu.contract_precision<fp32>} : vector<24x28xf32>, vector<28x144xf32>, vector<24x144xf32> -> vector<24x144xf32>
    %10 = arith.addf %5, %9 : vector<24x144xf32>
    %11 = vector.extract_strided_slice %1 {offsets = [2, 0], sizes = [24, 28], strides = [1, 1]} : vector<28x28xf32> to vector<24x28xf32>
    %c2 = arith.constant 2 : index
    %c0_8 = arith.constant 0 : index
    %c0_9 = arith.constant 0 : index
    %12 = vector.load %arg2[%c2, %c0_8, %c0_9] : memref<5x28x144xf32, #tpu.memory_space<vmem>>, vector<1x28x144xf32>
    %13 = vector.shape_cast %12 : vector<1x28x144xf32> to vector<28x144xf32>
    %cst_10 = arith.constant dense<0.000000e+00> : vector<24x144xf32>
    %14 = tpu.matmul %11, %13, %cst_10 {dimension_numbers = #tpu.dot_dimension_numbers<[1], [0], [0], [1], [0, 0, 1, 1], [], []>, precision = #tpu.contract_precision<fp32>} : vector<24x28xf32>, vector<28x144xf32>, vector<24x144xf32> -> vector<24x144xf32>
    %15 = arith.addf %10, %14 : vector<24x144xf32>
    %16 = vector.extract_strided_slice %1 {offsets = [3, 0], sizes = [24, 28], strides = [1, 1]} : vector<28x28xf32> to vector<24x28xf32>
    %c3 = arith.constant 3 : index
    %c0_11 = arith.constant 0 : index
    %c0_12 = arith.constant 0 : index
    %17 = vector.load %arg2[%c3, %c0_11, %c0_12] : memref<5x28x144xf32, #tpu.memory_space<vmem>>, vector<1x28x144xf32>
    %18 = vector.shape_cast %17 : vector<1x28x144xf32> to vector<28x144xf32>
    %cst_13 = arith.constant dense<0.000000e+00> : vector<24x144xf32>
    %19 = tpu.matmul %16, %18, %cst_13 {dimension_numbers = #tpu.dot_dimension_numbers<[1], [0], [0], [1], [0, 0, 1, 1], [], []>, precision = #tpu.contract_precision<fp32>} : vector<24x28xf32>, vector<28x144xf32>, vector<24x144xf32> -> vector<24x144xf32>
    %20 = arith.addf %15, %19 : vector<24x144xf32>
    %21 = vector.extract_strided_slice %1 {offsets = [4, 0], sizes = [24, 28], strides = [1, 1]} : vector<28x28xf32> to vector<24x28xf32>
    %c4 = arith.constant 4 : index
    %c0_14 = arith.constant 0 : index
    %c0_15 = arith.constant 0 : index
    %22 = vector.load %arg2[%c4, %c0_14, %c0_15] : memref<5x28x144xf32, #tpu.memory_space<vmem>>, vector<1x28x144xf32>
    %23 = vector.shape_cast %22 : vector<1x28x144xf32> to vector<28x144xf32>
    %cst_16 = arith.constant dense<0.000000e+00> : vector<24x144xf32>
    %24 = tpu.matmul %21, %23, %cst_16 {dimension_numbers = #tpu.dot_dimension_numbers<[1], [0], [0], [1], [0, 0, 1, 1], [], []>, precision = #tpu.contract_precision<fp32>} : vector<24x28xf32>, vector<28x144xf32>, vector<24x144xf32> -> vector<24x144xf32>
    %25 = arith.addf %20, %24 : vector<24x144xf32>
    %c0_17 = arith.constant 0 : index
    %c0_18 = arith.constant 0 : index
    %26 = vector.load %arg3[%c0_17, %c0_18] : memref<1x144xf32, #tpu.memory_space<vmem>>, vector<1x144xf32>
    %27 = vector.broadcast %26 : vector<1x144xf32> to vector<24x144xf32>
    %28 = arith.addf %25, %27 : vector<24x144xf32>
    %cst_19 = arith.constant 0.000000e+00 : f32
    %29 = vector.broadcast %cst_19 : f32 to vector<24x144xf32>
    %30 = arith.maximumf %28, %29 : vector<24x144xf32>
    %c0_20 = arith.constant 0 : index
    %c0_21 = arith.constant 0 : index
    %c0_22 = arith.constant 0 : index
    %31 = vector.load %arg4[%c0_20, %c0_21, %c0_22] : memref<2x12x24xf32, #tpu.memory_space<vmem>>, vector<1x12x24xf32>
    %32 = vector.shape_cast %31 : vector<1x12x24xf32> to vector<12x24xf32>
    %cst_23 = arith.constant dense<0.000000e+00> : vector<12x144xf32>
    %33 = tpu.matmul %32, %30, %cst_23 {dimension_numbers = #tpu.dot_dimension_numbers<[1], [0], [0], [1], [0, 0, 1, 1], [], []>, precision = #tpu.contract_precision<fp32>} : vector<12x24xf32>, vector<24x144xf32>, vector<12x144xf32> -> vector<12x144xf32>
    %c1_24 = arith.constant 1 : index
    %c0_25 = arith.constant 0 : index
    %c0_26 = arith.constant 0 : index
    %34 = vector.load %arg4[%c1_24, %c0_25, %c0_26] : memref<2x12x24xf32, #tpu.memory_space<vmem>>, vector<1x12x24xf32>
    %35 = vector.shape_cast %34 : vector<1x12x24xf32> to vector<12x24xf32>
    %cst_27 = arith.constant dense<0.000000e+00> : vector<12x144xf32>
    %36 = tpu.matmul %35, %30, %cst_27 {dimension_numbers = #tpu.dot_dimension_numbers<[1], [0], [0], [1], [0, 0, 1, 1], [], []>, precision = #tpu.contract_precision<fp32>} : vector<12x24xf32>, vector<24x144xf32>, vector<12x144xf32> -> vector<12x144xf32>
    %37 = arith.maximumf %33, %36 : vector<12x144xf32>
    %c0_28 = arith.constant 0 : index
    %c0_29 = arith.constant 0 : index
    %c0_30 = arith.constant 0 : index
    %38 = vector.load %arg5[%c0_28, %c0_29, %c0_30] : memref<2x144x72xf32, #tpu.memory_space<vmem>>, vector<1x144x72xf32>
    %39 = vector.shape_cast %38 : vector<1x144x72xf32> to vector<144x72xf32>
    %cst_31 = arith.constant dense<0.000000e+00> : vector<12x72xf32>
    %40 = tpu.matmul %37, %39, %cst_31 {dimension_numbers = #tpu.dot_dimension_numbers<[1], [0], [0], [1], [0, 0, 1, 1], [], []>, precision = #tpu.contract_precision<fp32>} : vector<12x144xf32>, vector<144x72xf32>, vector<12x72xf32> -> vector<12x72xf32>
    %c1_32 = arith.constant 1 : index
    %c0_33 = arith.constant 0 : index
    %c0_34 = arith.constant 0 : index
    %41 = vector.load %arg5[%c1_32, %c0_33, %c0_34] : memref<2x144x72xf32, #tpu.memory_space<vmem>>, vector<1x144x72xf32>
    %42 = vector.shape_cast %41 : vector<1x144x72xf32> to vector<144x72xf32>
    %cst_35 = arith.constant dense<0.000000e+00> : vector<12x72xf32>
    %43 = tpu.matmul %37, %42, %cst_35 {dimension_numbers = #tpu.dot_dimension_numbers<[1], [0], [0], [1], [0, 0, 1, 1], [], []>, precision = #tpu.contract_precision<fp32>} : vector<12x144xf32>, vector<144x72xf32>, vector<12x72xf32> -> vector<12x72xf32>
    %44 = arith.maximumf %40, %43 : vector<12x72xf32>
    %45 = vector.extract_strided_slice %44 {offsets = [0, 0], sizes = [8, 72], strides = [1, 1]} : vector<12x72xf32> to vector<8x72xf32>
    %c0_36 = arith.constant 0 : index
    %c0_37 = arith.constant 0 : index
    %c0_38 = arith.constant 0 : index
    %46 = vector.load %arg6[%c0_36, %c0_37, %c0_38] : memref<5x72x128xf32, #tpu.memory_space<vmem>>, vector<1x72x128xf32>
    %47 = vector.shape_cast %46 : vector<1x72x128xf32> to vector<72x128xf32>
    %cst_39 = arith.constant dense<0.000000e+00> : vector<8x128xf32>
    %48 = tpu.matmul %45, %47, %cst_39 {dimension_numbers = #tpu.dot_dimension_numbers<[1], [0], [0], [1], [0, 0, 1, 1], [], []>, precision = #tpu.contract_precision<fp32>} : vector<8x72xf32>, vector<72x128xf32>, vector<8x128xf32> -> vector<8x128xf32>
    %49 = vector.extract_strided_slice %44 {offsets = [1, 0], sizes = [8, 72], strides = [1, 1]} : vector<12x72xf32> to vector<8x72xf32>
    %c1_40 = arith.constant 1 : index
    %c0_41 = arith.constant 0 : index
    %c0_42 = arith.constant 0 : index
    %50 = vector.load %arg6[%c1_40, %c0_41, %c0_42] : memref<5x72x128xf32, #tpu.memory_space<vmem>>, vector<1x72x128xf32>
    %51 = vector.shape_cast %50 : vector<1x72x128xf32> to vector<72x128xf32>
    %cst_43 = arith.constant dense<0.000000e+00> : vector<8x128xf32>
    %52 = tpu.matmul %49, %51, %cst_43 {dimension_numbers = #tpu.dot_dimension_numbers<[1], [0], [0], [1], [0, 0, 1, 1], [], []>, precision = #tpu.contract_precision<fp32>} : vector<8x72xf32>, vector<72x128xf32>, vector<8x128xf32> -> vector<8x128xf32>
    %53 = arith.addf %48, %52 : vector<8x128xf32>
    %54 = vector.extract_strided_slice %44 {offsets = [2, 0], sizes = [8, 72], strides = [1, 1]} : vector<12x72xf32> to vector<8x72xf32>
    %c2_44 = arith.constant 2 : index
    %c0_45 = arith.constant 0 : index
    %c0_46 = arith.constant 0 : index
    %55 = vector.load %arg6[%c2_44, %c0_45, %c0_46] : memref<5x72x128xf32, #tpu.memory_space<vmem>>, vector<1x72x128xf32>
    %56 = vector.shape_cast %55 : vector<1x72x128xf32> to vector<72x128xf32>
    %cst_47 = arith.constant dense<0.000000e+00> : vector<8x128xf32>
    %57 = tpu.matmul %54, %56, %cst_47 {dimension_numbers = #tpu.dot_dimension_numbers<[1], [0], [0], [1], [0, 0, 1, 1], [], []>, precision = #tpu.contract_precision<fp32>} : vector<8x72xf32>, vector<72x128xf32>, vector<8x128xf32> -> vector<8x128xf32>
    %58 = arith.addf %53, %57 : vector<8x128xf32>
    %59 = vector.extract_strided_slice %44 {offsets = [3, 0], sizes = [8, 72], strides = [1, 1]} : vector<12x72xf32> to vector<8x72xf32>
    %c3_48 = arith.constant 3 : index
    %c0_49 = arith.constant 0 : index
    %c0_50 = arith.constant 0 : index
    %60 = vector.load %arg6[%c3_48, %c0_49, %c0_50] : memref<5x72x128xf32, #tpu.memory_space<vmem>>, vector<1x72x128xf32>
    %61 = vector.shape_cast %60 : vector<1x72x128xf32> to vector<72x128xf32>
    %cst_51 = arith.constant dense<0.000000e+00> : vector<8x128xf32>
    %62 = tpu.matmul %59, %61, %cst_51 {dimension_numbers = #tpu.dot_dimension_numbers<[1], [0], [0], [1], [0, 0, 1, 1], [], []>, precision = #tpu.contract_precision<fp32>} : vector<8x72xf32>, vector<72x128xf32>, vector<8x128xf32> -> vector<8x128xf32>
    %63 = arith.addf %58, %62 : vector<8x128xf32>
    %64 = vector.extract_strided_slice %44 {offsets = [4, 0], sizes = [8, 72], strides = [1, 1]} : vector<12x72xf32> to vector<8x72xf32>
    %c4_52 = arith.constant 4 : index
    %c0_53 = arith.constant 0 : index
    %c0_54 = arith.constant 0 : index
    %65 = vector.load %arg6[%c4_52, %c0_53, %c0_54] : memref<5x72x128xf32, #tpu.memory_space<vmem>>, vector<1x72x128xf32>
    %66 = vector.shape_cast %65 : vector<1x72x128xf32> to vector<72x128xf32>
    %cst_55 = arith.constant dense<0.000000e+00> : vector<8x128xf32>
    %67 = tpu.matmul %64, %66, %cst_55 {dimension_numbers = #tpu.dot_dimension_numbers<[1], [0], [0], [1], [0, 0, 1, 1], [], []>, precision = #tpu.contract_precision<fp32>} : vector<8x72xf32>, vector<72x128xf32>, vector<8x128xf32> -> vector<8x128xf32>
    %68 = arith.addf %63, %67 : vector<8x128xf32>
    %c0_56 = arith.constant 0 : index
    %c0_57 = arith.constant 0 : index
    %69 = vector.load %arg7[%c0_56, %c0_57] : memref<1x128xf32, #tpu.memory_space<vmem>>, vector<1x128xf32>
    %70 = vector.broadcast %69 : vector<1x128xf32> to vector<8x128xf32>
    %71 = arith.addf %68, %70 : vector<8x128xf32>
    %cst_58 = arith.constant 0.000000e+00 : f32
    %72 = vector.broadcast %cst_58 : f32 to vector<8x128xf32>
    %73 = arith.maximumf %71, %72 : vector<8x128xf32>
    %c0_59 = arith.constant 0 : index
    %c0_60 = arith.constant 0 : index
    %c0_61 = arith.constant 0 : index
    %74 = vector.load %arg8[%c0_59, %c0_60, %c0_61] : memref<2x4x8xf32, #tpu.memory_space<vmem>>, vector<1x4x8xf32>
    %75 = vector.shape_cast %74 : vector<1x4x8xf32> to vector<4x8xf32>
    %cst_62 = arith.constant dense<0.000000e+00> : vector<4x128xf32>
    %76 = tpu.matmul %75, %73, %cst_62 {dimension_numbers = #tpu.dot_dimension_numbers<[1], [0], [0], [1], [0, 0, 1, 1], [], []>, precision = #tpu.contract_precision<fp32>} : vector<4x8xf32>, vector<8x128xf32>, vector<4x128xf32> -> vector<4x128xf32>
    %c1_63 = arith.constant 1 : index
    %c0_64 = arith.constant 0 : index
    %c0_65 = arith.constant 0 : index
    %77 = vector.load %arg8[%c1_63, %c0_64, %c0_65] : memref<2x4x8xf32, #tpu.memory_space<vmem>>, vector<1x4x8xf32>
    %78 = vector.shape_cast %77 : vector<1x4x8xf32> to vector<4x8xf32>
    %cst_66 = arith.constant dense<0.000000e+00> : vector<4x128xf32>
    %79 = tpu.matmul %78, %73, %cst_66 {dimension_numbers = #tpu.dot_dimension_numbers<[1], [0], [0], [1], [0, 0, 1, 1], [], []>, precision = #tpu.contract_precision<fp32>} : vector<4x8xf32>, vector<8x128xf32>, vector<4x128xf32> -> vector<4x128xf32>
    %80 = arith.maximumf %76, %79 : vector<4x128xf32>
    %c0_67 = arith.constant 0 : index
    %c0_68 = arith.constant 0 : index
    %c0_69 = arith.constant 0 : index
    %81 = vector.load %arg9[%c0_67, %c0_68, %c0_69] : memref<2x128x64xf32, #tpu.memory_space<vmem>>, vector<1x128x64xf32>
    %82 = vector.shape_cast %81 : vector<1x128x64xf32> to vector<128x64xf32>
    %cst_70 = arith.constant dense<0.000000e+00> : vector<4x64xf32>
    %83 = tpu.matmul %80, %82, %cst_70 {dimension_numbers = #tpu.dot_dimension_numbers<[1], [0], [0], [1], [0, 0, 1, 1], [], []>, precision = #tpu.contract_precision<fp32>} : vector<4x128xf32>, vector<128x64xf32>, vector<4x64xf32> -> vector<4x64xf32>
    %c1_71 = arith.constant 1 : index
    %c0_72 = arith.constant 0 : index
    %c0_73 = arith.constant 0 : index
    %84 = vector.load %arg9[%c1_71, %c0_72, %c0_73] : memref<2x128x64xf32, #tpu.memory_space<vmem>>, vector<1x128x64xf32>
    %85 = vector.shape_cast %84 : vector<1x128x64xf32> to vector<128x64xf32>
    %cst_74 = arith.constant dense<0.000000e+00> : vector<4x64xf32>
    %86 = tpu.matmul %80, %85, %cst_74 {dimension_numbers = #tpu.dot_dimension_numbers<[1], [0], [0], [1], [0, 0, 1, 1], [], []>, precision = #tpu.contract_precision<fp32>} : vector<4x128xf32>, vector<128x64xf32>, vector<4x64xf32> -> vector<4x64xf32>
    %87 = arith.maximumf %83, %86 : vector<4x64xf32>
    %88 = vector.extract_strided_slice %87 {offsets = [0, 0], sizes = [1, 64], strides = [1, 1]} : vector<4x64xf32> to vector<1x64xf32>
    %c0_75 = arith.constant 0 : index
    %c0_76 = arith.constant 0 : index
    %c0_77 = arith.constant 0 : index
    %89 = vector.load %arg10[%c0_75, %c0_76, %c0_77] : memref<4x64x128xf32, #tpu.memory_space<vmem>>, vector<1x64x128xf32>
    %90 = vector.shape_cast %89 : vector<1x64x128xf32> to vector<64x128xf32>
    %cst_78 = arith.constant dense<0.000000e+00> : vector<1x128xf32>
    %91 = tpu.matmul %88, %90, %cst_78 {dimension_numbers = #tpu.dot_dimension_numbers<[1], [0], [0], [1], [0, 0, 1, 1], [], []>, precision = #tpu.contract_precision<fp32>} : vector<1x64xf32>, vector<64x128xf32>, vector<1x128xf32> -> vector<1x128xf32>
    %92 = vector.extract_strided_slice %87 {offsets = [1, 0], sizes = [1, 64], strides = [1, 1]} : vector<4x64xf32> to vector<1x64xf32>
    %c1_79 = arith.constant 1 : index
    %c0_80 = arith.constant 0 : index
    %c0_81 = arith.constant 0 : index
    %93 = vector.load %arg10[%c1_79, %c0_80, %c0_81] : memref<4x64x128xf32, #tpu.memory_space<vmem>>, vector<1x64x128xf32>
    %94 = vector.shape_cast %93 : vector<1x64x128xf32> to vector<64x128xf32>
    %cst_82 = arith.constant dense<0.000000e+00> : vector<1x128xf32>
    %95 = tpu.matmul %92, %94, %cst_82 {dimension_numbers = #tpu.dot_dimension_numbers<[1], [0], [0], [1], [0, 0, 1, 1], [], []>, precision = #tpu.contract_precision<fp32>} : vector<1x64xf32>, vector<64x128xf32>, vector<1x128xf32> -> vector<1x128xf32>
    %96 = arith.addf %91, %95 : vector<1x128xf32>
    %97 = vector.extract_strided_slice %87 {offsets = [2, 0], sizes = [1, 64], strides = [1, 1]} : vector<4x64xf32> to vector<1x64xf32>
    %c2_83 = arith.constant 2 : index
    %c0_84 = arith.constant 0 : index
    %c0_85 = arith.constant 0 : index
    %98 = vector.load %arg10[%c2_83, %c0_84, %c0_85] : memref<4x64x128xf32, #tpu.memory_space<vmem>>, vector<1x64x128xf32>
    %99 = vector.shape_cast %98 : vector<1x64x128xf32> to vector<64x128xf32>
    %cst_86 = arith.constant dense<0.000000e+00> : vector<1x128xf32>
    %100 = tpu.matmul %97, %99, %cst_86 {dimension_numbers = #tpu.dot_dimension_numbers<[1], [0], [0], [1], [0, 0, 1, 1], [], []>, precision = #tpu.contract_precision<fp32>} : vector<1x64xf32>, vector<64x128xf32>, vector<1x128xf32> -> vector<1x128xf32>
    %101 = arith.addf %96, %100 : vector<1x128xf32>
    %102 = vector.extract_strided_slice %87 {offsets = [3, 0], sizes = [1, 64], strides = [1, 1]} : vector<4x64xf32> to vector<1x64xf32>
    %c3_87 = arith.constant 3 : index
    %c0_88 = arith.constant 0 : index
    %c0_89 = arith.constant 0 : index
    %103 = vector.load %arg10[%c3_87, %c0_88, %c0_89] : memref<4x64x128xf32, #tpu.memory_space<vmem>>, vector<1x64x128xf32>
    %104 = vector.shape_cast %103 : vector<1x64x128xf32> to vector<64x128xf32>
    %cst_90 = arith.constant dense<0.000000e+00> : vector<1x128xf32>
    %105 = tpu.matmul %102, %104, %cst_90 {dimension_numbers = #tpu.dot_dimension_numbers<[1], [0], [0], [1], [0, 0, 1, 1], [], []>, precision = #tpu.contract_precision<fp32>} : vector<1x64xf32>, vector<64x128xf32>, vector<1x128xf32> -> vector<1x128xf32>
    %106 = arith.addf %101, %105 : vector<1x128xf32>
    %c0_91 = arith.constant 0 : index
    %c0_92 = arith.constant 0 : index
    %107 = vector.load %arg11[%c0_91, %c0_92] : memref<1x128xf32, #tpu.memory_space<vmem>>, vector<1x128xf32>
    %108 = arith.addf %106, %107 : vector<1x128xf32>
    %cst_93 = arith.constant 0.000000e+00 : f32
    %109 = vector.broadcast %cst_93 : f32 to vector<1x128xf32>
    %110 = arith.maximumf %108, %109 : vector<1x128xf32>
    %111 = vector.shape_cast %110 : vector<1x128xf32> to vector<1x128xf32>
    %112 = vector.broadcast %111 : vector<1x128xf32> to vector<8x128xf32>
    %c0_94 = arith.constant 0 : index
    %c0_95 = arith.constant 0 : index
    %c0_96 = arith.constant 0 : index
    %113 = vector.load %arg12[%c0_94, %c0_95, %c0_96] : memref<1x8x128xf32, #tpu.memory_space<vmem>>, vector<1x8x128xf32>
    %114 = vector.shape_cast %113 : vector<1x8x128xf32> to vector<8x128xf32>
    %115 = vector.shape_cast %112 : vector<8x128xf32> to vector<1x8x128xf32>
    tpu.vector_store %arg12[%c0_94, %c0_95, %c0_96], %115 {strides = array<i32>} : memref<1x8x128xf32, #tpu.memory_space<vmem>>, vector<1x8x128xf32>,
    return
  }
  func.func @transform_0(%arg0: i32) -> (i32, i32, i32) {
    %c0_i32 = arith.constant 0 : i32
    %c0_i32_0 = arith.constant 0 : i32
    %c0_i32_1 = arith.constant 0 : i32
    return %arg0, %c0_i32, %c0_i32_0 : i32, i32, i32
  }
  func.func @transform_1(%arg0: i32) -> (i32, i32, i32) {
    %c0_i32 = arith.constant 0 : i32
    %c0_i32_0 = arith.constant 0 : i32
    %c0_i32_1 = arith.constant 0 : i32
    %c0_i32_2 = arith.constant 0 : i32
    return %c0_i32, %c0_i32_0, %c0_i32_1 : i32, i32, i32
  }
  func.func @transform_2(%arg0: i32) -> (i32, i32) {
    %c0_i32 = arith.constant 0 : i32
    %c0_i32_0 = arith.constant 0 : i32
    %c0_i32_1 = arith.constant 0 : i32
    return %c0_i32, %c0_i32_0 : i32, i32
  }
  func.func @transform_3(%arg0: i32) -> (i32, i32, i32) {
    %c0_i32 = arith.constant 0 : i32
    %c0_i32_0 = arith.constant 0 : i32
    %c0_i32_1 = arith.constant 0 : i32
    %c0_i32_2 = arith.constant 0 : i32
    return %c0_i32, %c0_i32_0, %c0_i32_1 : i32, i32, i32
  }
  func.func @transform_4(%arg0: i32) -> (i32, i32, i32) {
    %c0_i32 = arith.constant 0 : i32
    %c0_i32_0 = arith.constant 0 : i32
    %c0_i32_1 = arith.constant 0 : i32
    %c0_i32_2 = arith.constant 0 : i32
    return %c0_i32, %c0_i32_0, %c0_i32_1 : i32, i32, i32
  }
  func.func @transform_5(%arg0: i32) -> (i32, i32, i32) {
    %c0_i32 = arith.constant 0 : i32
    %c0_i32_0 = arith.constant 0 : i32
    %c0_i32_1 = arith.constant 0 : i32
    %c0_i32_2 = arith.constant 0 : i32
    return %c0_i32, %c0_i32_0, %c0_i32_1 : i32, i32, i32
  }
  func.func @transform_6(%arg0: i32) -> (i32, i32) {
    %c0_i32 = arith.constant 0 : i32
    %c0_i32_0 = arith.constant 0 : i32
    %c0_i32_1 = arith.constant 0 : i32
    return %c0_i32, %c0_i32_0 : i32, i32
  }
  func.func @transform_7(%arg0: i32) -> (i32, i32, i32) {
    %c0_i32 = arith.constant 0 : i32
    %c0_i32_0 = arith.constant 0 : i32
    %c0_i32_1 = arith.constant 0 : i32
    %c0_i32_2 = arith.constant 0 : i32
    return %c0_i32, %c0_i32_0, %c0_i32_1 : i32, i32, i32
  }
  func.func @transform_8(%arg0: i32) -> (i32, i32, i32) {
    %c0_i32 = arith.constant 0 : i32
    %c0_i32_0 = arith.constant 0 : i32
    %c0_i32_1 = arith.constant 0 : i32
    %c0_i32_2 = arith.constant 0 : i32
    return %c0_i32, %c0_i32_0, %c0_i32_1 : i32, i32, i32
  }
  func.func @transform_9(%arg0: i32) -> (i32, i32, i32) {
    %c0_i32 = arith.constant 0 : i32
    %c0_i32_0 = arith.constant 0 : i32
    %c0_i32_1 = arith.constant 0 : i32
    %c0_i32_2 = arith.constant 0 : i32
    return %c0_i32, %c0_i32_0, %c0_i32_1 : i32, i32, i32
  }
  func.func @transform_10(%arg0: i32) -> (i32, i32) {
    %c0_i32 = arith.constant 0 : i32
    %c0_i32_0 = arith.constant 0 : i32
    %c0_i32_1 = arith.constant 0 : i32
    return %c0_i32, %c0_i32_0 : i32, i32
  }
  func.func @transform_11(%arg0: i32) -> (i32, i32, i32) {
    %c0_i32 = arith.constant 0 : i32
    %c0_i32_0 = arith.constant 0 : i32
    %c0_i32_1 = arith.constant 0 : i32
    return %arg0, %c0_i32, %c0_i32_0 : i32, i32, i32
  }
}

</mosaic_0001>

<bundles_post_ra>
// kernel: f1_forward.1
= control target key start
LH: loop header
LB: loop body
LE: loop exit
PB: predicated region body
PF: predicated region fallthrough
CT: control target
= control target key end

     0   :  { %16 = vsyncpa [#allocation3], 0  ;;  %s12975_s0 = inlined_call_operand.vmem [shape: f32[2,28,28], index: 0, kind: input, shape index: {}]   ;;  %s12976_s1 = inlined_call_operand.hbm [shape: f32[5,28,144], index: 1, kind: input, shape index: {}]   ;;  %s12977_s2 = inlined_call_operand.vmem [shape: f32[1,144], index: 2, kind: input, shape index: {}]   ;;  %s12978_s3 = inlined_call_operand.vmem [shape: f32[2,12,24], index: 3, kind: input, shape index: {}]   ;;  %s12979_s4 = inlined_call_operand.hbm [shape: f32[2,144,72], index: 4, kind: input, shape index: {}]   ;;  %s12980_s5 = inlined_call_operand.vmem [shape: f32[5,72,128], index: 5, kind: input, shape index: {}]   ;;  %s12981_s6 = inlined_call_operand.vmem [shape: f32[1,128], index: 6, kind: input, shape index: {}]   ;;  %s12982_s7 = inlined_call_operand.vmem [shape: f32[2,4,8], index: 7, kind: input, shape index: {}]   ;;  %s12983_s8 = inlined_call_operand.vmem [shape: f32[2,128,64], index: 8, kind: input, shape index: {}]   ;;  %s12984_s9 = inlined_call_operand.hbm [shape: f32[4,64,128], index: 9, kind: input, shape index: {}]   ;;  %s12985_s10 = inlined_call_operand.vmem [shape: f32[1,128], index: 10, kind: input, shape index: {}]   ;;  %s12986_s11 = inlined_call_operand.vmem [shape: f32[2,8,128], index: 11, kind: output, shape index: {}]  }
   0x1   :  { %17 = vsyncpa [#allocation5], 0  ;;  %s8822_s17 = smov 0  }
   0x2 LB: > { %s321_s20 = sshll.u32 %s12979_s4, 4  ;;  %s8831_s21 = sadd.s32 4294967295, %s8753_s17   ;;  %s8753_s17 = sphi %s8822_s17, %s23_s17   ;;  %s322_s20 = int_to_ptr.hbm [resolvable:$true] %s321_s20 }
   0x3   : > { %p8531_p0 = scmp.ge.s32.totalorder %s8753_s17, 1  ;;  %p290_p1 = scmp.lt.s32.totalorder %s8753_s17, 3 }
   0x4   : > { %p8623_p2 = scmp.eq.s32.totalorder %s8831_s21, 0  ;;  %s8755_s23 = smov [#allocation4]  }
   0x5   : > { %p8836_p3 = pnand %p8531_p0, %p290_p1  ;;  %s323_s24 = sshll.u32 %s8755_s23, 4  ;;  %s324_s24 = int_to_ptr.vmem [resolvable:$true] %s323_s24 }
   0x6   : > { %s301_s27 = sshll.u32 %s12976_s1, 4  ;;  %s8756_s29 = smov [#allocation2]   ;;  %s302_s27 = int_to_ptr.hbm [resolvable:$true] %s301_s27 }
   0x7   : > { %p8613_p4 = pneg %p8836_p3  ;;  %s303_s30 = sshll.u32 %s8756_s29, 4  ;;  %s304_s30 = int_to_ptr.vmem [resolvable:$true] %s303_s30 }
   0x8   : > { %s8757_s12 = smov 128   ;;  %s8758_s13 = smov 8  }
   0x9   : > { %p8847_p5 = pnand %p8623_p2, %p8613_p4  ;;  %s347_s16 = sshll.u32 %s12984_s9, 4  ;;  %s348_s16 = int_to_ptr.hbm [resolvable:$true] %s347_s16 }
   0xa   : > { %s8759_s18 = smov 256   ;;  %s8760_s19 = smov 16  }
   0xb   : > { %8619 = dma.hbm_to_vmem [thread:$0]  (!%p8847_p5), %s322_s20, 4608, %s324_s24, [#allocation5], %s8757_s12, %s8757_s12, %s8758_s13  }
   0xc   : > { %8616 = dma.hbm_to_vmem [thread:$0]  (!%p8847_p5), %s302_s27, 5120, %s304_s30, [#allocation3], %s8759_s18, %s8759_s18, %s8760_s19  }
   0xd   : > { %s8761_s23 = smov [#allocation6]   ;;  %376 = sbr.rel (%p8836_p3) target bundleno = 1858 (0x742), region = 64 }
   0xe   : > { %s349_s25 = sshll.u32 %s8761_s23, 4  ;;  %s350_s25 = int_to_ptr.vmem [resolvable:$true] %s349_s25 }
   0xf   : > { %8622 = dma.hbm_to_vmem [thread:$0]  (!%p8847_p5), %s348_s16, 4096, %s350_s25, [#allocation5], %s8757_s12, %s8757_s12, %s8758_s13  }
  0x12   : > { %8744 = dma.done.wait (%p8623_p2), [#allocation3], 5120  }
  0x13   : > { %8746 = vsyncadd (%p8623_p2), [#allocation3], 4294962176 }
  0x14   : > { %8748 = dma.done.wait (%p8623_p2), [#allocation5], 8704  }
  0x15   : > { %8750 = vsyncadd (%p8623_p2), [#allocation5], 4294958592  ;;  %p426_p6 = scmp.lt.s32.totalorder %s8831_s21, 1  ;;  %vm475_vm0 = vcmask 1043456   ;;  %v454_v0 = vld [vmem:[#allocation2 + $0x70] sm:$0xf] }
  0x16   : > { %v452_v1 = vld [vmem:[#allocation2 + $0x60] sm:$0xff]  ;;  %v450_v2 = vld [vmem:[#allocation2 + $0x50] sm:$0xff]  ;;  %vm460_vm1 = vcmask 1046528   ;;  %vm468_vm2 = vcmask 228352   ;;  %v477_v3 = vsel %vm475_vm0, %v454_v0, 0  ;;  %v453_v35 = vld [vmem:[#allocation2 + $0x68] sm:$0xff] }
  0x17   : > { %s13111_s21 = smov (!%p426_p6, %s8831_s21), 1  ;;  %v8881_v4 = vand.u32 4294901760, %v452_v1  ;;  %v8883_v5 = vand.u32 4294901760, %v450_v2  ;;  %v448_v6 = vld [vmem:[#allocation2 + $0x40] sm:$0xff]  ;;  %v8891_v9 = vand.u32 4294901760, %v477_v3  ;;  %v451_v40 = vld [vmem:[#allocation2 + $0x58] sm:$0xff] }
  0x18   : > { %s8600_s20 = sshll.u32 %s13111_s21, 5  ;;  %v8893_v10 = vand.u32 4294901760, %v448_v6  ;;  %v455_v20 = vld [vmem:[#allocation2 + $0x78] sm:$0xf]  ;;  %v449_v41 = vld [vmem:[#allocation2 + $0x48] sm:$0xff]  ;;  %v8954_v48 = vand.u32 4294901760, %v453_v35 }
  0x19   : > { %s8878_s26 = scalar_lea.vmem %s12975_s0, %s8600_s20  ;;  %v8898_v13 = vsub.f32 %v452_v1, %v8881_v4  ;;  %v8901_v14 = vsub.f32 %v450_v2, %v8883_v5  ;;  %v540_v16 = vsub.f32 %v477_v3, %v8891_v9  ;;  %495 = vmatpush.msra.mxu0 %v8891_v9  ;;  %629 = vmatpush.msra.mxu3 %v8891_v9  ;;  %v480_v31 = vsel %vm475_vm0, %v455_v20, 0  ;;  %s8542_s29 = sshll.u32 %s13111_s21, 3 }
  0x1a   : > { %v8886_v7 = vld [vmem:[%s8878_s26] sm:$0xff]  ;;  %v8889_v8 = vld [vmem:[%s8878_s26 + $0x8] sm:$0xff]  ;;  %v8904_v15 = vld [vmem:[%s8878_s26 + $0x10] sm:$0xff]  ;;  %v8910_v17 = vsub.f32 %v448_v6, %v8893_v10  ;;  %v8936_v34 = vand.u32 4294901760, %v480_v31  ;;  %v8962_v52 = vand.u32 4294901760, %v451_v40  ;;  %v8964_v53 = vand.u32 4294901760, %v449_v41  ;;  %s434_s13 = scalar_lea.vmem %s12986_s11, %s8542_s29 }
  0x1b   : > { %v461_v11 = vrot.slane %v8886_v7, 1  ;;  %v462_v12 = vrot.slane %v8889_v8, 1  ;;  %v8914_v19 = vld [vmem:[%s8878_s26 + $0x18] sm:$0xf]  ;;  %v547_v22 = vand.u32 4294901760, %v8898_v13  ;;  %v553_v23 = vand.u32 4294901760, %v8901_v14  ;;  %590 = vmatpush.msra.mxu2 %v540_v16  ;;  %497 = vmatpush.msra.mxu0 %v8881_v4 }
  0x1c   : > { %v541_v24 = vand.u32 4294901760, %v540_v16  ;;  %v559_v26 = vand.u32 4294901760, %v8910_v17  ;;  %v464_v27 = vrot.slane %v8904_v15, 1  ;;  %631 = vmatpush.msra.mxu3 %v8881_v4  ;;  %v466_v30 = vrot.slane %v8914_v19, 1 }
  0x1d   : > { %v463_v18 = vsel %vm460_vm1, %v461_v11, %v462_v12  ;;  %v548_v28 = vsub.f32 %v8898_v13, %v547_v22  ;;  %v554_v29 = vsub.f32 %v8901_v14, %v553_v23  ;;  %593 = vmatpush.msra.mxu2 %v8898_v13  ;;  %499 = vmatpush.msra.mxu0 %v8883_v5  ;;  %vm1491_vm3 = vcmask 1045504  }
  0x1e   : > { %v469_v21 = vsel %vm468_vm2, %v463_v18, 0  ;;  %v542_v32 = vsub.f32 %v540_v16, %v541_v24  ;;  %633 = vmatpush.msra.mxu3 %v8883_v5  ;;  %v560_v37 = vsub.f32 %v8910_v17, %v559_v26  ;;  %v465_v38 = vsel %vm460_vm1, %v462_v12, %v464_v27 }
  0x1f   : > { %v8920_v25 = vand.u32 4294901760, %v469_v21  ;;  %v549_v36 = vand.u32 4294901760, %v548_v28  ;;  %v467_v39 = vsel %vm460_vm1, %v464_v27, %v466_v30  ;;  %596 = vmatpush.msra.mxu2 %v8901_v14  ;;  %501 = vmatpush.msra.mxu0 %v8893_v10  ;;  %v555_v44 = vand.u32 4294901760, %v554_v29  ;;  %v439_v30 = vld [vmem:[#allocation2] sm:$0xff] }
  0x20   : > { %v543_v42 = vand.u32 4294901760, %v542_v32  ;;  %v471_v45 = vsel %vm468_vm2, %v465_v38, 0  ;;  %635 = vmatpush.msra.mxu3 %v8893_v10  ;;  %v473_v47 = vsel %vm468_vm2, %v467_v39, 0  ;;  %v787_v49 = vsub.f32 %v480_v31, %v8936_v34 }
  0x21   : > { %v8934_v33 = vsub.f32 %v469_v21, %v8920_v25  ;;  %v8951_v46 = vand.u32 4294901760, %v471_v45  ;;  %670 = vmatpush.msrb.mxu0 %v541_v24  ;;  %599 = vmatpush.msra.mxu2 %v8910_v17  ;;  %v8960_v51 = vand.u32 4294901760, %v473_v47  ;;  %v793_v56 = vsub.f32 %v453_v35, %v8954_v48  ;;  %v443_v17 = vld [vmem:[#allocation2 + $0x20] sm:$0xff] }
  0x22   : > { %544 = vmatpush.msra.mxu1 %v543_v42  ;;  %v788_v55 = vand.u32 4294901760, %v787_v49  ;;  %v561_v58 = vand.u32 4294901760, %v560_v37  ;;  %v799_v59 = vsub.f32 %v451_v40, %v8962_v52  ;;  %v805_v60 = vsub.f32 %v449_v41, %v8964_v53 }
  0x23   : > { %v8947_v43 = vand.u32 4294901760, %v8934_v33  ;;  %602 = vmatmul.f32.vlgmr.msra.gmra.mxu2 %v8934_v33  ;;  %v8969_v54 = vsub.f32 %v471_v45, %v8951_v46  ;;  %674 = vmatpush.msrb.mxu0 %v547_v22  ;;  %v794_v63 = vand.u32 4294901760, %v793_v56  ;;  %v8982_v0 = vsub.f32 %v473_v47, %v8960_v51 }
  0x24   : > { %550 = vmatpush.msra.mxu1 %v549_v36  ;;  %742 = vmatpush.msrb.mxu2 %v8936_v34  ;;  %v789_v62 = vsub.f32 %v787_v49, %v788_v55  ;;  %v800_v1 = vand.u32 4294901760, %v799_v59  ;;  %v806_v2 = vand.u32 4294901760, %v805_v60  ;;  %v9026_v24 = vand.u32 4294901760, %v443_v17 }
  0x25   : > { %v505_v50 = vsub.f32 %v8934_v33, %v8947_v43  ;;  %639 = vmatmul.f32.vlgmr.msra.gmra.mxu3 %v8947_v43  ;;  %v8978_v61 = vand.u32 4294901760, %v8969_v54  ;;  %v795_v11 = vsub.f32 %v793_v56, %v794_v63  ;;  %678 = vmatpush.msrb.mxu0 %v553_v23  ;;  %v8991_v20 = vand.u32 4294901760, %v8982_v0 }
  0x26   : > { %556 = vmatpush.msra.mxu1 %v555_v44  ;;  %744 = vmatpush.msrb.mxu2 %v8954_v48  ;;  %v790_v6 = vand.u32 4294901760, %v789_v62  ;;  %v801_v12 = vsub.f32 %v799_v59, %v800_v1  ;;  %v807_v13 = vsub.f32 %v805_v60, %v806_v2  ;;  %v1052_v27 = vsub.f32 %v443_v17, %v9026_v24 }
  0x27   : > { %v8972_v57 = vand.u32 4294901760, %v505_v50  ;;  %v513_v3 = vsub.f32 %v8969_v54, %v8978_v61  ;;  %v796_v16 = vand.u32 4294901760, %v795_v11  ;;  %682 = vmatpush.msrb.mxu0 %v559_v26  ;;  %v521_v22 = vsub.f32 %v8982_v0, %v8991_v20  ;;  %v441_v26 = vld [vmem:[#allocation2 + $0x10] sm:$0xff] }
  0x28   : > { %562 = vmatpush.msra.mxu1 %v561_v58  ;;  %791 = vmatpush.msrb.mxu3 %v790_v6  ;;  %v802_v21 = vand.u32 4294901760, %v801_v12  ;;  %v808_v14 = vand.u32 4294901760, %v807_v13  ;;  %v9031_v28 = vand.u32 4294901760, %v441_v26  ;;  %v1053_v35 = vand.u32 4294901760, %v1052_v27 }
  0x29   : > { %507 = vmatmul.f32.vlgmr.msra.gmra.mxu0 %v8972_v57  ;;  %564 = vmatmul.f32.vlgmr.msra.gmra.mxu1 %v8920_v25  ;;  %v514_v18 = vand.u32 4294901760, %v513_v3  ;;  %v978_v12 = vsel %vm468_vm2, %v8889_v8, 0  ;;  %vm2020_vm4 = vcmask 1044480   ;;  %vm3088_vm5 = vcmask 195584  }
  0x2a   : > { %746 = vmatpush.msrb.mxu2 %v8962_v52  ;;  %709 = vmatpush.msrb.mxu1 %v8891_v9  ;;  %v522_v9 = vand.u32 4294901760, %v521_v22  ;;  %v1058_v31 = vsub.f32 %v441_v26, %v9031_v28  ;;  %v1054_v38 = vsub.f32 %v1052_v27, %v1053_v35  ;;  %v9097_v22 = vand.u32 4294901760, %v978_v12 }
  0x2b   : > { %607 = vmatmul.f32.gmra.mxu2 %v8969_v54  ;;  %797 = vmatpush.msrb.mxu3 %v796_v16  ;;  %vm3938_vm6 = vcmask 130048   ;;  %vm5114_vm7 = vcmask 588800   ;;  %vm6424_vm8 = vcmask 64512   ;;  %vm7461_vm9 = vcmask 523264  }
  0x2c   : > { %748 = vmatpush.msrb.mxu2 %v8964_v53  ;;  %711 = vmatpush.msrb.mxu1 %v8881_v4  ;;  %v445_v4 = vld [vmem:[#allocation2 + $0x30] sm:$0xf]  ;;  %v1059_v39 = vand.u32 4294901760, %v1058_v31  ;;  %v1055_v40 = vand.u32 4294901760, %v1054_v38 }
  0x2d   : > { %645 = vmatmul.f32.gmra.mxu3 %v8978_v61  ;;  %837 = vmatpush.msra.mxu0 %v787_v49 }
  0x2e   : > { %803 = vmatpush.msrb.mxu3 %v802_v21  ;;  %713 = vmatpush.msrb.mxu1 %v8883_v5  ;;  %v983_v5 = vsel %vm475_vm0, %v445_v4, 0  ;;  %v1060_v41 = vsub.f32 %v1058_v31, %v1059_v39  ;;  %v9106_v4 = vsub.f32 %v978_v12, %v9097_v22  ;;  %v1484_v12 = vld [vmem:[#allocation2 + $0x88] sm:$0xff] }
  0x2f   : > { %917 = vmatpush.msra.mxu2 %v788_v55  ;;  %840 = vmatpush.msra.mxu0 %v793_v56 }
  0x30   : > { %809 = vmatpush.msrb.mxu3 %v808_v14  ;;  %715 = vmatpush.msrb.mxu1 %v8893_v10  ;;  %v9022_v10 = vand.u32 4294901760, %v983_v5  ;;  %v1061_v44 = vand.u32 4294901760, %v1060_v41  ;;  %v9112_v17 = vand.u32 4294901760, %v9106_v4 }
  0x31   : > { %515 = vmatmul.f32.gmra.mxu0 %v514_v18  ;;  %568 = vmatmul.f32.gmra.mxu1 %v8951_v46 }
  0x32   : > { %921 = vmatpush.msra.mxu2 %v794_v63  ;;  %956 = vmatpush.msra.mxu3 %v8936_v34  ;;  %v1046_v23 = vsub.f32 %v983_v5, %v9022_v10  ;;  %v980_v5 = vsel %vm468_vm2, %v8904_v15, 0 }
  0x33   : > { %612 = vmatmul.f32.gmra.mxu2 %v8982_v0  ;;  %876 = vmatpush.msra.mxu1 %v8936_v34  ;;  %v9037_v34 = vand.u32 4294901760, %v439_v30 }
  0x34   : > { %925 = vmatpush.msra.mxu2 %v800_v1  ;;  %958 = vmatpush.msra.mxu3 %v8954_v48  ;;  %v1047_v29 = vand.u32 4294901760, %v1046_v23 }
  0x35   : > { %651 = vmatmul.f32.gmra.mxu3 %v8991_v20  ;;  %843 = vmatpush.msra.mxu0 %v799_v59  ;;  %v9042_v37 = vsub.f32 %v439_v30, %v9037_v34 }
  0x36   : > { %929 = vmatpush.msra.mxu2 %v806_v2  ;;  %960 = vmatpush.msra.mxu3 %v8962_v52  ;;  %v1048_v32 = vsub.f32 %v1046_v23, %v1047_v29 }
  0x37   : > { %878 = vmatpush.msra.mxu1 %v8954_v48  ;;  %846 = vmatpush.msra.mxu0 %v805_v60  ;;  %v1065_v42 = vand.u32 4294901760, %v9042_v37  ;;  %v446_v48 = vld [vmem:[#allocation2 + $0x38] sm:$0xf]  ;;  %v440_v60 = vld [vmem:[#allocation2 + $0x8] sm:$0xff] }
  0x38   : > { %962 = vmatpush.msra.mxu3 %v8964_v53  ;;  %v1049_v36 = vand.u32 4294901760, %v1048_v32  ;;  %v986_v49 = vsel %vm475_vm0, %v446_v48, 0  ;;  %v9079_v63 = vand.u32 4294901760, %v440_v60 }
  0x39   : > { %523 = vmatmul.f32.gmra.mxu0 %v522_v9  ;;  %572 = vmatmul.f32.gmra.mxu1 %v8960_v51  ;;  %v1066_v45 = vsub.f32 %v9042_v37, %v1065_v42  ;;  %v9056_v50 = vand.u32 4294901760, %v986_v49 }
  0x3a   : > { %880 = vmatpush.msra.mxu1 %v8962_v52  ;;  %v444_v52 = vld [vmem:[#allocation2 + $0x28] sm:$0xff]  ;;  %v1311_v11 = vsub.f32 %v440_v60, %v9079_v63 }
  0x3b   : > { %754 = vmatmul.f32.vlgmr.msrb.gmra.mxu2 %v8972_v57  ;;  %v1067_v47 = vand.u32 4294901760, %v1066_v45  ;;  %v9063_v55 = vsub.f32 %v986_v49, %v9056_v50  ;;  %v9065_v56 = vand.u32 4294901760, %v444_v52 }
  0x3c   : > { %882 = vmatpush.msra.mxu1 %v8964_v53  ;;  %1096 = vmatpush.msrb.mxu2 %v1046_v23  ;;  %v976_v53 = vsel %vm468_vm2, %v8886_v7, 0 }
  0x3d   : > { %811 = vmatmul.f32.vlgmr.msrb.gmra.mxu3 %v8920_v25  ;;  %v1294_v57 = vand.u32 4294901760, %v9063_v55  ;;  %v1299_v58 = vsub.f32 %v444_v52, %v9065_v56  ;;  %v9073_v59 = vand.u32 4294901760, %v976_v53 }
  0x3e   : > { %1135 = vmatpush.msrb.mxu3 %v9022_v10  ;;  %1099 = vmatpush.msrb.mxu2 %v1052_v27 }
  0x3f   : > { %v1300_v62 = vand.u32 4294901760, %v1299_v58 }
  0x40   : > { %1137 = vmatpush.msrb.mxu3 %v9026_v24  ;;  %1102 = vmatpush.msrb.mxu2 %v1058_v31  ;;  %v1487_v31 = vld [vmem:[#allocation2 + $0xa0] sm:$0xff] }
  0x41   : > { %684 = vmatmul.f32.vlgmr.msrb.gmra.mxu0 %v8920_v25  ;;  %717 = vmatmul.f32.vlgmr.msrb.gmra.mxu1 %v8920_v25  ;;  %v1301_v3 = vsub.f32 %v1299_v58, %v1300_v62 }
  0x42   : > { %1001 = vmatpush.msrb.mxu0 %v9022_v10  ;;  %1139 = vmatpush.msrb.mxu3 %v9031_v28 }
  0x43   : > { %762 = vmatmul.f32.gmra.mxu2 %v514_v18  ;;  %1050 = vmatpush.msrb.mxu1 %v1049_v36  ;;  %v1302_v13 = vand.u32 4294901760, %v1301_v3  ;;  %v1312_v18 = vand.u32 4294901760, %v1311_v11 }
  0x44   : > { %1003 = vmatpush.msrb.mxu0 %v9026_v24  ;;  %1141 = vmatpush.msrb.mxu3 %v9037_v34 }
  0x45   : > { %815 = vmatmul.f32.gmra.mxu3 %v8951_v46  ;;  %1105 = vmatpush.msrb.mxu2 %v9042_v37 }
  0x46   : > { %1005 = vmatpush.msrb.mxu0 %v9031_v28  ;;  %1056 = vmatpush.msrb.mxu1 %v1055_v40 }
  0x48   : > { %1007 = vmatpush.msrb.mxu0 %v9037_v34  ;;  %1062 = vmatpush.msrb.mxu1 %v1061_v44 }
  0x49   : > { %688 = vmatmul.f32.gmra.mxu0 %v8951_v46  ;;  %721 = vmatmul.f32.gmra.mxu1 %v8951_v46 }
  0x4a   : > { %1068 = vmatpush.msrb.mxu1 %v1067_v47 }
  0x4b   : > { %770 = vmatmul.f32.gmra.mxu2 %v522_v9 }
  0x4d   : > { %819 = vmatmul.f32.gmra.mxu3 %v8960_v51 }
  0x51   : > { %692 = vmatmul.f32.gmra.mxu0 %v8960_v51  ;;  %725 = vmatmul.f32.gmra.mxu1 %v8960_v51 }
  0x53   : > { %931 = vmatmul.f32.vlgmr.msra.gmra.mxu2 %v8920_v25 }
  0x54   : > { %1248 = vmatpush.msra.mxu2 %v9056_v50 }
  0x55   : > { %964 = vmatmul.f32.vlgmr.msra.gmra.mxu3 %v8920_v25  ;;  %v442_v25 = vld [vmem:[#allocation2 + $0x18] sm:$0xff] }
  0x56   : > { %1250 = vmatpush.msra.mxu2 %v9065_v56 }
  0x59   : > { %849 = vmatmul.f32.vlgmr.msra.gmra.mxu0 %v8934_v33  ;;  %886 = vmatmul.f32.vlgmr.msra.gmra.mxu1 %v8947_v43  ;;  %v9070_v33 = vand.u32 4294901760, %v442_v25  ;;  %v1295_v43 = vsub.f32 %v9063_v55, %v1294_v57 }
  0x5a   : > { %1176 = vmatpush.msra.mxu0 %v1047_v29  ;;  %1215 = vmatpush.msra.mxu1 %v9022_v10 }
  0x5b   : > { %935 = vmatmul.f32.gmra.mxu2 %v8951_v46  ;;  %v1305_v1 = vsub.f32 %v442_v25, %v9070_v33  ;;  %v1296_v2 = vand.u32 4294901760, %v1295_v43 }
  0x5c   : > { %1180 = vmatpush.msra.mxu0 %v1053_v35  ;;  %1252 = vmatpush.msra.mxu2 %v9070_v33  ;;  %v1485_v35 = vld [vmem:[#allocation2 + $0x90] sm:$0xff] }
  0x5d   : > { %968 = vmatmul.f32.gmra.mxu3 %v8951_v46  ;;  %v1306_v6 = vand.u32 4294901760, %v1305_v1  ;;  %1217 = vmatpush.msra.mxu1 %v9026_v24  ;;  %v9087_v46 = vsub.f32 %v976_v53, %v9073_v59  ;;  %v9157_v37 = vand.u32 4294901760, %v1485_v35 }
  0x5e   : > { %1184 = vmatpush.msra.mxu0 %v1059_v39  ;;  %1254 = vmatpush.msra.mxu2 %v9079_v63  ;;  %v1483_v39 = vld [vmem:[#allocation2 + $0x80] sm:$0xff] }
  0x5f   : > { %1297 = vmatpush.msra.mxu3 %v1296_v2  ;;  %v1307_v16 = vsub.f32 %v1305_v1, %v1306_v6  ;;  %1219 = vmatpush.msra.mxu1 %v9031_v28  ;;  %v9095_v14 = vand.u32 4294901760, %v9087_v46  ;;  %v1489_v28 = vld [vmem:[#allocation2 + $0xb0] sm:$0xf]  ;;  %v9163_v41 = vsub.f32 %v1485_v35, %v9157_v37  ;;  %v1486_v2 = vld [vmem:[#allocation2 + $0x98] sm:$0xff] }
  0x60   : > { %1188 = vmatpush.msra.mxu0 %v1065_v42  ;;  %v1506_v29 = vsel %vm475_vm0, %v1489_v28, 0  ;;  %v9165_v42 = vand.u32 4294901760, %v1483_v39 }
  0x61   : > { %854 = vmatmul.f32.gmra.mxu0 %v8969_v54  ;;  %892 = vmatmul.f32.gmra.mxu1 %v8978_v61  ;;  %v1308_v21 = vand.u32 4294901760, %v1307_v16  ;;  %v1313_v54 = vsub.f32 %v1311_v11, %v1312_v18  ;;  %v1011_v61 = vsub.f32 %v9087_v46, %v9095_v14  ;;  %v9148_v30 = vand.u32 4294901760, %v1506_v29 }
  0x62   : > { %1303 = vmatpush.msra.mxu3 %v1302_v13  ;;  %1221 = vmatpush.msra.mxu1 %v9037_v34  ;;  %v9152_v34 = vand.u32 4294901760, %v1487_v31  ;;  %v9171_v48 = vsub.f32 %v1483_v39, %v9165_v42  ;;  %v1582_v49 = vand.u32 4294901760, %v9163_v41 }
  0x63   : > { %939 = vmatmul.f32.gmra.mxu2 %v8960_v51  ;;  %v1314_v9 = vand.u32 4294901760, %v1313_v54  ;;  %v1012_v10 = vand.u32 4294901760, %v1011_v61  ;;  %v1569_v32 = vsub.f32 %v1506_v29, %v9148_v30  ;;  %v9224_v54 = vand.u32 4294901760, %v1484_v12 }
  0x64   : > { %1309 = vmatpush.msra.mxu3 %v1308_v21  ;;  %v1575_v36 = vsub.f32 %v1487_v31, %v9152_v34  ;;  %v1583_v52 = vsub.f32 %v9163_v41, %v1582_v49  ;;  %v1588_v53 = vand.u32 4294901760, %v9171_v48 }
  0x65   : > { %972 = vmatmul.f32.gmra.mxu3 %v8960_v51  ;;  %v9114_v51 = vand.u32 4294901760, %v980_v5  ;;  %v1570_v38 = vand.u32 4294901760, %v1569_v32  ;;  %v9233_v61 = vsub.f32 %v1484_v12, %v9224_v54 }
  0x66   : > { %1315 = vmatpush.msra.mxu3 %v1314_v9  ;;  %v1576_v44 = vand.u32 4294901760, %v1575_v36 }
  0x67   : > { %v9122_v23 = vsub.f32 %v980_v5, %v9114_v51  ;;  %v1571_v40 = vsub.f32 %v1569_v32, %v1570_v38 }
  0x68   : > { %v1577_v47 = vsub.f32 %v1575_v36, %v1576_v44 }
  0x69   : > { %859 = vmatmul.f32.gmra.mxu0 %v8982_v0  ;;  %898 = vmatmul.f32.gmra.mxu1 %v8991_v20  ;;  %v1019_v0 = vsub.f32 %v9106_v4, %v9112_v17  ;;  %v9128_v24 = vand.u32 4294901760, %v9122_v23  ;;  %v1572_v45 = vand.u32 4294901760, %v1571_v40 }
  0x6b   : > { %1108 = vmatmul.f32.vlgmr.msrb.gmra.mxu2 %v9087_v46  ;;  %v1020_v20 = vand.u32 4294901760, %v1019_v0  ;;  %v1027_v26 = vsub.f32 %v9122_v23, %v9128_v24 }
  0x6c   : > { %1423 = vmatpush.msrb.mxu2 %v1294_v57  ;;  %v1492_v57 = vrot.slane %v8886_v7, 2  ;;  %v1495_v7 = vrot.slane %v8904_v15, 2  ;;  %v9208_v15 = vand.u32 4294901760, %v1486_v2 }
  0x6d   : > { %1145 = vmatmul.f32.vlgmr.msrb.gmra.mxu3 %v9095_v14  ;;  %v1028_v27 = vand.u32 4294901760, %v1027_v26 }
  0x6e   : > { %1462 = vmatpush.msrb.mxu3 %v9056_v50  ;;  %1427 = vmatpush.msrb.mxu2 %v1300_v62  ;;  %v9222_v21 = vsub.f32 %v1486_v2, %v9208_v15 }
  0x70   : > { %1464 = vmatpush.msrb.mxu3 %v9065_v56  ;;  %1431 = vmatpush.msrb.mxu2 %v1306_v6 }
  0x71   : > { %1013 = vmatmul.f32.vlgmr.msrb.gmra.mxu0 %v1012_v10  ;;  %1070 = vmatmul.f32.vlgmr.msrb.gmra.mxu1 %v9073_v59 }
  0x72   : > { %1343 = vmatpush.msrb.mxu0 %v9063_v55  ;;  %1382 = vmatpush.msrb.mxu1 %v9056_v50  ;;  %v1578_v50 = vand.u32 4294901760, %v1577_v47  ;;  %v1584_v55 = vand.u32 4294901760, %v1583_v52 }
  0x73   : > { %1466 = vmatpush.msrb.mxu3 %v9070_v33  ;;  %1113 = vmatmul.f32.gmra.mxu2 %v9106_v4 }
  0x74   : > { %1346 = vmatpush.msrb.mxu0 %v1299_v58  ;;  %1384 = vmatpush.msrb.mxu1 %v9065_v56  ;;  %v1589_v56 = vsub.f32 %v9171_v48, %v1588_v53  ;;  %v1490_v58 = vld [vmem:[#allocation2 + $0xb8] sm:$0xf] }
  0x75   : > { %1151 = vmatmul.f32.gmra.mxu3 %v9112_v17  ;;  %1435 = vmatpush.msrb.mxu2 %v1312_v18  ;;  %v1509_v43 = vsel %vm475_vm0, %v1490_v58, 0 }
  0x76   : > { %1349 = vmatpush.msrb.mxu0 %v1305_v1  ;;  %1468 = vmatpush.msrb.mxu3 %v9079_v63  ;;  %v1590_v25 = vand.u32 4294901760, %v1589_v56  ;;  %v9192_v62 = vand.u32 4294901760, %v1509_v43 }
  0x77   : > { %1386 = vmatpush.msrb.mxu1 %v9070_v33  ;;  %v1493_v33 = vrot.slane %v8889_v8, 2  ;;  %v1488_v8 = vld [vmem:[#allocation2 + $0xa8] sm:$0xff] }
  0x78   : > { %1352 = vmatpush.msrb.mxu0 %v1311_v11  ;;  %v9199_v1 = vsub.f32 %v1509_v43, %v9192_v62 }
  0x79   : > { %1021 = vmatmul.f32.gmra.mxu0 %v1020_v20  ;;  %1388 = vmatpush.msrb.mxu1 %v9079_v63  ;;  %v1494_v60 = vsel %vm1491_vm3, %v1492_v57, %v1493_v33 }
  0x7a   : > { %1074 = vmatmul.f32.gmra.mxu1 %v9097_v22  ;;  %v1499_v63 = vsel %vm468_vm2, %v1494_v60, 0  ;;  %v1817_v3 = vand.u32 4294901760, %v9199_v1 }
  0x7b   : > { %1118 = vmatmul.f32.gmra.mxu2 %v9122_v23  ;;  %v9210_v11 = vand.u32 4294901760, %v1499_v63 }
  0x7c   : > { %v1818_v16 = vsub.f32 %v9199_v1, %v1817_v3 }
  0x7d   : > { %1157 = vmatmul.f32.gmra.mxu3 %v9128_v24  ;;  %v9237_v0 = vsub.f32 %v1499_v63, %v9210_v11 }
  0x7f   : > { %v9250_v35 = vand.u32 4294901760, %v9237_v0 }
  0x81   : > { %1029 = vmatmul.f32.gmra.mxu0 %v1028_v27 }
  0x82   : > { %1078 = vmatmul.f32.gmra.mxu1 %v9114_v51 }
  0x83   : > { %1260 = vmatmul.f32.vlgmr.msra.gmra.mxu2 %v1012_v10 }
  0x84   : > { %1619 = vmatpush.msra.mxu2 %v1569_v32 }
  0x85   : > { %1317 = vmatmul.f32.vlgmr.msra.gmra.mxu3 %v9073_v59 }
  0x86   : > { %1658 = vmatpush.msra.mxu3 %v9148_v30  ;;  %1622 = vmatpush.msra.mxu2 %v1575_v36 }
  0x88   : > { %1660 = vmatpush.msra.mxu3 %v9152_v34  ;;  %1625 = vmatpush.msra.mxu2 %v9163_v41  ;;  %v1534_v41 = vsub.f32 %v9237_v0, %v9250_v35 }
  0x89   : > { %1190 = vmatmul.f32.vlgmr.msra.gmra.mxu0 %v9073_v59 }
  0x8a   : > { %1223 = vmatmul.f32.vlgmr.msra.gmra.mxu1 %v9073_v59  ;;  %1524 = vmatpush.msra.mxu0 %v9148_v30 }
  0x8b   : > { %1268 = vmatmul.f32.gmra.mxu2 %v1020_v20  ;;  %1662 = vmatpush.msra.mxu3 %v9157_v37 }
  0x8c   : > { %1526 = vmatpush.msra.mxu0 %v9152_v34  ;;  %1573 = vmatpush.msra.mxu1 %v1572_v45 }
  0x8d   : > { %1321 = vmatmul.f32.gmra.mxu3 %v9097_v22  ;;  %1628 = vmatpush.msra.mxu2 %v9171_v48  ;;  %v1535_v48 = vand.u32 4294901760, %v1534_v41 }
  0x8e   : > { %1528 = vmatpush.msra.mxu0 %v9157_v37  ;;  %1664 = vmatpush.msra.mxu3 %v9165_v42 }
  0x8f   : > { %1579 = vmatpush.msra.mxu1 %v1578_v50 }
  0x90   : > { %1530 = vmatpush.msra.mxu0 %v9165_v42 }
  0x91   : > { %1194 = vmatmul.f32.gmra.mxu0 %v9097_v22  ;;  %1585 = vmatpush.msra.mxu1 %v1584_v55 }
  0x92   : > { %1227 = vmatmul.f32.gmra.mxu1 %v9097_v22 }
  0x93   : > { %1276 = vmatmul.f32.gmra.mxu2 %v1028_v27  ;;  %1591 = vmatpush.msra.mxu1 %v1590_v25 }
  0x95   : > { %1325 = vmatmul.f32.gmra.mxu3 %v9114_v51 }
  0x99   : > { %1198 = vmatmul.f32.gmra.mxu0 %v9114_v51 }
  0x9a   : > { %1231 = vmatmul.f32.gmra.mxu1 %v9114_v51 }
  0x9b   : > { %1437 = vmatmul.f32.vlgmr.msrb.gmra.mxu2 %v9073_v59 }
  0x9c   : > { %1771 = vmatpush.msrb.mxu2 %v9192_v62 }
  0x9d   : > { %1470 = vmatmul.f32.vlgmr.msrb.gmra.mxu3 %v9073_v59  ;;  %v9201_v59 = vand.u32 4294901760, %v1488_v8 }
  0x9f   : > { %v9206_v6 = vsub.f32 %v1488_v8, %v9201_v59  ;;  %1773 = vmatpush.msrb.mxu2 %v9201_v59 }
  0xa1   : > { %1355 = vmatmul.f32.vlgmr.msrb.gmra.mxu0 %v9087_v46  ;;  %v1496_v46 = vsel %vm1491_vm3, %v1493_v33, %v1495_v7  ;;  %v1823_v18 = vand.u32 4294901760, %v9206_v6  ;;  %1775 = vmatpush.msrb.mxu2 %v9208_v15 }
  0xa2   : > { %1699 = vmatpush.msrb.mxu0 %v1570_v38  ;;  %1392 = vmatmul.f32.vlgmr.msrb.gmra.mxu1 %v9095_v14  ;;  %v1819_v14 = vand.u32 4294901760, %v1818_v16  ;;  %v1501_v20 = vsel %vm468_vm2, %v1496_v46, 0 }
  0xa3   : > { %1738 = vmatpush.msrb.mxu1 %v9148_v30  ;;  %1441 = vmatmul.f32.gmra.mxu2 %v9097_v22  ;;  %v1824_v9 = vsub.f32 %v9206_v6, %v1823_v18  ;;  %v1497_v30 = vrot.slane %v8914_v19, 2  ;;  %v9252_v36 = vand.u32 4294901760, %v1501_v20 }
  0xa4   : > { %1703 = vmatpush.msrb.mxu0 %v1576_v44  ;;  %1777 = vmatpush.msrb.mxu2 %v9224_v54 }
  0xa5   : > { %1474 = vmatmul.f32.gmra.mxu3 %v9097_v22  ;;  %v1829_v22 = vand.u32 4294901760, %v9222_v21  ;;  %1740 = vmatpush.msrb.mxu1 %v9152_v34  ;;  %v1825_v28 = vand.u32 4294901760, %v1824_v9 }
  0xa6   : > { %v508_v13 = vpop.f32.mrf.mxu0  ;;  %1707 = vmatpush.msrb.mxu0 %v1582_v49  ;;  %v565_v5 = vpop.f32.mrf.mxu1  ;;  %1820 = vmatpush.msrb.mxu3 %v1819_v14 }
  0xa7   : > { %v603_v10 = vpop.f32.mrf.mxu2  ;;  %v566_v26 = vadd.f32 %v565_v5, %v508_v13  ;;  %v1830_v29 = vsub.f32 %v9222_v21, %v1829_v22  ;;  %1742 = vmatpush.msrb.mxu1 %v9157_v37 }
  0xa8   : > { %v640_v27 = vpop.f32.mrf.mxu3  ;;  %1711 = vmatpush.msrb.mxu0 %v1588_v53  ;;  %1826 = vmatpush.msrb.mxu3 %v1825_v28 }
  0xa9   : > { %1360 = vmatmul.f32.gmra.mxu0 %v9106_v4  ;;  %v1835_v4 = vand.u32 4294901760, %v9233_v61  ;;  %v604_v31 = vadd.f32 %v603_v10, %v566_v26  ;;  %v1831_v32 = vand.u32 4294901760, %v1830_v29  ;;  %1744 = vmatpush.msrb.mxu1 %v9165_v42  ;;  %v9264_v42 = vsub.f32 %v1501_v20, %v9252_v36  ;;  %v2014_v26 = vld [vmem:[#allocation2 + $0xd0] sm:$0xff] }
  0xaa   : > { %1398 = vmatmul.f32.gmra.mxu1 %v9112_v17  ;;  %v1498_v17 = vsel %vm1491_vm3, %v1495_v7, %v1497_v30  ;;  %v9344_v29 = vand.u32 4294901760, %v2014_v26 }
  0xab   : > { %v1836_v34 = vsub.f32 %v9233_v61, %v1835_v4  ;;  %v9255_v38 = vadd.f32 %v640_v27, %v604_v31  ;;  %1445 = vmatmul.f32.gmra.mxu2 %v9114_v51  ;;  %1832 = vmatpush.msrb.mxu3 %v1831_v32  ;;  %v1503_v47 = vsel %vm468_vm2, %v1498_v17, 0  ;;  %v9269_v49 = vand.u32 4294901760, %v9264_v42  ;;  %v2012_v32 = vld [vmem:[#allocation2 + $0xc0] sm:$0xff] }
  0xac   : > { %v9355_v17 = vsub.f32 %v2014_v26, %v9344_v29 }
  0xad   : > { %1478 = vmatmul.f32.gmra.mxu3 %v9114_v51  ;;  %v1837_v19 = vand.u32 4294901760, %v1836_v34  ;;  %v1542_v55 = vsub.f32 %v9264_v42, %v9269_v49 }
  0xae   : > { %v516_v39 = vpop.f32.mrf.mxu0  ;;  %v569_v37 = vpop.f32.mrf.mxu1 }
  0xaf   : > { %v608_v40 = vpop.f32.mrf.mxu2  ;;  %1838 = vmatpush.msrb.mxu3 %v1837_v19  ;;  %v570_v44 = vadd.f32 %v569_v37, %v516_v39  ;;  %v1543_v58 = vand.u32 4294901760, %v1542_v55  ;;  %v9357_v37 = vand.u32 4294901760, %v2012_v32 }
  0xb0   : > { %v646_v45 = vpop.f32.mrf.mxu3 }
  0xb1   : > { %1365 = vmatmul.f32.gmra.mxu0 %v9122_v23  ;;  %v609_v51 = vadd.f32 %v608_v40, %v570_v44  ;;  %v9271_v23 = vand.u32 4294901760, %v1503_v47 }
  0xb2   : > { %1404 = vmatmul.f32.gmra.mxu1 %v9128_v24 }
  0xb3   : > { %v9273_v50 = vadd.f32 %v646_v45, %v609_v51  ;;  %1631 = vmatmul.f32.vlgmr.msra.gmra.mxu2 %v9237_v0  ;;  %v9283_v56 = vsub.f32 %v1503_v47, %v9271_v23  ;;  %v9364_v45 = vsub.f32 %v2012_v32, %v9357_v37  ;;  %v2111_v47 = vand.u32 4294901760, %v9355_v17  ;;  %v2017_v32 = vld [vmem:[#allocation2 + $0xe8] sm:$0xff] }
  0xb4   : > { %1946 = vmatpush.msra.mxu2 %v1817_v3 }
  0xb5   : > { %1668 = vmatmul.f32.vlgmr.msra.gmra.mxu3 %v9250_v35  ;;  %v9292_v60 = vand.u32 4294901760, %v9283_v56 }
  0xb6   : > { %v524_v52 = vpop.f32.mrf.mxu0  ;;  %1985 = vmatpush.msra.mxu3 %v9192_v62  ;;  %v573_v24 = vpop.f32.mrf.mxu1  ;;  %1950 = vmatpush.msra.mxu2 %v1823_v18 }
  0xb7   : > { %v613_v53 = vpop.f32.mrf.mxu2  ;;  %v574_v25 = vadd.f32 %v573_v24, %v524_v52  ;;  %v1550_v63 = vsub.f32 %v9283_v56, %v9292_v60  ;;  %v2112_v24 = vsub.f32 %v9355_v17, %v2111_v47 }
  0xb8   : > { %v652_v57 = vpop.f32.mrf.mxu3  ;;  %1987 = vmatpush.msra.mxu3 %v9201_v59  ;;  %1954 = vmatpush.msra.mxu2 %v1829_v22 }
  0xb9   : > { %1536 = vmatmul.f32.vlgmr.msra.gmra.mxu0 %v1535_v48  ;;  %v614_v33 = vadd.f32 %v613_v53, %v574_v25  ;;  %v2117_v53 = vand.u32 4294901760, %v9364_v45 }
  0xba   : > { %1866 = vmatpush.msra.mxu0 %v9199_v1  ;;  %1593 = vmatmul.f32.vlgmr.msra.gmra.mxu1 %v9210_v11 }
  0xbb   : > { %1905 = vmatpush.msra.mxu1 %v9192_v62  ;;  %1989 = vmatpush.msra.mxu3 %v9208_v15  ;;  %v9296_v43 = vadd.f32 %v652_v57, %v614_v33  ;;  %v2113_v57 = vand.u32 4294901760, %v2112_v24  ;;  %v2118_v33 = vsub.f32 %v9364_v45, %v2117_v53 }
  0xbc   : > { %1869 = vmatpush.msra.mxu0 %v9206_v6  ;;  %1636 = vmatmul.f32.gmra.mxu2 %v9264_v42 }
  0xbd   : > { %1674 = vmatmul.f32.gmra.mxu3 %v9269_v49  ;;  %1907 = vmatpush.msra.mxu1 %v9201_v59  ;;  %v1551_v59 = vand.u32 4294901760, %v1550_v63 }
  0xbe   : > { %v9298_v7 = vpop.f32.mrf.mxu0  ;;  %1872 = vmatpush.msra.mxu0 %v9222_v21  ;;  %1958 = vmatpush.msra.mxu2 %v1835_v4  ;;  %v9305_v8 = vpop.f32.mrf.mxu1 }
  0xbf   : > { %1991 = vmatpush.msra.mxu3 %v9224_v54  ;;  %v755_v62 = vpop.f32.mrf.mxu2  ;;  %1909 = vmatpush.msra.mxu1 %v9208_v15 }
  0xc0   : > { %v812_v1 = vpop.f32.mrf.mxu3  ;;  %1875 = vmatpush.msra.mxu0 %v9233_v61  ;;  %v2016_v61 = vld [vmem:[#allocation2 + $0xe0] sm:$0xff] }
  0xc1   : > { %1544 = vmatmul.f32.gmra.mxu0 %v1543_v58  ;;  %v813_v2 = vadd.f32 %v812_v1, %v755_v62  ;;  %1911 = vmatpush.msra.mxu1 %v9224_v54  ;;  %v2018_v54 = vld [vmem:[#allocation2 + $0xf0] sm:$0xf]  ;;  %v9336_v20 = vand.u32 4294901760, %v2016_v61 }
  0xc2   : > { %1597 = vmatmul.f32.gmra.mxu1 %v9252_v36  ;;  %v2035_v9 = vsel %vm475_vm0, %v2018_v54, 0 }
  0xc3   : > { %v9330_v22 = vand.u32 4294901760, %v2035_v9  ;;  %v9342_v28 = vsub.f32 %v2016_v61, %v9336_v20 }
  0xc4   : > { %1641 = vmatmul.f32.gmra.mxu2 %v9283_v56 }
  0xc5   : > { %1680 = vmatmul.f32.gmra.mxu3 %v9292_v60  ;;  %v9334_v10 = vsub.f32 %v2035_v9, %v9330_v22  ;;  %v2105_v40 = vand.u32 4294901760, %v9342_v28  ;;  %v2019_v9 = vld [vmem:[#allocation2 + $0xf8] sm:$0xf] }
  0xc6   : > { %v9313_v3 = vpop.f32.mrf.mxu0  ;;  %v9317_v6 = vpop.f32.mrf.mxu1 }
  0xc7   : > { %v763_v46 = vpop.f32.mrf.mxu2  ;;  %v2099_v4 = vand.u32 4294901760, %v9334_v10  ;;  %v2106_v51 = vsub.f32 %v9342_v28, %v2105_v40 }
  0xc8   : > { %v816_v15 = vpop.f32.mrf.mxu3 }
  0xc9   : > { %1552 = vmatmul.f32.gmra.mxu0 %v1551_v59  ;;  %v817_v12 = vadd.f32 %v816_v15, %v763_v46  ;;  %v2100_v19 = vsub.f32 %v9334_v10, %v2099_v4  ;;  %v2107_v55 = vand.u32 4294901760, %v2106_v51  ;;  %v9390_v15 = vld [vmem:[%s8878_s26 + $0x8] sm:$0xff]  ;;  %v2015_v51 = vld [vmem:[#allocation2 + $0xd8] sm:$0xff] }
  0xca   : > { %1601 = vmatmul.f32.gmra.mxu1 %v9271_v23  ;;  %v9426_v24 = vand.u32 4294901760, %v2015_v51 }
  0xcb   : > { %v2101_v44 = vand.u32 4294901760, %v2100_v19 }
  0xcc   : > { %1783 = vmatmul.f32.vlgmr.msrb.gmra.mxu2 %v1535_v48 }
  0xcd   : > { %1840 = vmatmul.f32.vlgmr.msrb.gmra.mxu3 %v9210_v11  ;;  %2148 = vmatpush.msrb.mxu2 %v9334_v10 }
  0xce   : > { %v9320_v13 = vpop.f32.mrf.mxu0  ;;  %v9324_v16 = vpop.f32.mrf.mxu1  ;;  %2187 = vmatpush.msrb.mxu3 %v9330_v22 }
  0xcf   : > { %v771_v18 = vpop.f32.mrf.mxu2  ;;  %2151 = vmatpush.msrb.mxu2 %v9342_v28 }
  0xd0   : > { %v820_v21 = vpop.f32.mrf.mxu3  ;;  %2189 = vmatpush.msrb.mxu3 %v9336_v20 }
  0xd1   : > { %1713 = vmatmul.f32.vlgmr.msrb.gmra.mxu0 %v9210_v11  ;;  %v9326_v14 = vadd.f32 %v820_v21, %v771_v18  ;;  %2154 = vmatpush.msrb.mxu2 %v9355_v17 }
  0xd2   : > { %1746 = vmatmul.f32.vlgmr.msrb.gmra.mxu1 %v9210_v11  ;;  %2053 = vmatpush.msrb.mxu0 %v9330_v22 }
  0xd3   : > { %2191 = vmatpush.msrb.mxu3 %v9344_v29  ;;  %2102 = vmatpush.msrb.mxu1 %v2101_v44 }
  0xd4   : > { %1791 = vmatmul.f32.gmra.mxu2 %v1543_v58  ;;  %2055 = vmatpush.msrb.mxu0 %v9336_v20 }
  0xd5   : > { %1844 = vmatmul.f32.gmra.mxu3 %v9252_v36  ;;  %2157 = vmatpush.msrb.mxu2 %v9364_v45 }
  0xd6   : > { %v850_v5 = vpop.f32.mrf.mxu0  ;;  %v887_v30 = vpop.f32.mrf.mxu1  ;;  %2057 = vmatpush.msrb.mxu0 %v9344_v29  ;;  %2193 = vmatpush.msrb.mxu3 %v9357_v37 }
  0xd7   : > { %v851_v27 = vadd.f32 %v850_v5, %v813_v2  ;;  %v932_v31 = vpop.f32.mrf.mxu2  ;;  %2108 = vmatpush.msrb.mxu1 %v2107_v55  ;;  %v2119_v2 = vand.u32 4294901760, %v2118_v33  ;;  %v2038_v5 = vsel %vm475_vm0, %v2019_v9, 0  ;;  %v2013_v55 = vld [vmem:[#allocation2 + $0xc8] sm:$0xff] }
  0xd8   : > { %v965_v39 = vpop.f32.mrf.mxu3  ;;  %2059 = vmatpush.msrb.mxu0 %v9357_v37 }
  0xd9   : > { %1717 = vmatmul.f32.gmra.mxu0 %v9252_v36  ;;  %v888_v34 = vadd.f32 %v887_v30, %v851_v27  ;;  %2114 = vmatpush.msrb.mxu1 %v2113_v57  ;;  %v9401_v27 = vand.u32 4294901760, %v2038_v5 }
  0xda   : > { %1750 = vmatmul.f32.gmra.mxu1 %v9252_v36 }
  0xdb   : > { %v933_v41 = vadd.f32 %v932_v31, %v888_v34  ;;  %2120 = vmatpush.msrb.mxu1 %v2119_v2 }
  0xdc   : > { %1799 = vmatmul.f32.gmra.mxu2 %v1551_v59  ;;  %v9386_v59 = vld [vmem:[%s8878_s26] sm:$0xff] }
  0xdd   : > { %v9372_v48 = vadd.f32 %v965_v39, %v933_v41  ;;  %1848 = vmatmul.f32.gmra.mxu3 %v9271_v23  ;;  %v2021_v46 = vrot.slane %v9386_v59, 3  ;;  %v9416_v41 = vld [vmem:[%s8878_s26 + $0x10] sm:$0xff] }
  0xde   : > { %v855_v52 = vpop.f32.mrf.mxu0  ;;  %v893_v58 = vpop.f32.mrf.mxu1  ;;  %v2024_v44 = vrot.slane %v9416_v41, 3 }
  0xdf   : > { %v856_v25 = vadd.f32 %v855_v52, %v817_v12  ;;  %v936_v62 = vpop.f32.mrf.mxu2  ;;  %v2022_v12 = vrot.slane %v9390_v15, 3 }
  0xe0   : > { %v969_v1 = vpop.f32.mrf.mxu3 }
  0xe1   : > { %1721 = vmatmul.f32.gmra.mxu0 %v9271_v23  ;;  %v894_v63 = vadd.f32 %v893_v58, %v856_v25  ;;  %v2023_v61 = vsel %vm2020_vm4, %v2021_v46, %v2022_v12  ;;  %v2025_v57 = vsel %vm2020_vm4, %v2022_v12, %v2024_v44 }
  0xe2   : > { %1754 = vmatmul.f32.gmra.mxu1 %v9271_v23  ;;  %v2028_v19 = vsel %vm468_vm2, %v2023_v61, 0  ;;  %v2030_v12 = vsel %vm468_vm2, %v2025_v57, 0  ;;  %v690_v61 = vadd.f32 %v9313_v3, %v9273_v50 }
  0xe3   : > { %v937_v18 = vadd.f32 %v936_v62, %v894_v63  ;;  %v9481_v45 = vand.u32 4294901760, %v2030_v12 }
  0xe4   : > { %1960 = vmatmul.f32.vlgmr.msra.gmra.mxu2 %v9210_v11 }
  0xe5   : > { %v9394_v21 = vadd.f32 %v969_v1, %v937_v18  ;;  %1993 = vmatmul.f32.vlgmr.msra.gmra.mxu3 %v9210_v11  ;;  %2300 = vmatpush.msra.mxu2 %v9401_v27  ;;  %v9409_v11 = vsub.f32 %v2038_v5, %v9401_v27 }
  0xe6   : > { %v860_v54 = vpop.f32.mrf.mxu0  ;;  %v899_v30 = vpop.f32.mrf.mxu1 }
  0xe7   : > { %v861_v26 = vadd.f32 %v860_v54, %v9326_v14  ;;  %v940_v31 = vpop.f32.mrf.mxu2  ;;  %v9411_v14 = vand.u32 4294901760, %v2017_v32  ;;  %v2346_v10 = vand.u32 4294901760, %v9409_v11 }
  0xe8   : > { %v973_v39 = vpop.f32.mrf.mxu3 }
  0xe9   : > { %1878 = vmatmul.f32.vlgmr.msra.gmra.mxu0 %v9237_v0  ;;  %v900_v34 = vadd.f32 %v899_v30, %v861_v26  ;;  %v686_v0 = vadd.f32 %v9298_v7, %v9255_v38  ;;  %v9429_v7 = vand.u32 4294901760, %v2028_v19  ;;  %2302 = vmatpush.msra.mxu2 %v9411_v14  ;;  %v2347_v28 = vsub.f32 %v9409_v11, %v2346_v10 }
  0xea   : > { %2228 = vmatpush.msra.mxu0 %v2099_v4  ;;  %1915 = vmatmul.f32.vlgmr.msra.gmra.mxu1 %v9250_v35  ;;  %v9424_v4 = vsub.f32 %v2017_v32, %v9411_v14 }
  0xeb   : > { %v941_v52 = vadd.f32 %v940_v31, %v900_v34  ;;  %v719_v38 = vadd.f32 %v9305_v8, %v686_v0  ;;  %2267 = vmatpush.msra.mxu1 %v9330_v22  ;;  %2304 = vmatpush.msra.mxu2 %v9426_v24  ;;  %v9448_v22 = vand.u32 4294901760, %v2013_v55 }
  0xec   : > { %2232 = vmatpush.msra.mxu0 %v2105_v40  ;;  %1964 = vmatmul.f32.gmra.mxu2 %v9252_v36  ;;  %v2352_v8 = vand.u32 4294901760, %v9424_v4  ;;  %v9442_v40 = vsub.f32 %v2015_v51, %v9426_v24 }
  0xed   : > { %v9433_v35 = vadd.f32 %v973_v39, %v941_v52  ;;  %1997 = vmatmul.f32.gmra.mxu3 %v9252_v36  ;;  %v2348_v36 = vand.u32 4294901760, %v2347_v28  ;;  %2269 = vmatpush.msra.mxu1 %v9336_v20  ;;  %v9461_v1 = vsub.f32 %v2013_v55, %v9448_v22  ;;  %v9470_v20 = vld [vmem:[%s8878_s26 + $0x18] sm:$0xf] }
  0xee   : > { %v1014_v25 = vpop.f32.mrf.mxu0  ;;  %2236 = vmatpush.msra.mxu0 %v2111_v47  ;;  %v2353_v58 = vsub.f32 %v9424_v4, %v2352_v8  ;;  %v2358_v62 = vand.u32 4294901760, %v9442_v40  ;;  %v1071_v63 = vpop.f32.mrf.mxu1  ;;  %v9457_v47 = vsub.f32 %v2028_v19, %v9429_v7  ;;  %2306 = vmatpush.msra.mxu2 %v9448_v22  ;;  %v2026_v54 = vrot.slane %v9470_v20, 3 }
  0xef   : > { %v1015_v33 = vadd.f32 %v1014_v25, %v719_v38  ;;  %v1109_v17 = vpop.f32.mrf.mxu2  ;;  %2349 = vmatpush.msra.mxu3 %v2348_v36  ;;  %v2364_v9 = vand.u32 4294901760, %v9461_v1  ;;  %2271 = vmatpush.msra.mxu1 %v9344_v29  ;;  %v723_v29 = vadd.f32 %v9317_v6, %v690_v61  ;;  %v9497_v6 = vsub.f32 %v2030_v12, %v9481_v45 }
  0xf0   : > { %v1146_v46 = vpop.f32.mrf.mxu3  ;;  %v2354_v18 = vand.u32 4294901760, %v2353_v58  ;;  %2240 = vmatpush.msra.mxu0 %v2117_v53  ;;  %v9479_v30 = vand.u32 4294901760, %v9457_v47 }
  0xf1   : > { %1883 = vmatmul.f32.gmra.mxu0 %v9264_v42  ;;  %v1072_v2 = vadd.f32 %v1071_v63, %v1015_v33  ;;  %v2359_v42 = vsub.f32 %v9442_v40, %v2358_v62  ;;  %v2365_v53 = vsub.f32 %v9461_v1, %v2364_v9  ;;  %2273 = vmatpush.msra.mxu1 %v9357_v37  ;;  %v9504_v52 = vand.u32 4294901760, %v9497_v6 }
  0xf2   : > { %1921 = vmatmul.f32.gmra.mxu1 %v9269_v49  ;;  %2355 = vmatpush.msra.mxu3 %v2354_v18  ;;  %v2027_v49 = vsel %vm2020_vm4, %v2024_v44, %v2026_v54  ;;  %v2063_v37 = vsub.f32 %v9457_v47, %v9479_v30  ;;  %v694_v44 = vadd.f32 %v9320_v13, %v9296_v43 }
  0xf3   : > { %v1110_v5 = vadd.f32 %v1109_v17, %v1072_v2  ;;  %v2360_v26 = vand.u32 4294901760, %v2359_v42  ;;  %v2366_v3 = vand.u32 4294901760, %v2365_v53  ;;  %v2071_v57 = vsub.f32 %v9497_v6, %v9504_v52 }
  0xf4   : > { %1968 = vmatmul.f32.gmra.mxu2 %v9271_v23  ;;  %v727_v55 = vadd.f32 %v9324_v16, %v694_v44 }
  0xf5   : > { %v9488_v31 = vadd.f32 %v1146_v46, %v1110_v5  ;;  %2001 = vmatmul.f32.gmra.mxu3 %v9271_v23  ;;  %v2032_v23 = vsel %vm468_vm2, %v2027_v49, 0  ;;  %v2072_v58 = vand.u32 4294901760, %v2071_v57  ;;  %v2547_v5 = vld [vmem:[#allocation2 + $0x130] sm:$0xf] }
  0xf6   : > { %v1022_v50 = vpop.f32.mrf.mxu0  ;;  %2361 = vmatpush.msra.mxu3 %v2360_v26  ;;  %v9506_v38 = vand.u32 4294901760, %v2032_v23 }
  0xf7   : > { %v1023_v32 = vadd.f32 %v1022_v50, %v723_v29  ;;  %v1075_v34 = vpop.f32.mrf.mxu1  ;;  %v1114_v39 = vpop.f32.mrf.mxu2  ;;  %v2545_v29 = vld [vmem:[#allocation2 + $0x120] sm:$0xff] }
  0xf8   : > { %2367 = vmatpush.msra.mxu3 %v2366_v3  ;;  %v1152_v0 = vpop.f32.mrf.mxu3  ;;  %v9519_v16 = vsub.f32 %v2032_v23, %v9506_v38  ;;  %v9579_v3 = vand.u32 4294901760, %v2545_v29  ;;  %v2541_v23 = vld [vmem:[#allocation2 + $0x100] sm:$0xff] }
  0xf9   : > { %1888 = vmatmul.f32.gmra.mxu0 %v9283_v56  ;;  %v1076_v19 = vadd.f32 %v1075_v34, %v1023_v32  ;;  %v2064_v56 = vand.u32 4294901760, %v2063_v37 }
  0xfa   : > { %1927 = vmatmul.f32.gmra.mxu1 %v9292_v60  ;;  %v9530_v63 = vand.u32 4294901760, %v9519_v16  ;;  %v9585_v34 = vsub.f32 %v2545_v29, %v9579_v3 }
  0xfb   : > { %v1115_v51 = vadd.f32 %v1114_v39, %v1076_v19 }
  0xfc   : > { %2160 = vmatmul.f32.vlgmr.msrb.gmra.mxu2 %v9457_v47 }
  0xfd   : > { %v9509_v25 = vadd.f32 %v1152_v0, %v1115_v51  ;;  %2197 = vmatmul.f32.vlgmr.msrb.gmra.mxu3 %v9479_v30  ;;  %2475 = vmatpush.msrb.mxu2 %v2346_v10 }
  0xfe   : > { %v1030_v28 = vpop.f32.mrf.mxu0  ;;  %2514 = vmatpush.msrb.mxu3 %v9401_v27 }
  0xff   : > { %v1031_v60 = vadd.f32 %v1030_v28, %v727_v55  ;;  %v1079_v43 = vpop.f32.mrf.mxu1  ;;  %v1119_v13 = vpop.f32.mrf.mxu2  ;;  %2479 = vmatpush.msrb.mxu2 %v2352_v8  ;;  %v9600_v28 = vand.u32 4294901760, %v2541_v23 }
 0x100   : > { %v1158_v36 = vpop.f32.mrf.mxu3  ;;  %2516 = vmatpush.msrb.mxu3 %v9411_v14 }
 0x101   : > { %2065 = vmatmul.f32.vlgmr.msrb.gmra.mxu0 %v2064_v56  ;;  %v1080_v33 = vadd.f32 %v1079_v43, %v1031_v60  ;;  %2483 = vmatpush.msrb.mxu2 %v2358_v62  ;;  %v2079_v62 = vsub.f32 %v9519_v16, %v9530_v63  ;;  %v2633_v60 = vand.u32 4294901760, %v9585_v34  ;;  %v9607_v57 = vsub.f32 %v2541_v23, %v9600_v28 }
 0x102   : > { %2395 = vmatpush.msrb.mxu0 %v9409_v11  ;;  %2122 = vmatmul.f32.vlgmr.msrb.gmra.mxu1 %v9429_v7 }
 0x103   : > { %v1120_v10 = vadd.f32 %v1119_v13, %v1080_v33  ;;  %2434 = vmatpush.msrb.mxu1 %v9401_v27  ;;  %2518 = vmatpush.msrb.mxu3 %v9426_v24 }
 0x104   : > { %2398 = vmatpush.msrb.mxu0 %v9424_v4  ;;  %2165 = vmatmul.f32.gmra.mxu2 %v9497_v6 }
 0x105   : > { %v9534_v8 = vadd.f32 %v1158_v36, %v1120_v10  ;;  %2203 = vmatmul.f32.gmra.mxu3 %v9504_v52  ;;  %2436 = vmatpush.msrb.mxu1 %v9411_v14  ;;  %v2634_v36 = vsub.f32 %v9585_v34, %v2633_v60 }
 0x106   : > { %v9536_v11 = vpop.f32.mrf.mxu0  ;;  %2401 = vmatpush.msrb.mxu0 %v9442_v40  ;;  %2487 = vmatpush.msrb.mxu2 %v2364_v9  ;;  %v2080_v40 = vand.u32 4294901760, %v2079_v62  ;;  %v2645_v62 = vand.u32 4294901760, %v9607_v57 }
 0x107   : > { %2520 = vmatpush.msrb.mxu3 %v9448_v22  ;;  %v9545_v27 = vpop.f32.mrf.mxu1  ;;  %v1261_v4 = vpop.f32.mrf.mxu2  ;;  %2438 = vmatpush.msrb.mxu1 %v9426_v24 }
 0x108   : > { %v1262_v17 = vadd.f32 %v1261_v4, %v9372_v48  ;;  %v1318_v2 = vpop.f32.mrf.mxu3  ;;  %2404 = vmatpush.msrb.mxu0 %v9461_v1 }
 0x109   : > { %2073 = vmatmul.f32.gmra.mxu0 %v2072_v58  ;;  %2440 = vmatpush.msrb.mxu1 %v9448_v22 }
 0x10a   : > { %v1319_v14 = vadd.f32 %v1318_v2, %v1262_v17  ;;  %2126 = vmatmul.f32.gmra.mxu1 %v9481_v45  ;;  %v2635_v17 = vand.u32 4294901760, %v2634_v36 }
 0x10c   : > { %2170 = vmatmul.f32.gmra.mxu2 %v9519_v16 }
 0x10d   : > { %2209 = vmatmul.f32.gmra.mxu3 %v9530_v63 }
 0x10e   : > { %v9554_v46 = vpop.f32.mrf.mxu0 }
 0x10f   : > { %v9558_v12 = vpop.f32.mrf.mxu1  ;;  %v1269_v24 = vpop.f32.mrf.mxu2 }
 0x110   : > { %v1270_v48 = vadd.f32 %v1269_v24, %v9394_v21  ;;  %v1322_v18 = vpop.f32.mrf.mxu3  ;;  %v2563_v21 = vsel %vm475_vm0, %v2547_v5, 0  ;;  %v2550_v5 = vrot.slane %v9390_v15, 4 }
 0x111   : > { %2081 = vmatmul.f32.gmra.mxu0 %v2080_v40  ;;  %v9573_v53 = vand.u32 4294901760, %v2563_v21 }
 0x112   : > { %v1323_v1 = vadd.f32 %v1322_v18, %v1270_v48  ;;  %2130 = vmatmul.f32.gmra.mxu1 %v9506_v38 }
 0x113   : > { %v9577_v49 = vsub.f32 %v2563_v21, %v9573_v53 }
 0x114   : > { %2312 = vmatmul.f32.vlgmr.msra.gmra.mxu2 %v2064_v56 }
 0x115   : > { %2369 = vmatmul.f32.vlgmr.msra.gmra.mxu3 %v9429_v7  ;;  %2676 = vmatpush.msra.mxu2 %v9577_v49  ;;  %v2627_v37 = vand.u32 4294901760, %v9577_v49 }
 0x116   : > { %v9562_v22 = vpop.f32.mrf.mxu0  ;;  %2715 = vmatpush.msra.mxu3 %v9573_v53 }
 0x117   : > { %v9566_v42 = vpop.f32.mrf.mxu1  ;;  %v1277_v54 = vpop.f32.mrf.mxu2  ;;  %2679 = vmatpush.msra.mxu2 %v9585_v34  ;;  %v2628_v56 = vsub.f32 %v9577_v49, %v2627_v37 }
 0x118   : > { %v1278_v9 = vadd.f32 %v1277_v54, %v9433_v35  ;;  %v1326_v61 = vpop.f32.mrf.mxu3  ;;  %v2543_v35 = vld [vmem:[#allocation2 + $0x110] sm:$0xff]  ;;  %2717 = vmatpush.msra.mxu3 %v9579_v3 }
 0x119   : > { %2242 = vmatmul.f32.vlgmr.msra.gmra.mxu0 %v9429_v7  ;;  %v9587_v39 = vand.u32 4294901760, %v2543_v35  ;;  %v2629_v13 = vand.u32 4294901760, %v2628_v56  ;;  %v2552_v56 = vrot.slane %v9416_v41, 4 }
 0x11a   : > { %v9570_v26 = vadd.f32 %v1326_v61, %v1278_v9  ;;  %2275 = vmatmul.f32.vlgmr.msra.gmra.mxu1 %v9429_v7  ;;  %2581 = vmatpush.msra.mxu0 %v9573_v53  ;;  %v2549_v61 = vrot.slane %v9386_v59, 4 }
 0x11b   : > { %v9598_v55 = vsub.f32 %v2543_v35, %v9587_v39  ;;  %2719 = vmatpush.msra.mxu3 %v9587_v39  ;;  %2630 = vmatpush.msra.mxu1 %v2629_v13 }
 0x11c   : > { %2320 = vmatmul.f32.gmra.mxu2 %v2072_v58  ;;  %2583 = vmatpush.msra.mxu0 %v9579_v3  ;;  %v2551_v35 = vsel %vm475_vm0, %v2549_v61, %v2550_v5 }
 0x11d   : > { %2373 = vmatmul.f32.gmra.mxu3 %v9481_v45  ;;  %v2639_v33 = vand.u32 4294901760, %v9598_v55  ;;  %2682 = vmatpush.msra.mxu2 %v9598_v55 }
 0x11e   : > { %v1356_v50 = vpop.f32.mrf.mxu0  ;;  %2585 = vmatpush.msra.mxu0 %v9587_v39  ;;  %2721 = vmatpush.msra.mxu3 %v9600_v28 }
 0x11f   : > { %v1357_v32 = vadd.f32 %v1356_v50, %v1319_v14  ;;  %v1393_v19 = vpop.f32.mrf.mxu1  ;;  %v1438_v0 = vpop.f32.mrf.mxu2  ;;  %v2640_v4 = vsub.f32 %v9598_v55, %v2639_v33  ;;  %2685 = vmatpush.msra.mxu2 %v9607_v57  ;;  %2636 = vmatpush.msra.mxu1 %v2635_v17  ;;  %v2548_v50 = vld [vmem:[#allocation2 + $0x138] sm:$0xf] }
 0x120   : > { %v1471_v51 = vpop.f32.mrf.mxu3  ;;  %2587 = vmatpush.msra.mxu0 %v9600_v28 }
 0x121   : > { %2246 = vmatmul.f32.gmra.mxu0 %v9481_v45  ;;  %v1394_v44 = vadd.f32 %v1393_v19, %v1357_v32  ;;  %v2641_v14 = vand.u32 4294901760, %v2640_v4  ;;  %v2566_v32 = vsel %vm475_vm0, %v2548_v50, 0 }
 0x122   : > { %2279 = vmatmul.f32.gmra.mxu1 %v9481_v45  ;;  %v9636_v15 = vand.u32 4294901760, %v2566_v32 }
 0x123   : > { %v1439_v43 = vadd.f32 %v1438_v0, %v1394_v44  ;;  %2642 = vmatpush.msra.mxu1 %v2641_v14  ;;  %v2546_v0 = vld [vmem:[#allocation2 + $0x128] sm:$0xff] }
 0x124   : > { %2328 = vmatmul.f32.gmra.mxu2 %v2080_v40  ;;  %v2646_v40 = vsub.f32 %v9607_v57, %v2645_v62 }
 0x125   : > { %v9613_v10 = vadd.f32 %v1471_v51, %v1439_v43  ;;  %2377 = vmatmul.f32.gmra.mxu3 %v9506_v38  ;;  %v2556_v51 = vsel %vm468_vm2, %v2551_v35, 0 }
 0x126   : > { %v1361_v58 = vpop.f32.mrf.mxu0  ;;  %v2647_v9 = vand.u32 4294901760, %v2646_v40 }
 0x127   : > { %13024 = vst [vmem:[#allocation9_spill] sm:$0xff] %v9613_v10  ;;  %v1362_v2 = vadd.f32 %v1361_v58, %v1323_v1  ;;  %v1399_v24 = vpop.f32.mrf.mxu1  ;;  %v1442_v48 = vpop.f32.mrf.mxu2  ;;  %v2542_v58 = vld [vmem:[#allocation2 + $0x108] sm:$0xff] }
 0x128   : > { %v1475_v54 = vpop.f32.mrf.mxu3  ;;  %2648 = vmatpush.msra.mxu1 %v2647_v9 }
 0x129   : > { %2250 = vmatmul.f32.gmra.mxu0 %v9506_v38  ;;  %v1400_v18 = vadd.f32 %v1399_v24, %v1362_v2  ;;  %v2553_v2 = vsel %vm475_vm0, %v2550_v5, %v2552_v56 }
 0x12a   : > { %2283 = vmatmul.f32.gmra.mxu1 %v9506_v38  ;;  %v2558_v9 = vsel %vm468_vm2, %v2553_v2, 0 }
 0x12b   : > { %v1443_v1 = vadd.f32 %v1442_v48, %v1400_v18  ;;  %v9701_v35 = vand.u32 4294901760, %v2558_v9 }
 0x12c   : > { %2489 = vmatmul.f32.vlgmr.msrb.gmra.mxu2 %v9429_v7 }
 0x12d   : > { %v9629_v21 = vadd.f32 %v1475_v54, %v1443_v1  ;;  %2522 = vmatmul.f32.vlgmr.msrb.gmra.mxu3 %v9429_v7  ;;  %2828 = vmatpush.msrb.mxu2 %v9636_v15  ;;  %v9644_v7 = vsub.f32 %v2566_v32, %v9636_v15 }
 0x12e   : > { %v1366_v29 = vpop.f32.mrf.mxu0 }
 0x12f   : > { %13025 = vst [vmem:[#allocation10_spill] sm:$0xff] %v9629_v21  ;;  %v1367_v59 = vadd.f32 %v1366_v29, %v9570_v26  ;;  %v1405_v34 = vpop.f32.mrf.mxu1  ;;  %v1446_v19 = vpop.f32.mrf.mxu2  ;;  %v9646_v26 = vand.u32 4294901760, %v2546_v0  ;;  %v2874_v13 = vand.u32 4294901760, %v9644_v7 }
 0x130   : > { %v1479_v44 = vpop.f32.mrf.mxu3 }
 0x131   : > { %2407 = vmatmul.f32.vlgmr.msrb.gmra.mxu0 %v9457_v47  ;;  %v1406_v23 = vadd.f32 %v1405_v34, %v1367_v59  ;;  %v2544_v47 = vld [vmem:[#allocation2 + $0x118] sm:$0xff]  ;;  %v9652_v36 = vsub.f32 %v2546_v0, %v9646_v26  ;;  %2830 = vmatpush.msrb.mxu2 %v9646_v26 }
 0x132   : > { %2756 = vmatpush.msrb.mxu0 %v2627_v37  ;;  %2444 = vmatmul.f32.vlgmr.msrb.gmra.mxu1 %v9479_v30  ;;  %v9654_v49 = vand.u32 4294901760, %v2544_v47  ;;  %v9656_v37 = vand.u32 4294901760, %v2556_v51  ;;  %v2875_v30 = vsub.f32 %v9644_v7, %v2874_v13 }
 0x133   : > { %v1447_v43 = vadd.f32 %v1446_v19, %v1406_v23  ;;  %2795 = vmatpush.msrb.mxu1 %v9573_v53  ;;  %v9675_v53 = vand.u32 4294901760, %v2542_v58  ;;  %v9712_v19 = vsub.f32 %v2558_v9, %v9701_v35 }
 0x134   : > { %2760 = vmatpush.msrb.mxu0 %v2633_v60  ;;  %2493 = vmatmul.f32.gmra.mxu2 %v9481_v45  ;;  %v2880_v60 = vand.u32 4294901760, %v9652_v36  ;;  %v9669_v17 = vsub.f32 %v2544_v47, %v9654_v49  ;;  %v2876_v14 = vand.u32 4294901760, %v2875_v30  ;;  %v9684_v55 = vsub.f32 %v2556_v51, %v9656_v37 }
 0x135   : > { %v9660_v41 = vadd.f32 %v1479_v44, %v1447_v43  ;;  %2526 = vmatmul.f32.gmra.mxu3 %v9481_v45  ;;  %2832 = vmatpush.msrb.mxu2 %v9654_v49 }
 0x136   : > { %v1537_v4 = vpop.f32.mrf.mxu0  ;;  %2764 = vmatpush.msrb.mxu0 %v2639_v33  ;;  %v2881_v45 = vsub.f32 %v9652_v36, %v2880_v60  ;;  %v2886_v40 = vand.u32 4294901760, %v9669_v17  ;;  %2797 = vmatpush.msrb.mxu1 %v9579_v3  ;;  %v9688_v33 = vsub.f32 %v2542_v58, %v9675_v53  ;;  %v9699_v50 = vand.u32 4294901760, %v9684_v55 }
 0x137   : > { %13026 = vst [vmem:[#allocation11_spill] sm:$0xff] %v9660_v41  ;;  %v1594_v24 = vpop.f32.mrf.mxu1  ;;  %v1632_v48 = vpop.f32.mrf.mxu2  ;;  %2834 = vmatpush.msrb.mxu2 %v9675_v53  ;;  %2877 = vmatpush.msrb.mxu3 %v2876_v14 }
 0x138   : > { %v1595_v18 = vadd.f32 %v1594_v24, %v1537_v4  ;;  %v1669_v54 = vpop.f32.mrf.mxu3  ;;  %v2882_v61 = vand.u32 4294901760, %v2881_v45  ;;  %v2887_v3 = vsub.f32 %v9669_v17, %v2886_v40  ;;  %2768 = vmatpush.msrb.mxu0 %v2645_v62  ;;  %v2892_v5 = vand.u32 4294901760, %v9688_v33  ;;  %2799 = vmatpush.msrb.mxu1 %v9587_v39 }
 0x139   : > { %2412 = vmatmul.f32.gmra.mxu0 %v9497_v6  ;;  %v2554_v6 = vrot.slane %v9470_v20, 4  ;;  %v2591_v34 = vsub.f32 %v9684_v55, %v9699_v50 }
 0x13a   : > { %v1633_v1 = vadd.f32 %v1632_v48, %v1595_v18  ;;  %2450 = vmatmul.f32.gmra.mxu1 %v9504_v52  ;;  %2883 = vmatpush.msrb.mxu3 %v2882_v61  ;;  %v2888_v29 = vand.u32 4294901760, %v2887_v3  ;;  %v2893_v32 = vsub.f32 %v9688_v33, %v2892_v5 }
 0x13b   : > { %2801 = vmatpush.msrb.mxu1 %v9600_v28  ;;  %v2555_v39 = vsel %vm475_vm0, %v2552_v56, %v2554_v6  ;;  %v9716_v44 = vand.u32 4294901760, %v2591_v34 }
 0x13c   : > { %v1670_v57 = vadd.f32 %v1669_v54, %v1633_v1  ;;  %2497 = vmatmul.f32.gmra.mxu2 %v9506_v38  ;;  %2889 = vmatpush.msrb.mxu3 %v2888_v29  ;;  %v2894_v52 = vand.u32 4294901760, %v2893_v32  ;;  %v2560_v23 = vsel %vm468_vm2, %v2555_v39, 0 }
 0x13d   : > { %2530 = vmatmul.f32.gmra.mxu3 %v9506_v38  ;;  %v9721_v51 = vand.u32 4294901760, %v2560_v23 }
 0x13e   : > { %v1545_v20 = vpop.f32.mrf.mxu0  ;;  %2895 = vmatpush.msrb.mxu3 %v2894_v52 }
 0x13f   : > { %v1598_v62 = vpop.f32.mrf.mxu1  ;;  %v1637_v59 = vpop.f32.mrf.mxu2  ;;  %v9732_v4 = vsub.f32 %v2560_v23, %v9721_v51 }
 0x140   : > { %v1599_v28 = vadd.f32 %v1598_v62, %v1545_v20  ;;  %v1675_v0 = vpop.f32.mrf.mxu3 }
 0x141   : > { %2417 = vmatmul.f32.gmra.mxu0 %v9519_v16  ;;  %v9719_v16 = vand.u32 4294901760, %v9712_v19  ;;  %v9741_v45 = vand.u32 4294901760, %v9732_v4 }
 0x142   : > { %v1638_v38 = vadd.f32 %v1637_v59, %v1599_v28  ;;  %2456 = vmatmul.f32.gmra.mxu1 %v9530_v63 }
 0x143   : > { %v2599_v58 = vsub.f32 %v9712_v19, %v9719_v16  ;;  %v2607_v48 = vsub.f32 %v9732_v4, %v9741_v45 }
 0x144   : > { %v1676_v56 = vadd.f32 %v1675_v0, %v1638_v38  ;;  %2688 = vmatmul.f32.vlgmr.msra.gmra.mxu2 %v9684_v55 }
 0x145   : > { %2725 = vmatmul.f32.vlgmr.msra.gmra.mxu3 %v9699_v50  ;;  %3003 = vmatpush.msra.mxu2 %v2874_v13  ;;  %v2600_v14 = vand.u32 4294901760, %v2599_v58 }
 0x146   : > { %v1553_v47 = vpop.f32.mrf.mxu0  ;;  %3042 = vmatpush.msra.mxu3 %v9636_v15 }
 0x147   : > { %v1602_v63 = vpop.f32.mrf.mxu1  ;;  %v1642_v43 = vpop.f32.mrf.mxu2  ;;  %3007 = vmatpush.msra.mxu2 %v2880_v60 }
 0x148   : > { %v1603_v30 = vadd.f32 %v1602_v63, %v1553_v47  ;;  %v1681_v2 = vpop.f32.mrf.mxu3  ;;  %3044 = vmatpush.msra.mxu3 %v9646_v26 }
 0x149   : > { %2593 = vmatmul.f32.vlgmr.msra.gmra.mxu0 %v9716_v44  ;;  %3011 = vmatpush.msra.mxu2 %v2886_v40 }
 0x14a   : > { %2923 = vmatpush.msra.mxu0 %v9644_v7  ;;  %v1643_v13 = vadd.f32 %v1642_v43, %v1603_v30  ;;  %2650 = vmatmul.f32.vlgmr.msra.gmra.mxu1 %v9656_v37  ;;  %v1192_v7 = vadd.f32 %v9536_v11, %v9488_v31  ;;  %v2608_v11 = vand.u32 4294901760, %v2607_v48 }
 0x14b   : > { %2962 = vmatpush.msra.mxu1 %v9636_v15  ;;  %3015 = vmatpush.msra.mxu2 %v2892_v5 }
 0x14c   : > { %2926 = vmatpush.msra.mxu0 %v9652_v36  ;;  %v1682_v60 = vadd.f32 %v1681_v2, %v1643_v13  ;;  %2693 = vmatmul.f32.gmra.mxu2 %v9712_v19  ;;  %v1225_v18 = vadd.f32 %v9545_v27, %v1192_v7  ;;  %v1196_v27 = vadd.f32 %v9554_v46, %v9509_v25 }
 0x14d   : > { %2731 = vmatmul.f32.gmra.mxu3 %v9719_v16  ;;  %2964 = vmatpush.msra.mxu1 %v9646_v26  ;;  %v1200_v25 = vadd.f32 %v9562_v22, %v9534_v8 }
 0x14e   : > { %v1714_v24 = vpop.f32.mrf.mxu0  ;;  %2929 = vmatpush.msra.mxu0 %v9669_v17  ;;  %3046 = vmatpush.msra.mxu3 %v9654_v49 }
 0x14f   : > { %v1715_v36 = vadd.f32 %v1714_v24, %v1670_v57  ;;  %v1747_v40 = vpop.f32.mrf.mxu1  ;;  %v9751_v15 = vpop.f32.mrf.mxu2  ;;  %2966 = vmatpush.msra.mxu1 %v9654_v49  ;;  %v1233_v29 = vadd.f32 %v9566_v42, %v1200_v25 }
 0x150   : > { %v9757_v54 = vpop.f32.mrf.mxu3  ;;  %2932 = vmatpush.msra.mxu0 %v9688_v33  ;;  %3048 = vmatpush.msra.mxu3 %v9675_v53 }
 0x151   : > { %2601 = vmatmul.f32.gmra.mxu0 %v2600_v14  ;;  %v1748_v17 = vadd.f32 %v1747_v40, %v1715_v36  ;;  %2968 = vmatpush.msra.mxu1 %v9675_v53  ;;  %v1229_v53 = vadd.f32 %v9558_v12, %v1196_v27 }
 0x152   : > { %2654 = vmatmul.f32.gmra.mxu1 %v9701_v35 }
 0x153   : > { %v9762_v31 = vadd.f32 %v1748_v17, %v1225_v18 }
 0x154   : > { %2698 = vmatmul.f32.gmra.mxu2 %v9732_v4 }
 0x155   : > { %2737 = vmatmul.f32.gmra.mxu3 %v9741_v45 }
 0x156   : > { %v1718_v26 = vpop.f32.mrf.mxu0 }
 0x157   : > { %v1719_v49 = vadd.f32 %v1718_v26, %v1676_v56  ;;  %v1751_v33 = vpop.f32.mrf.mxu1  ;;  %v9769_v9 = vpop.f32.mrf.mxu2 }
 0x158   : > { %v9772_v3 = vpop.f32.mrf.mxu3 }
 0x159   : > { %2609 = vmatmul.f32.gmra.mxu0 %v2608_v11  ;;  %v1752_v61 = vadd.f32 %v1751_v33, %v1719_v49 }
 0x15a   : > { %2658 = vmatmul.f32.gmra.mxu1 %v9721_v51 }
 0x15b   : > { %v9774_v6 = vadd.f32 %v1752_v61, %v1229_v53 }
 0x15c   : > { %2840 = vmatmul.f32.vlgmr.msrb.gmra.mxu2 %v9716_v44 }
 0x15d   : > { %2897 = vmatmul.f32.vlgmr.msrb.gmra.mxu3 %v9656_v37 }
 0x15e   : > { %v1722_v5 = vpop.f32.mrf.mxu0 }
 0x15f   : > { %v1723_v46 = vadd.f32 %v1722_v5, %v1682_v60  ;;  %v1755_v1 = vpop.f32.mrf.mxu1  ;;  %v9782_v12 = vpop.f32.mrf.mxu2 }
 0x160   : > { %v9785_v57 = vpop.f32.mrf.mxu3 }
 0x161   : > { %2770 = vmatmul.f32.vlgmr.msrb.gmra.mxu0 %v9656_v37  ;;  %v1756_v32 = vadd.f32 %v1755_v1, %v1723_v46  ;;  %13027 = vst [vmem:[#allocation12_spill] sm:$0xff] %v9785_v57 }
 0x162   : > { %2803 = vmatmul.f32.vlgmr.msrb.gmra.mxu1 %v9656_v37 }
 0x163   : > { %v9787_v20 = vadd.f32 %v1756_v32, %v1233_v29 }
 0x164   : > { %2848 = vmatmul.f32.gmra.mxu2 %v2600_v14 }
 0x165   : > { %2901 = vmatmul.f32.gmra.mxu3 %v9701_v35 }
 0x166   : > { %v9790_v39 = vpop.f32.mrf.mxu0 }
 0x167   : > { %v9794_v8 = vpop.f32.mrf.mxu1  ;;  %v9796_v22 = vpop.f32.mrf.mxu2 }
 0x168   : > { %13028 = vst [vmem:[#allocation13_spill] sm:$0xff] %v9796_v22  ;;  %v9798_v52 = vpop.f32.mrf.mxu3 }
 0x169   : > { %2774 = vmatmul.f32.gmra.mxu0 %v9701_v35  ;;  %13029 = vst [vmem:[#allocation14_spill] sm:$0xff] %v9798_v52 }
 0x16a   : > { %2807 = vmatmul.f32.gmra.mxu1 %v9701_v35 }
 0x16c   : > { %2856 = vmatmul.f32.gmra.mxu2 %v2608_v11 }
 0x16d   : > { %2905 = vmatmul.f32.gmra.mxu3 %v9721_v51 }
 0x16e   : > { %v9801_v42 = vpop.f32.mrf.mxu0 }
 0x16f   : > { %v9805_v62 = vpop.f32.mrf.mxu1  ;;  %v9807_v59 = vpop.f32.mrf.mxu2 }
 0x170   : > { %13030 = vst [vmem:[#allocation15_spill] sm:$0xff] %v9807_v59  ;;  %v9809_v34 = vpop.f32.mrf.mxu3 }
 0x171   : > { %2778 = vmatmul.f32.gmra.mxu0 %v9721_v51  ;;  %13031 = vst [vmem:[#allocation16_spill] sm:$0xff] %v9809_v34 }
 0x172   : > { %2811 = vmatmul.f32.gmra.mxu1 %v9721_v51 }
 0x174   : > { %3017 = vmatmul.f32.vlgmr.msra.gmra.mxu2 %v9656_v37 }
 0x175   : > { %3050 = vmatmul.f32.vlgmr.msra.gmra.mxu3 %v9656_v37 }
 0x176   : > { %v9812_v28 = vpop.f32.mrf.mxu0 }
 0x177   : > { %13032 = vst [vmem:[#allocation17_spill] sm:$0xff] %v9812_v28  ;;  %v9817_v0 = vpop.f32.mrf.mxu1  ;;  %v9819_v23 = vpop.f32.mrf.mxu2 }
 0x178   : > { %13033 = vst [vmem:[#allocation18_spill] sm:$0xff] %v9817_v0  ;;  %v9821_v38 = vpop.f32.mrf.mxu3 }
 0x179   : > { %2935 = vmatmul.f32.vlgmr.msra.gmra.mxu0 %v9684_v55  ;;  %13034 = vst [vmem:[#allocation19_spill] sm:$0xff] %v9819_v23 }
 0x17a   : > { %13035 = vst [vmem:[#allocation20_spill] sm:$0xff] %v9821_v38  ;;  %2972 = vmatmul.f32.vlgmr.msra.gmra.mxu1 %v9699_v50 }
 0x17c   : > { %3021 = vmatmul.f32.gmra.mxu2 %v9701_v35 }
 0x17d   : > { %3054 = vmatmul.f32.gmra.mxu3 %v9701_v35 }
 0x17e   : > { %v2066_v44 = vpop.f32.mrf.mxu0 }
 0x17f   : > { %v2123_v56 = vpop.f32.mrf.mxu1  ;;  %v2161_v47 = vpop.f32.mrf.mxu2 }
 0x180   : > { %v2198_v37 = vpop.f32.mrf.mxu3 }
 0x181   : > { %2940 = vmatmul.f32.gmra.mxu0 %v9712_v19 }
 0x182   : > { %2978 = vmatmul.f32.gmra.mxu1 %v9719_v16 }
 0x184   : > { %3025 = vmatmul.f32.gmra.mxu2 %v9721_v51 }
 0x185   : > { %3058 = vmatmul.f32.gmra.mxu3 %v9721_v51 }
 0x186   : > { %v2074_v55 = vpop.f32.mrf.mxu0 }
 0x187   : > { %v2127_v50 = vpop.f32.mrf.mxu1  ;;  %v2166_v63 = vpop.f32.mrf.mxu2 }
 0x188   : > { %v2204_v43 = vpop.f32.mrf.mxu3  ;;  %v2128_v0 = vadd.f32 %v2127_v50, %v2074_v55 }
 0x189   : > { %2945 = vmatmul.f32.gmra.mxu0 %v9732_v4 }
 0x18a   : > { %2984 = vmatmul.f32.gmra.mxu1 %v9741_v45 }
 0x18e   : > { %v2082_v35 = vpop.f32.mrf.mxu0 }
 0x18f   : > { %v2131_v58 = vpop.f32.mrf.mxu1  ;;  %v2171_v19 = vpop.f32.mrf.mxu2 }
 0x190   : > { %v9832_v30 = vpop.f32.mrf.mxu3  ;;  %v2132_v28 = vadd.f32 %v2131_v58, %v2082_v35 }
 0x196   : > { %v2243_v2 = vpop.f32.mrf.mxu0 }
 0x197   : > { %v2276_v13 = vpop.f32.mrf.mxu1  ;;  %v9834_v16 = vpop.f32.mrf.mxu2 }
 0x198   : > { %v9836_v14 = vpop.f32.mrf.mxu3 }
 0x19e   : > { %v2247_v60 = vpop.f32.mrf.mxu0 }
 0x19f   : > { %v2280_v51 = vpop.f32.mrf.mxu1  ;;  %v9838_v24 = vpop.f32.mrf.mxu2 }
 0x1a0   : > { %v9840_v4 = vpop.f32.mrf.mxu3 }
 0x1a6   : > { %v9842_v7 = vpop.f32.mrf.mxu0 }
 0x1a7   : > { %v9844_v45 = vpop.f32.mrf.mxu1  ;;  %v9846_v36 = vpop.f32.mrf.mxu2 }
 0x1a8   : > { %13036 = vst [vmem:[#allocation21_spill] sm:$0xff] %v9846_v36  ;;  %v9848_v40 = vpop.f32.mrf.mxu3 }
 0x1a9   : > { %13037 = vst [vmem:[#allocation22_spill] sm:$0xff] %v9848_v40 }
 0x1ae   : > { %v9850_v48 = vpop.f32.mrf.mxu0 }
 0x1af   : > { %v9852_v18 = vpop.f32.mrf.mxu1  ;;  %v9854_v17 = vpop.f32.mrf.mxu2 }
 0x1b0   : > { %13038 = vst [vmem:[#allocation23_spill] sm:$0xff] %v9852_v18  ;;  %v9856_v11 = vpop.f32.mrf.mxu3 }
 0x1b1   : > { %13039 = vst [vmem:[#allocation24_spill] sm:$0xff] %v9854_v17 }
 0x1b2   : > { %13040 = vst [vmem:[#allocation25_spill] sm:$0xff] %v9856_v11  ;;  %v2124_v11 = vadd.f32 %v2123_v56, %v2066_v44 }
 0x1b6   : > { %v9858_v26 = vpop.f32.mrf.mxu0 }
 0x1b7   : > { %v9860_v27 = vpop.f32.mrf.mxu1  ;;  %v9862_v49 = vpop.f32.mrf.mxu2 }
 0x1b8   : > { %13041 = vst [vmem:[#allocation26_spill] sm:$0xff] %v9860_v27  ;;  %v9864_v33 = vpop.f32.mrf.mxu3 }
 0x1b9   : > { %13042 = vst [vmem:[#allocation27_spill] sm:$0xff] %v9862_v49  ;;  %v2167_v49 = vadd.f32 %v2166_v63, %v2128_v0 }
 0x1ba   : > { %13043 = vst [vmem:[#allocation28_spill] sm:$0xff] %v9864_v33 }
 0x1bb   : > { %v2205_v36 = vadd.f32 %v2204_v43, %v2167_v49  ;;  %v1842_v49 = vadd.f32 %v9757_v54, %v9751_v15 }
 0x1bd   : > { %v2248_v56 = vadd.f32 %v2247_v60, %v2205_v36  ;;  %v1880_v15 = vadd.f32 %v9790_v39, %v1842_v49  ;;  %v13058_v49 = vld [vmem:[#allocation14_spill] sm:$0xff] }
 0x1be   : > { %v9866_v53 = vpop.f32.mrf.mxu0 }
 0x1bf   : > { %13044 = vst [vmem:[#allocation29_spill] sm:$0xff] %v9866_v53  ;;  %v9868_v61 = vpop.f32.mrf.mxu1  ;;  %v9870_v5 = vpop.f32.mrf.mxu2 }
 0x1c0   : > { %13045 = vst [vmem:[#allocation30_spill] sm:$0xff] %v9868_v61  ;;  %v9872_v25 = vpop.f32.mrf.mxu3  ;;  %v2162_v61 = vadd.f32 %v2161_v47, %v2124_v11  ;;  %v2281_v47 = vadd.f32 %v2280_v51, %v2248_v56 }
 0x1c1   : > { %13046 = vst [vmem:[#allocation31_spill] sm:$0xff] %v9870_v5 }
 0x1c2   : > { %13047 = vst [vmem:[#allocation32_spill] sm:$0xff] %v9872_v25  ;;  %v2199_v40 = vadd.f32 %v2198_v37, %v2162_v61 }
 0x1c4   : > { %v2244_v27 = vadd.f32 %v2243_v2, %v2199_v40 }
 0x1c6   : > { %v2594_v46 = vpop.f32.mrf.mxu0  ;;  %v2277_v55 = vadd.f32 %v2276_v13, %v2244_v27 }
 0x1c7   : > { %v2651_v1 = vpop.f32.mrf.mxu1  ;;  %v2689_v29 = vpop.f32.mrf.mxu2 }
 0x1c8   : > { %v2726_v32 = vpop.f32.mrf.mxu3  ;;  %v2652_v53 = vadd.f32 %v2651_v1, %v2594_v46  ;;  %v2172_v46 = vadd.f32 %v2171_v19, %v2132_v28  ;;  %v2534_v43 = vadd.f32 %v2277_v55, %v9762_v31  ;;  %v1917_v55 = vadd.f32 %v9794_v8, %v1880_v15 }
 0x1ca   : > { %v2690_v5 = vadd.f32 %v2689_v29, %v2652_v53  ;;  %v2211_v28 = vadd.f32 %v9832_v30, %v2172_v46 }
 0x1cc   : > { %v2727_v18 = vadd.f32 %v2726_v32, %v2690_v5  ;;  %v2252_v51 = vadd.f32 %v9842_v7, %v2211_v28  ;;  %v1846_v7 = vadd.f32 %v9772_v3, %v9769_v9  ;;  %v2371_v3 = vadd.f32 %v9836_v14, %v9834_v16 }
 0x1cd   : > { %v2375_v32 = vadd.f32 %v9840_v4, %v9838_v24  ;;  %v13048_v24 = vld [vmem:[#allocation12_spill] sm:$0xff] }
 0x1ce   : > { %v2602_v41 = vpop.f32.mrf.mxu0  ;;  %v2285_v30 = vadd.f32 %v9844_v45, %v2252_v51  ;;  %v1885_v54 = vadd.f32 %v9801_v42, %v1846_v7  ;;  %v1850_v4 = vadd.f32 %v13048_v24, %v9782_v12  ;;  %v13055_v51 = vld [vmem:[#allocation22_spill] sm:$0xff] }
 0x1cf   : > { %v2655_v38 = vpop.f32.mrf.mxu1  ;;  %v2694_v23 = vpop.f32.mrf.mxu2  ;;  %v2414_v16 = vadd.f32 %v9858_v26, %v2375_v32 }
 0x1d0   : > { %v2732_v21 = vpop.f32.mrf.mxu3  ;;  %v2656_v17 = vadd.f32 %v2655_v38, %v2602_v41  ;;  %v9881_v38 = vld [vmem:[%s12977_s2] sm:$0x3]  ;;  %v2538_v45 = vadd.f32 %v2285_v30, %v9787_v20  ;;  %v1923_v42 = vadd.f32 %v9805_v62, %v1885_v54  ;;  %v13060_v54 = vld [vmem:[#allocation18_spill] sm:$0xff] }
 0x1d2   : > { %v2695_v57 = vadd.f32 %v2694_v23, %v2656_v17  ;;  %v3086_v23 = vld [vmem:[%s12978_s3] sm:$0xff] }
 0x1d3   : > { %v3090_v60 = vsel %vm3088_vm5, %v3086_v23, 0 }
 0x1d4   : > { %v2733_v0 = vadd.f32 %v2732_v21, %v2695_v57  ;;  %v2536_v21 = vadd.f32 %v2281_v47, %v9774_v6  ;;  %v9896_v36 = vand.u32 4294901760, %v3090_v60  ;;  %v2409_v47 = vadd.f32 %v9850_v48, %v2371_v3  ;;  %v13061_v3 = vld [vmem:[#allocation29_spill] sm:$0xff] }
 0x1d6   : > { %v2610_v10 = vpop.f32.mrf.mxu0 }
 0x1d7   : > { %v2659_v33 = vpop.f32.mrf.mxu1  ;;  %v2699_v34 = vpop.f32.mrf.mxu2 }
 0x1d8   : > { %v2738_v52 = vpop.f32.mrf.mxu3  ;;  %v2660_v63 = vadd.f32 %v2659_v33, %v2610_v10  ;;  %v3070_v10 = vperm.slane %v9881_v38, 0 }
 0x1da   : > { %v2700_v58 = vadd.f32 %v2699_v34, %v2660_v63  ;;  %v3087_v34 = vld [vmem:[%s12978_s3 + $0x8] sm:$0xf]  ;;  %v13049_v63 = vld [vmem:[#allocation23_spill] sm:$0xff] }
 0x1db   : > { %v3093_v1 = vsel %vm3088_vm5, %v3087_v34, 0 }
 0x1dc   : > { %v2739_v6 = vadd.f32 %v2738_v52, %v2700_v58  ;;  %v9909_v52 = vsub.f32 %v3090_v60, %v9896_v36  ;;  %v9926_v56 = vand.u32 4294901760, %v3093_v1  ;;  %v13053_v58 = vld [vmem:[#allocation17_spill] sm:$0xff] }
 0x1dd   : > { %v13054_v60 = vld [vmem:[#allocation21_spill] sm:$0xff] }
 0x1de   : > { %v2771_v25 = vpop.f32.mrf.mxu0  ;;  %v9924_v20 = vand.u32 4294901760, %v9909_v52  ;;  %v9946_v26 = vsub.f32 %v3093_v1, %v9926_v56  ;;  %v13059_v1 = vld [vmem:[#allocation16_spill] sm:$0xff] }
 0x1df   : > { %v2804_v59 = vpop.f32.mrf.mxu1  ;;  %v9874_v22 = vpop.f32.mrf.mxu2  ;;  %v2772_v50 = vadd.f32 %v2771_v25, %v2727_v18 }
 0x1e0   : > { %v9876_v44 = vpop.f32.mrf.mxu3  ;;  %v3117_v48 = vsub.f32 %v9909_v52, %v9924_v20 }
 0x1e1   : > { %v2805_v41 = vadd.f32 %v2804_v59, %v2772_v50 }
 0x1e3   : > { %v3062_v19 = vadd.f32 %v2805_v41, %v2534_v43  ;;  %v2446_v41 = vadd.f32 %v13049_v63, %v2409_v47  ;;  %v13063_v47 = vld [vmem:[#allocation28_spill] sm:$0xff] }
 0x1e5   : > { %v3074_v40 = vadd.f32 %v3070_v10, %v3062_v19  ;;  %v1890_v19 = vadd.f32 %v13053_v58, %v1850_v4 }
 0x1e6   : > { %v2775_v37 = vpop.f32.mrf.mxu0 }
 0x1e7   : > { %v2776_v35 = vadd.f32 %v2775_v37, %v2733_v0  ;;  %v2808_v57 = vpop.f32.mrf.mxu1  ;;  %v9890_v59 = vpop.f32.mrf.mxu2  ;;  %v3080_v61 = vmax.f32 %v3074_v40, 0.0  ;;  %v2899_v0 = vadd.f32 %v9876_v44, %v9874_v22  ;;  %v13050_v37 = vld [vmem:[#allocation26_spill] sm:$0xff]  ;;  %v13052_v44 = vld [vmem:[#allocation15_spill] sm:$0xff]  ;;  %v13056_v40 = vld [vmem:[#allocation24_spill] sm:$0xff] }
 0x1e8   : > { %v9892_v13 = vpop.f32.mrf.mxu3  ;;  %v2452_v23 = vadd.f32 %v13050_v37, %v2414_v16 }
 0x1e9   : > { %v2809_v2 = vadd.f32 %v2808_v57, %v2776_v35  ;;  %v9929_v50 = vand.u32 4294901760, %v3080_v61  ;;  %v13051_v35 = vld [vmem:[#allocation13_spill] sm:$0xff]  ;;  %v1966_v57 = vadd.f32 %v13052_v44, %v1923_v42 }
 0x1ea   : > { %v1962_v28 = vadd.f32 %v13051_v35, %v1917_v55  ;;  %v13066_v35 = vld [vmem:[#allocation10_spill] sm:$0xff] }
 0x1eb   : > { %v3064_v31 = vadd.f32 %v2809_v2, %v2536_v21  ;;  %v9952_v22 = vsub.f32 %v3080_v61, %v9929_v50  ;;  %v1999_v15 = vadd.f32 %v13059_v1, %v1966_v57 }
 0x1ec   : > { %v1995_v7 = vadd.f32 %v13058_v49, %v1962_v28  ;;  %v13069_v49 = vld [vmem:[#allocation20_spill] sm:$0xff] }
 0x1ed   : > { %v3076_v18 = vadd.f32 %v3070_v10, %v3064_v31  ;;  %v2379_v31 = vadd.f32 %v13055_v51, %v13054_v60  ;;  %v2008_v28 = vadd.f32 %v1999_v15, %v13066_v35 }
 0x1ee   : > { %v2779_v17 = vpop.f32.mrf.mxu0 }
 0x1ef   : > { %v3082_v11 = vmax.f32 %v3076_v18, 0.0  ;;  %v2780_v27 = vadd.f32 %v2779_v17, %v2739_v6  ;;  %v2812_v33 = vpop.f32.mrf.mxu1  ;;  %v9906_v53 = vpop.f32.mrf.mxu2  ;;  %v2491_v18 = vadd.f32 %v13056_v40, %v2446_v41  ;;  %v13057_v17 = vld [vmem:[#allocation27_spill] sm:$0xff]  ;;  %v2419_v32 = vadd.f32 %v13061_v3, %v2379_v31 }
 0x1f0   : > { %v9912_v25 = vpop.f32.mrf.mxu3  ;;  %v2495_v34 = vadd.f32 %v13057_v17, %v2452_v23 }
 0x1f1   : > { %v2813_v5 = vadd.f32 %v2812_v33, %v2780_v27  ;;  %v9915_v29 = vand.u32 4294901760, %v3082_v11  ;;  %v9971_v27 = vand.u32 4294901760, %v9946_v26  ;;  %v2903_v33 = vadd.f32 %v9892_v13, %v9890_v59 }
 0x1f2   : > { %v2528_v16 = vadd.f32 %v13063_v47, %v2495_v34 }
 0x1f3   : > { %v3066_v9 = vadd.f32 %v2813_v5, %v2538_v45  ;;  %v9935_v14 = vsub.f32 %v3082_v11, %v9915_v29  ;;  %v9968_v11 = vand.u32 4294901760, %v3117_v48  ;;  %v9982_v5 = vand.u32 4294901760, %v9952_v22 }
 0x1f4   : > { %v2537_v51 = vadd.f32 %v2528_v16, %v2008_v28 }
 0x1f5   : > { %v3078_v46 = vadd.f32 %v3070_v10, %v3066_v9  ;;  %v9957_v2 = vand.u32 4294901760, %v9935_v14  ;;  %v1929_v9 = vadd.f32 %v13060_v54, %v1890_v19 }
 0x1f6   : > { %v2936_v39 = vpop.f32.mrf.mxu0 }
 0x1f7   : > { %v3084_v8 = vmax.f32 %v3078_v46, 0.0  ;;  %v2973_v43 = vpop.f32.mrf.mxu1  ;;  %v3018_v62 = vpop.f32.mrf.mxu2  ;;  %v2937_v12 = vadd.f32 %v2936_v39, %v2899_v0  ;;  %v3153_v59 = vsub.f32 %v9935_v14, %v9957_v2  ;;  %v13062_v39 = vld [vmem:[#allocation25_spill] sm:$0xff]  ;;  %v3125_v0 = vsub.f32 %v9946_v26, %v9971_v27 }
 0x1f8   : > { %v3051_v10 = vpop.f32.mrf.mxu3  ;;  %v2524_v42 = vadd.f32 %v13062_v39, %v2491_v18  ;;  %v2907_v18 = vadd.f32 %v9912_v25, %v9906_v53  ;;  %v13070_v25 = vld [vmem:[#allocation32_spill] sm:$0xff] }
 0x1f9   : > { %v9949_v21 = vand.u32 4294901760, %v3084_v8  ;;  %v2974_v30 = vadd.f32 %v2973_v43, %v2937_v12  ;;  %v3159_v43 = vsub.f32 %v9952_v22, %v9982_v5  ;;  %v13067_v12 = vld [vmem:[#allocation19_spill] sm:$0xff]  ;;  %v10014_v19 = vand.u32 4294901760, %v3153_v59 }
 0x1fa   : > { %v1970_v44 = vadd.f32 %v13067_v12, %v1929_v9  ;;  %v10016_v31 = vand.u32 4294901760, %v3125_v0 }
 0x1fb   : > { %3109 = vmatpush.msrb.mxu0 %v9949_v21  ;;  %3218 = vmatpush.msrb.mxu3 %v9949_v21  ;;  %v9964_v6 = vsub.f32 %v3084_v8, %v9949_v21  ;;  %v3019_v13 = vadd.f32 %v3018_v62, %v2974_v30  ;;  %v13064_v8 = vld [vmem:[#allocation30_spill] sm:$0xff]  ;;  %v13065_v62 = vld [vmem:[#allocation9_spill] sm:$0xff]  ;;  %v13068_v30 = vld [vmem:[#allocation31_spill] sm:$0xff] }
 0x1fc   : > { %v2458_v63 = vadd.f32 %v13064_v8, %v2419_v32  ;;  %v2006_v48 = vadd.f32 %v1995_v7, %v13065_v62  ;;  %v2003_v7 = vadd.f32 %v13069_v49, %v1970_v44 }
 0x1fd   : > { %3111 = vmatpush.msrb.mxu0 %v9915_v29  ;;  %3186 = vmatpush.msrb.mxu2 %v9964_v6  ;;  %v9979_v61 = vand.u32 4294901760, %v9964_v6  ;;  %v3052_v57 = vadd.f32 %v3051_v10, %v3019_v13  ;;  %v10023_v10 = vand.u32 4294901760, %v3159_v43 }
 0x1fe   : > { %v2941_v45 = vpop.f32.mrf.mxu0  ;;  %3220 = vmatpush.msrb.mxu3 %v9915_v29  ;;  %v2535_v60 = vadd.f32 %v2524_v42, %v2006_v48  ;;  %v2499_v40 = vadd.f32 %v13068_v30, %v2458_v63  ;;  %v8543_v48 = vld [vmem:[%s12978_s3 + $0x10] sm:$0xff] }
 0x1ff   : > { %v2942_v55 = vadd.f32 %v2941_v45, %v2903_v33  ;;  %3113 = vmatpush.msrb.mxu0 %v9929_v50  ;;  %3189 = vmatpush.msrb.mxu2 %v9935_v14  ;;  %v3147_v46 = vsub.f32 %v9964_v6, %v9979_v61  ;;  %v2979_v24 = vpop.f32.mrf.mxu1  ;;  %v3022_v4 = vpop.f32.mrf.mxu2  ;;  %v3071_v45 = vperm.slane %v9881_v38, 1  ;;  %v13071_v38 = vld [vmem:[#allocation11_spill] sm:$0xff]  ;;  %v3505_v12 = vsel %vm3088_vm5, %v8543_v48, 0  ;;  %v3927_v48 = vld [vmem:[#allocation4 + $0x38] sm:$0xff] }
 0x200   : > { %3222 = vmatpush.msrb.mxu3 %v9929_v50  ;;  %3119 = vmatmul.f32.vlgmr.msrb.gmra.mxu0 %v9968_v11  ;;  %v3055_v23 = vpop.f32.mrf.mxu3  ;;  %v3063_v33 = vadd.f32 %v3052_v57, %v2535_v60  ;;  %v2532_v9 = vadd.f32 %v13070_v25, %v2499_v40  ;;  %v2010_v13 = vadd.f32 %v2003_v7, %v13071_v38 }
 0x201   : > { %v2980_v41 = vadd.f32 %v2979_v24, %v2942_v55  ;;  %3252 = vmatpush.msra.mxu0 %v9979_v61  ;;  %3192 = vmatpush.msrb.mxu2 %v9952_v22  ;;  %v10003_v37 = vand.u32 4294901760, %v3147_v46 }
 0x202   : > { %3195 = vmatmul.f32.vlgmr.msrb.gmra.mxu2 %v9909_v52  ;;  %3226 = vmatmul.f32.vlgmr.msrb.gmra.mxu3 %v9924_v20  ;;  %v3075_v55 = vadd.f32 %v3071_v45, %v3063_v33  ;;  %v2539_v39 = vadd.f32 %v2532_v9, %v2010_v13 }
 0x203   : > { %v3023_v58 = vadd.f32 %v3022_v4, %v2980_v41  ;;  %3256 = vmatpush.msra.mxu0 %v9957_v2  ;;  %3149 = vmatpush.msrb.mxu1 %v10003_v37 }
 0x204   : > { %v3081_v16 = vmax.f32 %v3075_v55, 0.0 }
 0x205   : > { %v3056_v34 = vadd.f32 %v3055_v23, %v3023_v58  ;;  %3260 = vmatpush.msra.mxu0 %v9982_v5  ;;  %3155 = vmatpush.msrb.mxu1 %v10014_v19 }
 0x206   : > { %v2946_v17 = vpop.f32.mrf.mxu0  ;;  %v10041_v8 = vand.u32 4294901760, %v3081_v16 }
 0x207   : > { %v2947_v1 = vadd.f32 %v2946_v17, %v2907_v18  ;;  %v3065_v15 = vadd.f32 %v3056_v34, %v2537_v51  ;;  %3161 = vmatpush.msrb.mxu1 %v10023_v10  ;;  %v2985_v54 = vpop.f32.mrf.mxu1  ;;  %v3026_v53 = vpop.f32.mrf.mxu2  ;;  %v10084_v51 = vand.u32 4294901760, %v3505_v12 }
 0x208   : > { %3127 = vmatmul.f32.gmra.mxu0 %v10016_v31  ;;  %3163 = vmatmul.f32.vlgmr.msrb.gmra.mxu1 %v9896_v36  ;;  %v3059_v59 = vpop.f32.mrf.mxu3  ;;  %v10054_v62 = vsub.f32 %v3081_v16, %v10041_v8 }
 0x209   : > { %v3077_v3 = vadd.f32 %v3071_v45, %v3065_v15  ;;  %v2986_v32 = vadd.f32 %v2985_v54, %v2947_v1  ;;  %3284 = vmatpush.msra.mxu1 %v9949_v21  ;;  %v10098_v40 = vsub.f32 %v3505_v12, %v10084_v51  ;;  %v3931_v1 = vld [vmem:[#allocation4 + $0x58] sm:$0xff] }
 0x20a   : > { %3200 = vmatmul.f32.gmra.mxu2 %v9946_v26  ;;  %3232 = vmatmul.f32.gmra.mxu3 %v9971_v27  ;;  %v10076_v57 = vand.u32 4294901760, %v10054_v62 }
 0x20b   : > { %v3027_v46 = vadd.f32 %v3026_v53, %v2986_v32  ;;  %3286 = vmatpush.msra.mxu1 %v9915_v29  ;;  %v3083_v42 = vmax.f32 %v3077_v3, 0.0  ;;  %v10214_v32 = vand.u32 4294901760, %v3931_v1 }
 0x20c   : > { %v3362_v30 = vsub.f32 %v10054_v62, %v10076_v57 }
 0x20d   : > { %v3060_v47 = vadd.f32 %v3059_v59, %v3027_v46  ;;  %3288 = vmatpush.msra.mxu1 %v9929_v50  ;;  %v10039_v4 = vand.u32 4294901760, %v3083_v42  ;;  %v3930_v59 = vld [vmem:[#allocation4 + $0x50] sm:$0xff]  ;;  %v10223_v46 = vsub.f32 %v3931_v1, %v10214_v32 }
 0x20e   : > { %v3363_v17 = vand.u32 4294901760, %v3362_v30  ;;  %v3926_v30 = vld [vmem:[#allocation4 + $0x30] sm:$0xff] }
 0x20f   : > { %v3067_v24 = vadd.f32 %v3060_v47, %v2539_v39  ;;  %v10046_v23 = vsub.f32 %v3083_v42, %v10039_v4  ;;  %v10225_v39 = vand.u32 4294901760, %v3930_v59  ;;  %v3929_v42 = vld [vmem:[#allocation4 + $0x48] sm:$0xff] }
 0x210   : > { %3167 = vmatmul.f32.gmra.mxu1 %v9926_v56  ;;  %3262 = vmatmul.f32.vlgmr.msra.gmra.mxu0 %v9896_v36 }
 0x211   : > { %v3079_v0 = vadd.f32 %v3071_v45, %v3067_v24  ;;  %v10067_v28 = vand.u32 4294901760, %v10046_v23  ;;  %v10232_v24 = vand.u32 4294901760, %v3929_v42 }
 0x213   : > { %v3085_v63 = vmax.f32 %v3079_v0, 0.0  ;;  %v3356_v60 = vsub.f32 %v10046_v23, %v10067_v28  ;;  %v10236_v0 = vsub.f32 %v3930_v59, %v10225_v39 }
 0x215   : > { %v10043_v41 = vand.u32 4294901760, %v3085_v63 }
 0x217   : > { %3312 = vmatpush.msra.mxu2 %v10043_v41  ;;  %3421 = vmatpush.msrb.mxu1 %v10043_v41  ;;  %v10051_v43 = vsub.f32 %v3085_v63, %v10043_v41 }
 0x218   : > { %3266 = vmatmul.f32.gmra.mxu0 %v9926_v56  ;;  %3290 = vmatmul.f32.vlgmr.msra.gmra.mxu1 %v9896_v36 }
 0x219   : > { %3314 = vmatpush.msra.mxu2 %v10039_v4  ;;  %3389 = vmatpush.msrb.mxu0 %v10051_v43  ;;  %v10064_v35 = vand.u32 4294901760, %v10051_v43 }
 0x21a   : > { %3423 = vmatpush.msrb.mxu1 %v10039_v4 }
 0x21b   : > { %3316 = vmatpush.msra.mxu2 %v10041_v8  ;;  %3392 = vmatpush.msrb.mxu0 %v10046_v23  ;;  %v3350_v44 = vsub.f32 %v10051_v43, %v10064_v35 }
 0x21c   : > { %3425 = vmatpush.msrb.mxu1 %v10041_v8  ;;  %3322 = vmatmul.f32.vlgmr.msra.gmra.mxu2 %v9968_v11  ;;  %v8544_v11 = vld [vmem:[%s12978_s3 + $0x18] sm:$0xf] }
 0x21d   : > { %3455 = vmatpush.msrb.mxu2 %v10064_v35  ;;  %v3351_v58 = vand.u32 4294901760, %v3350_v44  ;;  %3395 = vmatpush.msrb.mxu0 %v10054_v62  ;;  %v3508_v18 = vsel %vm3088_vm5, %v8544_v11, 0  ;;  %v10258_v44 = vand.u32 4294901760, %v3927_v48 }
 0x21e   : > { %3564 = vmatpush.msra.mxu1 %v10003_v37  ;;  %v3357_v37 = vand.u32 4294901760, %v3356_v60 }
 0x21f   : > { %3459 = vmatpush.msrb.mxu2 %v10067_v28  ;;  %3524 = vmatpush.msra.mxu0 %v9949_v21 }
 0x220   : > { %3570 = vmatpush.msra.mxu1 %v10014_v19  ;;  %3352 = vmatpush.msra.mxu3 %v3351_v58  ;;  %v10110_v19 = vand.u32 4294901760, %v3508_v18 }
 0x221   : > { %3294 = vmatmul.f32.gmra.mxu1 %v9926_v56  ;;  %3398 = vmatmul.f32.vlgmr.msrb.gmra.mxu0 %v9909_v52  ;;  %v10108_v52 = vand.u32 4294901760, %v10098_v40 }
 0x222   : > { %3463 = vmatpush.msrb.mxu2 %v10076_v57  ;;  %3526 = vmatpush.msra.mxu0 %v9915_v29 }
 0x223   : > { %3576 = vmatpush.msra.mxu1 %v10023_v10  ;;  %3358 = vmatpush.msra.mxu3 %v3357_v37  ;;  %v3932_v10 = vld [vmem:[#allocation4 + $0x60] sm:$0xff] }
 0x224   : > { %3601 = vmatpush.msra.mxu2 %v9964_v6  ;;  %3528 = vmatpush.msra.mxu0 %v9929_v50  ;;  %v3532_v6 = vsub.f32 %v10098_v40, %v10108_v52  ;;  %v10196_v45 = vand.u32 4294901760, %v3932_v10 }
 0x225   : > { %3364 = vmatpush.msra.mxu3 %v3363_v17  ;;  %3330 = vmatmul.f32.gmra.mxu2 %v10016_v31 }
 0x226   : > { %3667 = vmatpush.msrb.mxu0 %v9979_v61  ;;  %3604 = vmatpush.msra.mxu2 %v9935_v14  ;;  %v3538_v61 = vsub.f32 %v3508_v18, %v10110_v19  ;;  %v3533_v14 = vand.u32 4294901760, %v3532_v6  ;;  %v10206_v25 = vsub.f32 %v3932_v10, %v10196_v45  ;;  %v10276_v18 = vsub.f32 %v3927_v48, %v10258_v44 }
 0x227   : > { %3366 = vmatmul.f32.vlgmr.msra.gmra.mxu3 %v9896_v36 }
 0x228   : > { %3487 = vmatpush.msrb.mxu3 %v10043_v41  ;;  %3607 = vmatpush.msra.mxu2 %v9952_v22  ;;  %v3539_v22 = vand.u32 4294901760, %v3538_v61  ;;  %v4014_v55 = vand.u32 4294901760, %v10206_v25 }
 0x229   : > { %3671 = vmatpush.msrb.mxu0 %v9957_v2  ;;  %3429 = vmatmul.f32.vlgmr.msrb.gmra.mxu1 %v9924_v20 }
 0x22a   : > { %3489 = vmatpush.msrb.mxu3 %v10039_v4  ;;  %3403 = vmatmul.f32.gmra.mxu0 %v9946_v26  ;;  %v3540_v20 = vsub.f32 %v3538_v61, %v3539_v22  ;;  %v3934_v26 = vld [vmem:[#allocation4 + $0x70] sm:$0xff]  ;;  %v4015_v16 = vsub.f32 %v10206_v25, %v4014_v55 }
 0x22b   : > { %3675 = vmatpush.msrb.mxu0 %v9982_v5  ;;  %3699 = vmatpush.msrb.mxu1 %v9949_v21  ;;  %v10176_v2 = vand.u32 4294901760, %v3934_v26 }
 0x22c   : > { %3491 = vmatpush.msrb.mxu3 %v10041_v8  ;;  %v4016_v63 = vand.u32 4294901760, %v4015_v16 }
 0x22d   : > { %3701 = vmatpush.msrb.mxu1 %v9915_v29  ;;  %3465 = vmatmul.f32.vlgmr.msrb.gmra.mxu2 %v9896_v36  ;;  %v10182_v31 = vsub.f32 %v3934_v26, %v10176_v2 }
 0x22e   : > { %3633 = vmatpush.msra.mxu3 %v9949_v21  ;;  %3727 = vmatpush.msrb.mxu2 %v10043_v41 }
 0x22f   : > { %3370 = vmatmul.f32.gmra.mxu3 %v9926_v56  ;;  %3703 = vmatpush.msrb.mxu1 %v9929_v50  ;;  %v4002_v7 = vand.u32 4294901760, %v10182_v31 }
 0x230   : > { %3635 = vmatpush.msra.mxu3 %v9915_v29  ;;  %3729 = vmatpush.msrb.mxu2 %v10039_v4  ;;  %v3541_v29 = vand.u32 4294901760, %v3540_v20  ;;  %v3924_v20 = vld [vmem:[#allocation4 + $0x20] sm:$0xff] }
 0x231   : > { %3435 = vmatmul.f32.gmra.mxu1 %v9971_v27  ;;  %v3933_v27 = vld [vmem:[#allocation4 + $0x68] sm:$0xff]  ;;  %v4003_v54 = vsub.f32 %v10182_v31, %v4002_v7  ;;  %v10296_v26 = vand.u32 4294901760, %v3924_v20 }
 0x232   : > { %3637 = vmatpush.msra.mxu3 %v9929_v50  ;;  %3534 = vmatmul.f32.vlgmr.msra.gmra.mxu0 %v3533_v14  ;;  %v10184_v34 = vand.u32 4294901760, %v3933_v27 }
 0x233   : > { %3804 = vmatpush.msra.mxu0 %v10051_v43  ;;  %3731 = vmatpush.msrb.mxu2 %v10041_v8  ;;  %v4004_v38 = vand.u32 4294901760, %v4003_v54 }
 0x234   : > { %v10194_v33 = vsub.f32 %v3933_v27, %v10184_v34 }
 0x235   : > { %3807 = vmatpush.msra.mxu0 %v10046_v23  ;;  %3469 = vmatmul.f32.gmra.mxu2 %v9926_v56 }
 0x236   : > { %v4008_v53 = vand.u32 4294901760, %v10194_v33 }
 0x237   : > { %3493 = vmatmul.f32.vlgmr.msrb.gmra.mxu3 %v9896_v36  ;;  %3810 = vmatpush.msra.mxu0 %v10054_v62  ;;  %v3935_v36 = vld [vmem:[#allocation4 + $0x78] sm:$0xff]  ;;  %v4026_v62 = vand.u32 4294901760, %v10236_v0 }
 0x238   : > { %3767 = vmatpush.msrb.mxu3 %v3351_v58  ;;  %v4009_v13 = vsub.f32 %v10194_v33, %v4008_v53 }
 0x239   : > { %3578 = vmatmul.f32.vlgmr.msra.gmra.mxu1 %v10084_v51 }
 0x23a   : > { %3542 = vmatmul.f32.gmra.mxu0 %v3541_v29  ;;  %3773 = vmatpush.msrb.mxu3 %v3357_v37  ;;  %v4010_v47 = vand.u32 4294901760, %v4009_v13 }
 0x23b   : > { %3836 = vmatpush.msra.mxu1 %v10043_v41 }
 0x23c   : > { %3779 = vmatpush.msrb.mxu3 %v3363_v17  ;;  %v10278_v17 = vand.u32 4294901760, %v3926_v30 }
 0x23d   : > { %3838 = vmatpush.msra.mxu1 %v10039_v4  ;;  %3610 = vmatmul.f32.vlgmr.msra.gmra.mxu2 %v10098_v40 }
 0x23e   : > { %3870 = vmatpush.msra.mxu2 %v10064_v35 }
 0x23f   : > { %3497 = vmatmul.f32.gmra.mxu3 %v9926_v56  ;;  %3840 = vmatpush.msra.mxu1 %v10041_v8  ;;  %v10169_v56 = vand.u32 4294901760, %v3935_v36 }
 0x240   : > { %3874 = vmatpush.msra.mxu2 %v10067_v28 }
 0x241   : > { %3582 = vmatmul.f32.gmra.mxu1 %v10110_v19  ;;  %v10174_v21 = vsub.f32 %v3935_v36, %v10169_v56 }
 0x242   : > { %3677 = vmatmul.f32.vlgmr.msrb.gmra.mxu0 %v10084_v51  ;;  %3878 = vmatpush.msra.mxu2 %v10076_v57 }
 0x243   : > { %3946 = vmatpush.msrb.mxu0 %v10169_v56  ;;  %v3996_v5 = vand.u32 4294901760, %v10174_v21 }
 0x245   : > { %3615 = vmatmul.f32.gmra.mxu2 %v3538_v61  ;;  %3948 = vmatpush.msrb.mxu0 %v10176_v2  ;;  %v3997_v49 = vsub.f32 %v10174_v21, %v3996_v5 }
 0x247   : > { %3641 = vmatmul.f32.vlgmr.msra.gmra.mxu3 %v10108_v52  ;;  %3950 = vmatpush.msrb.mxu0 %v10184_v34  ;;  %v3998_v15 = vand.u32 4294901760, %v3997_v49  ;;  %v3923_v49 = vld [vmem:[#allocation4 + $0x18] sm:$0xff] }
 0x248   : > { %3902 = vmatpush.msra.mxu3 %v10043_v41  ;;  %v10241_v41 = vsub.f32 %v3929_v42, %v10232_v24  ;;  %v10309_v54 = vand.u32 4294901760, %v3923_v49  ;;  %v3922_v42 = vld [vmem:[#allocation4 + $0x10] sm:$0xff] }
 0x249   : > { %3705 = vmatmul.f32.vlgmr.msrb.gmra.mxu1 %v10084_v51  ;;  %3952 = vmatpush.msrb.mxu0 %v10196_v45 }
 0x24a   : > { %3681 = vmatmul.f32.gmra.mxu0 %v10110_v19  ;;  %3904 = vmatpush.msra.mxu3 %v10039_v4  ;;  %v4020_v4 = vand.u32 4294901760, %v10223_v46  ;;  %v4032_v28 = vand.u32 4294901760, %v10241_v41 }
 0x24b   : > { %3999 = vmatpush.msrb.mxu1 %v3998_v15  ;;  %3954 = vmatpush.msrb.mxu0 %v10214_v32  ;;  %v10307_v15 = vsub.f32 %v3924_v20, %v10296_v26  ;;  %v3920_v20 = vld [vmem:[#allocation4] sm:$0xff] }
 0x24c   : > { %3906 = vmatpush.msra.mxu3 %v10041_v8  ;;  %v3928_v8 = vld [vmem:[#allocation4 + $0x40] sm:$0xff]  ;;  %v4021_v43 = vsub.f32 %v10223_v46, %v4020_v4  ;;  %v4033_v11 = vsub.f32 %v10241_v41, %v4032_v28 }
 0x24d   : > { %3737 = vmatmul.f32.vlgmr.msrb.gmra.mxu2 %v3533_v14  ;;  %4005 = vmatpush.msrb.mxu1 %v4004_v38  ;;  %v10243_v23 = vand.u32 4294901760, %v3928_v8  ;;  %v4044_v14 = vand.u32 4294901760, %v10276_v18 }
 0x24e   : > { %4101 = vmatpush.msrb.mxu2 %v10174_v21  ;;  %3956 = vmatpush.msrb.mxu0 %v10225_v39  ;;  %v4022_v60 = vand.u32 4294901760, %v4021_v43 }
 0x24f   : > { %3647 = vmatmul.f32.gmra.mxu3 %v3539_v22  ;;  %4011 = vmatpush.msrb.mxu1 %v4010_v47  ;;  %v10256_v12 = vsub.f32 %v3928_v8, %v10243_v23  ;;  %v4045_v27 = vsub.f32 %v10276_v18, %v4044_v14  ;;  %v12988_v8 = vand.u32 4294901760, %v10307_v15 }
 0x250   : > { %4104 = vmatpush.msrb.mxu2 %v10182_v31  ;;  %3958 = vmatpush.msrb.mxu0 %v10232_v24 }
 0x251   : > { %3709 = vmatmul.f32.gmra.mxu1 %v10110_v19  ;;  %v4038_v37 = vand.u32 4294901760, %v10256_v12  ;;  %v4046_v38 = vand.u32 4294901760, %v4045_v27 }
 0x252   : > { %3813 = vmatmul.f32.vlgmr.msra.gmra.mxu0 %v10098_v40  ;;  %4107 = vmatpush.msrb.mxu2 %v10194_v33 }
 0x253   : > { %4017 = vmatpush.msrb.mxu1 %v4016_v63  ;;  %3960 = vmatpush.msrb.mxu0 %v10243_v23  ;;  %v4039_v6 = vsub.f32 %v10256_v12, %v4038_v37 }
 0x254   : > { %4110 = vmatpush.msrb.mxu2 %v10206_v25  ;;  %v13072_v25 = vand.u32 4294901760, %v10307_v15 }
 0x255   : > { %3745 = vmatmul.f32.gmra.mxu2 %v3541_v29  ;;  %4023 = vmatpush.msrb.mxu1 %v4022_v60  ;;  %v4040_v29 = vand.u32 4294901760, %v4039_v6  ;;  %v10332_v60 = vsub.f32 %v3923_v49, %v10309_v54  ;;  %v10352_v49 = vand.u32 4294901760, %v3920_v20 }
 0x256   : > { %4113 = vmatpush.msrb.mxu2 %v10223_v46  ;;  %3962 = vmatpush.msrb.mxu0 %v10258_v44 }
 0x257   : > { %3781 = vmatmul.f32.vlgmr.msrb.gmra.mxu3 %v10084_v51 }
 0x258   : > { %4159 = vmatpush.msrb.mxu3 %v10169_v56  ;;  %4116 = vmatpush.msrb.mxu2 %v10236_v0 }
 0x259   : > { %3844 = vmatmul.f32.vlgmr.msra.gmra.mxu1 %v10108_v52  ;;  %v3925_v52 = vld [vmem:[#allocation4 + $0x28] sm:$0xff]  ;;  %3964 = vmatpush.msrb.mxu0 %v10278_v17 }
 0x25a   : > { %3818 = vmatmul.f32.gmra.mxu0 %v3538_v61  ;;  %4161 = vmatpush.msrb.mxu3 %v10176_v2  ;;  %v10284_v61 = vand.u32 4294901760, %v3925_v52 }
 0x25b   : > { %4119 = vmatpush.msrb.mxu2 %v10241_v41  ;;  %v3937_v41 = vld [vmem:[#allocation4 + $0x88] sm:$0xff] }
 0x25c   : > { %4163 = vmatpush.msrb.mxu3 %v10184_v34  ;;  %v10294_v36 = vsub.f32 %v3925_v52, %v10284_v61  ;;  %3966 = vmatpush.msrb.mxu0 %v10284_v61 }
 0x25d   : > { %3880 = vmatmul.f32.vlgmr.msra.gmra.mxu2 %v10084_v51 }
 0x25e   : > { %4165 = vmatpush.msrb.mxu3 %v10196_v45  ;;  %4122 = vmatpush.msrb.mxu2 %v10256_v12  ;;  %v4056_v1 = vand.u32 4294901760, %v10294_v36 }
 0x25f   : > { %3785 = vmatmul.f32.gmra.mxu3 %v10110_v19  ;;  %3968 = vmatpush.msrb.mxu0 %v10296_v26 }
 0x260   : > { %4167 = vmatpush.msrb.mxu3 %v10214_v32  ;;  %4125 = vmatpush.msrb.mxu2 %v10276_v18  ;;  %v4057_v16 = vsub.f32 %v10294_v36, %v4056_v1 }
 0x261   : > { %3850 = vmatmul.f32.gmra.mxu1 %v3539_v22  ;;  %v10290_v22 = vsub.f32 %v3926_v30, %v10278_v17  ;;  %v3921_v30 = vld [vmem:[#allocation4 + $0x8] sm:$0xff]  ;;  %3970 = vmatpush.msrb.mxu0 %v10309_v54 }
 0x262   : > { %4169 = vmatpush.msrb.mxu3 %v10225_v39  ;;  %v10340_v52 = vand.u32 4294901760, %v3921_v30 }
 0x263   : > { %v4050_v10 = vand.u32 4294901760, %v10290_v22  ;;  %4128 = vmatpush.msrb.mxu2 %v10290_v22 }
 0x264   : > { %4171 = vmatpush.msrb.mxu3 %v10232_v24  ;;  %v10350_v27 = vsub.f32 %v3921_v30, %v10340_v52 }
 0x265   : > { %3884 = vmatmul.f32.gmra.mxu2 %v10110_v19  ;;  %v4051_v13 = vsub.f32 %v10290_v22, %v4050_v10 }
 0x266   : > { %4173 = vmatpush.msrb.mxu3 %v10243_v23  ;;  %4131 = vmatpush.msrb.mxu2 %v10294_v36 }
 0x267   : > { %3908 = vmatmul.f32.vlgmr.msra.gmra.mxu3 %v10084_v51  ;;  %v4027_v51 = vsub.f32 %v10236_v0, %v4026_v62  ;;  %v4052_v48 = vand.u32 4294901760, %v4051_v13 }
 0x268   : > { %4175 = vmatpush.msrb.mxu3 %v10258_v44  ;;  %4134 = vmatpush.msrb.mxu2 %v10307_v15 }
 0x269   : > { %v4028_v40 = vand.u32 4294901760, %v4027_v51  ;;  %v10334_v51 = vand.u32 4294901760, %v3922_v42 }
 0x26a   : > { %4177 = vmatpush.msrb.mxu3 %v10278_v17  ;;  %4137 = vmatpush.msrb.mxu2 %v10332_v60 }
 0x26b   : > { %4029 = vmatpush.msrb.mxu1 %v4028_v40  ;;  %v4063_v40 = vsub.f32 %v10307_v15, %v12988_v8  ;;  %v10346_v6 = vsub.f32 %v3922_v42, %v10334_v51  ;;  %3972 = vmatpush.msrb.mxu0 %v10334_v51  ;;  %v4080_v42 = vand.u32 4294901760, %v10350_v27 }
 0x26c   : > { %4179 = vmatpush.msrb.mxu3 %v10284_v61 }
 0x26d   : > { %v4074_v13 = vand.u32 4294901760, %v10346_v6  ;;  %3974 = vmatpush.msrb.mxu0 %v10340_v52  ;;  %4140 = vmatpush.msrb.mxu2 %v10346_v6 }
 0x26e   : > { %4181 = vmatpush.msrb.mxu3 %v10296_v26 }
 0x26f   : > { %3912 = vmatmul.f32.gmra.mxu3 %v10110_v19  ;;  %v4034_v19 = vand.u32 4294901760, %v4033_v11  ;;  %v4058_v11 = vand.u32 4294901760, %v4057_v16  ;;  %v4085_v16 = vsub.f32 %v3920_v20, %v10352_v49  ;;  %v4075_v30 = vsub.f32 %v10346_v6, %v4074_v13  ;;  %3976 = vmatpush.msrb.mxu0 %v10352_v49 }
 0x270   : > { %4183 = vmatpush.msrb.mxu3 %v10309_v54  ;;  %4143 = vmatpush.msrb.mxu2 %v10350_v27 }
 0x271   : > { %4035 = vmatpush.msrb.mxu1 %v4034_v19  ;;  %v12987_v19 = vand.u32 4294901760, %v10332_v60  ;;  %4206 = vmatpush.msra.mxu0 %v3996_v5  ;;  %v4076_v8 = vand.u32 4294901760, %v4075_v30 }
 0x272   : > { %4185 = vmatpush.msrb.mxu3 %v10334_v51  ;;  %4146 = vmatpush.msrb.mxu2 %v4085_v16 }
 0x273   : > { %4041 = vmatpush.msrb.mxu1 %v4040_v29  ;;  %v4064_v29 = vand.u32 4294901760, %v4063_v40  ;;  %v4086_v40 = vand.u32 4294901760, %v4085_v16  ;;  %4210 = vmatpush.msra.mxu0 %v4002_v7 }
 0x274   : > { %4187 = vmatpush.msrb.mxu3 %v10340_v52 }
 0x275   : > { %4047 = vmatpush.msrb.mxu1 %v4046_v38  ;;  %v4069_v38 = vsub.f32 %v10332_v60, %v12987_v19  ;;  %4214 = vmatpush.msra.mxu0 %v4008_v53 }
 0x276   : > { %4189 = vmatpush.msrb.mxu3 %v10352_v49 }
 0x277   : > { %4053 = vmatpush.msrb.mxu1 %v4052_v48  ;;  %v4070_v48 = vand.u32 4294901760, %v4069_v38  ;;  %v4087_v38 = vsub.f32 %v4085_v16, %v4086_v40  ;;  %4218 = vmatpush.msra.mxu0 %v4014_v55 }
 0x279   : > { %4059 = vmatpush.msrb.mxu1 %v4058_v11  ;;  %v4081_v11 = vsub.f32 %v10350_v27, %v4080_v42  ;;  %v4088_v5 = vand.u32 4294901760, %v4087_v38  ;;  %4222 = vmatpush.msra.mxu0 %v4020_v4 }
 0x27b   : > { %4065 = vmatpush.msrb.mxu1 %v4064_v29  ;;  %v4082_v6 = vand.u32 4294901760, %v4081_v11  ;;  %4226 = vmatpush.msra.mxu0 %v4026_v62 }
 0x27d   : > { %v10171_v50 = vpop.f32.mrf.mxu0  ;;  %4071 = vmatpush.msrb.mxu1 %v4070_v48  ;;  %4230 = vmatpush.msra.mxu0 %v4032_v28  ;;  %v4331_v28 = vand.u32 4294901760, %v3937_v41 }
 0x27f   : > { %4077 = vmatpush.msrb.mxu1 %v4076_v8  ;;  %4234 = vmatpush.msra.mxu0 %v4038_v37  ;;  %v10443_v37 = vsub.f32 %v3937_v41, %v4331_v28 }
 0x280   : > { %4332 = vmatpush.msra.mxu2 %v4331_v28 }
 0x281   : > { %4083 = vmatpush.msrb.mxu1 %v4082_v6  ;;  %4238 = vmatpush.msra.mxu0 %v4044_v14  ;;  %v4368_v14 = vand.u32 4294901760, %v10443_v37 }
 0x283   : > { %4089 = vmatpush.msrb.mxu1 %v4088_v5  ;;  %4242 = vmatpush.msra.mxu0 %v4050_v10 }
 0x285   : > { %v10210_v9 = vpop.f32.mrf.mxu1  ;;  %v10212_v3 = vpop.f32.mrf.mxu0  ;;  %4277 = vmatpush.msra.mxu1 %v10169_v56  ;;  %4246 = vmatpush.msra.mxu0 %v4056_v1 }
 0x286   : > { %v10252_v35 = vpop.f32.mrf.mxu2  ;;  %v10327_v63 = vpop.f32.mrf.mxu3  ;;  %v3165_v4 = vadd.f32 %v10210_v9, %v10171_v50 }
 0x287   : > { %4279 = vmatpush.msra.mxu1 %v10176_v2  ;;  %4250 = vmatpush.msra.mxu0 %v13072_v25 }
 0x288   : > { %v3197_v12 = vadd.f32 %v10252_v35, %v3165_v4 }
 0x289   : > { %4281 = vmatpush.msra.mxu1 %v10184_v34 }
 0x28b   : > { %4283 = vmatpush.msra.mxu1 %v10196_v45 }
 0x28d   : > { %v10261_v57 = vpop.f32.mrf.mxu1  ;;  %v10263_v58 = vpop.f32.mrf.mxu0  ;;  %4285 = vmatpush.msra.mxu1 %v10214_v32  ;;  %v13073_v32 = vand.u32 4294901760, %v10332_v60 }
 0x28e   : > { %v10319_v47 = vpop.f32.mrf.mxu2  ;;  %v10380_v21 = vpop.f32.mrf.mxu3  ;;  %v3169_v9 = vadd.f32 %v10261_v57, %v10212_v3 }
 0x28f   : > { %4287 = vmatpush.msra.mxu1 %v10225_v39  ;;  %4254 = vmatpush.msra.mxu0 %v13073_v32 }
 0x291   : > { %4289 = vmatpush.msra.mxu1 %v10232_v24  ;;  %4258 = vmatpush.msra.mxu0 %v4074_v13 }
 0x293   : > { %4291 = vmatpush.msra.mxu1 %v10243_v23  ;;  %4262 = vmatpush.msra.mxu0 %v4080_v42 }
 0x295   : > { %v10313_v59 = vpop.f32.mrf.mxu1  ;;  %v10329_v43 = vpop.f32.mrf.mxu0  ;;  %4293 = vmatpush.msra.mxu1 %v10258_v44  ;;  %4266 = vmatpush.msra.mxu0 %v4086_v40  ;;  %v3936_v44 = vld [vmem:[#allocation4 + $0x80] sm:$0xff] }
 0x296   : > { %v4333_v18 = vand.u32 4294901760, %v3936_v44 }
 0x297   : > { %4295 = vmatpush.msra.mxu1 %v10278_v17  ;;  %v3228_v17 = vadd.f32 %v10327_v63, %v3197_v12 }
 0x298   : > { %4334 = vmatpush.msra.mxu2 %v4333_v18  ;;  %v4373_v22 = vsub.f32 %v3936_v44, %v4333_v18  ;;  %v4522_v44 = vld [vmem:[#allocation4 + $0x100] sm:$0xff] }
 0x299   : > { %4297 = vmatpush.msra.mxu1 %v10284_v61  ;;  %v3264_v8 = vadd.f32 %v10263_v58, %v3228_v17 }
 0x29a   : > { %v4374_v10 = vand.u32 4294901760, %v4373_v22 }
 0x29b   : > { %4299 = vmatpush.msra.mxu1 %v10296_v26  ;;  %v4369_v26 = vsub.f32 %v10443_v37, %v4368_v14  ;;  %v3292_v27 = vadd.f32 %v10313_v59, %v3264_v8 }
 0x29c   : > { %v4375_v3 = vsub.f32 %v4373_v22, %v4374_v10 }
 0x29d   : > { %4301 = vmatpush.msra.mxu1 %v10309_v54  ;;  %v3202_v54 = vadd.f32 %v10319_v47, %v3169_v9  ;;  %v4521_v9 = vld [vmem:[#allocation4 + $0xf8] sm:$0xff] }
 0x29e   : > { %v10371_v19 = vpop.f32.mrf.mxu1  ;;  %v10373_v20 = vpop.f32.mrf.mxu0 }
 0x29f   : > { %v10376_v29 = vpop.f32.mrf.mxu2  ;;  %4303 = vmatpush.msra.mxu1 %v10334_v51  ;;  %v4370_v51 = vand.u32 4294901760, %v4369_v26  ;;  %v10500_v26 = vand.u32 4294901760, %v4521_v9 }
 0x2a1   : > { %4305 = vmatpush.msra.mxu1 %v10340_v52  ;;  %4371 = vmatpush.msra.mxu3 %v4370_v51  ;;  %v4376_v52 = vand.u32 4294901760, %v4375_v3  ;;  %v10513_v3 = vsub.f32 %v4521_v9, %v10500_v26 }
 0x2a3   : > { %4307 = vmatpush.msra.mxu1 %v10352_v49  ;;  %v3234_v49 = vadd.f32 %v10380_v21, %v3202_v54  ;;  %4377 = vmatpush.msra.mxu3 %v4376_v52  ;;  %v4518_v52 = vld [vmem:[#allocation4 + $0xe0] sm:$0xff] }
 0x2a5   : > { %v3268_v58 = vadd.f32 %v10329_v43, %v3234_v49 }
 0x2a6   : > { %v10389_v31 = vpop.f32.mrf.mxu1 }
 0x2a7   : > { %v10396_v33 = vpop.f32.mrf.mxu0  ;;  %v3296_v59 = vadd.f32 %v10371_v19, %v3268_v58 }
 0x2a8   : > { %v10398_v53 = vpop.f32.mrf.mxu2 }
 0x2aa   : > { %v10394_v7 = vpop.f32.mrf.mxu3 }
 0x2ae   : > { %v10409_v56 = vpop.f32.mrf.mxu1 }
 0x2af   : > { %v3535_v45 = vpop.f32.mrf.mxu0 }
 0x2b0   : > { %v10416_v34 = vpop.f32.mrf.mxu2 }
 0x2b2   : > { %v10414_v2 = vpop.f32.mrf.mxu3 }
 0x2b6   : > { %v3579_v55 = vpop.f32.mrf.mxu1 }
 0x2b7   : > { %v3543_v24 = vpop.f32.mrf.mxu0  ;;  %v3580_v50 = vadd.f32 %v3579_v55, %v3535_v45 }
 0x2b8   : > { %v10428_v46 = vpop.f32.mrf.mxu2 }
 0x2ba   : > { %v10430_v39 = vpop.f32.mrf.mxu3 }
 0x2be   : > { %v3583_v0 = vpop.f32.mrf.mxu1 }
 0x2bf   : > { %v3678_v61 = vpop.f32.mrf.mxu0  ;;  %v3584_v57 = vadd.f32 %v3583_v0, %v3543_v24  ;;  %v3368_v0 = vadd.f32 %v10394_v7, %v10376_v29 }
 0x2c0   : > { %v3611_v62 = vpop.f32.mrf.mxu2 }
 0x2c1   : > { %v3612_v36 = vadd.f32 %v3611_v62, %v3580_v50  ;;  %v4523_v62 = vld [vmem:[#allocation4 + $0x108] sm:$0xff]  ;;  %v3400_v29 = vadd.f32 %v10373_v20, %v3368_v0 }
 0x2c2   : > { %v10438_v23 = vpop.f32.mrf.mxu3 }
 0x2c6   : > { %v3706_v35 = vpop.f32.mrf.mxu1 }
 0x2c7   : > { %v3682_v48 = vpop.f32.mrf.mxu0 }
 0x2c8   : > { %v3616_v1 = vpop.f32.mrf.mxu2 }
 0x2c9   : > { %v3617_v42 = vadd.f32 %v3616_v1, %v3584_v57  ;;  %v3372_v1 = vadd.f32 %v10414_v2, %v10398_v53 }
 0x2ca   : > { %v3642_v15 = vpop.f32.mrf.mxu3 }
 0x2cb   : > { %v3643_v60 = vadd.f32 %v3642_v15, %v3612_v36 }
 0x2cd   : > { %v3679_v63 = vadd.f32 %v3678_v61, %v3643_v60  ;;  %v4519_v60 = vld [vmem:[#allocation4 + $0xe8] sm:$0xff] }
 0x2ce   : > { %v3710_v6 = vpop.f32.mrf.mxu1 }
 0x2cf   : > { %v3707_v13 = vadd.f32 %v3706_v35, %v3679_v63  ;;  %v3814_v41 = vpop.f32.mrf.mxu0 }
 0x2d0   : > { %v3738_v47 = vpop.f32.mrf.mxu2 }
 0x2d1   : > { %v3916_v16 = vmax.f32 %v3292_v27, %v3707_v13  ;;  %v3405_v27 = vadd.f32 %v10396_v33, %v3372_v1  ;;  %v10531_v33 = vand.u32 4294901760, %v4518_v52 }
 0x2d2   : > { %v3648_v30 = vpop.f32.mrf.mxu3 }
 0x2d3   : > { %v10455_v11 = vand.u32 4294901760, %v3916_v16  ;;  %v3649_v40 = vadd.f32 %v3648_v30, %v3617_v42  ;;  %v10524_v42 = vand.u32 4294901760, %v4519_v60  ;;  %v4517_v30 = vld [vmem:[#allocation4 + $0xd8] sm:$0xff] }
 0x2d5   : > { %v10458_v38 = vsub.f32 %v3916_v16, %v10455_v11  ;;  %v3683_v5 = vadd.f32 %v3682_v48, %v3649_v40  ;;  %4091 = vmatmul.f32.vlgmr.msrb.gmra.mxu1 %v10455_v11 }
 0x2d6   : > { %4495 = vmatpush.msrb.mxu1 %v4331_v28  ;;  %v3845_v7 = vpop.f32.mrf.mxu1 }
 0x2d7   : > { %v3711_v21 = vadd.f32 %v3710_v6, %v3683_v5  ;;  %4149 = vmatmul.f32.vlgmr.msrb.gmra.mxu2 %v10458_v38  ;;  %v10464_v45 = vand.u32 4294901760, %v10458_v38  ;;  %v3819_v63 = vpop.f32.mrf.mxu0  ;;  %v4516_v5 = vld [vmem:[#allocation4 + $0xd0] sm:$0xff] }
 0x2d8   : > { %4497 = vmatpush.msrb.mxu1 %v4333_v18  ;;  %4403 = vmatpush.msrb.mxu2 %v10443_v37  ;;  %v3746_v32 = vpop.f32.mrf.mxu2 }
 0x2d9   : > { %v3918_v43 = vmax.f32 %v3296_v59, %v3711_v21  ;;  %4193 = vmatmul.f32.vlgmr.msrb.gmra.mxu3 %v10464_v45  ;;  %v3980_v25 = vsub.f32 %v10458_v38, %v10464_v45  ;;  %v3437_v21 = vadd.f32 %v10409_v56, %v3405_v27 }
 0x2da   : > { %v3782_v55 = vpop.f32.mrf.mxu3  ;;  %4433 = vmatpush.msrb.mxu3 %v4331_v28  ;;  %4406 = vmatpush.msrb.mxu2 %v4373_v22  ;;  %v4520_v22 = vld [vmem:[#allocation4 + $0xf0] sm:$0xff] }
 0x2db   : > { %v10470_v19 = vand.u32 4294901760, %v3918_v43  ;;  %v10472_v24 = vand.u32 4294901760, %v3980_v25  ;;  %v3783_v28 = vadd.f32 %v3782_v55, %v3738_v47  ;;  %v10509_v15 = vand.u32 4294901760, %v4520_v22 }
 0x2dc   : > { %4435 = vmatpush.msrb.mxu3 %v4333_v18  ;;  %v10488_v18 = vand.u32 4294901760, %v4523_v62  ;;  %v12996_v47 = vand.u32 4294901760, %v10513_v3  ;;  %v10545_v25 = vand.u32 4294901760, %v4517_v30  ;;  %v3471_v56 = vadd.f32 %v10428_v46, %v3437_v21 }
 0x2dd   : > { %v10475_v4 = vsub.f32 %v3918_v43, %v10470_v19  ;;  %3982 = vmatmul.f32.vlgmr.msrb.gmra.mxu0 %v10472_v24  ;;  %4095 = vmatmul.f32.gmra.mxu1 %v10470_v19  ;;  %v3815_v17 = vadd.f32 %v3814_v41, %v3783_v28  ;;  %v10519_v2 = vsub.f32 %v4520_v22, %v10509_v15 }
 0x2de   : > { %4466 = vmatpush.msrb.mxu0 %v4368_v14  ;;  %v10493_v14 = vand.u32 4294901760, %v4522_v44  ;;  %v10496_v36 = vsub.f32 %v4523_v62, %v10488_v18  ;;  %v3851_v58 = vpop.f32.mrf.mxu1  ;;  %v4590_v62 = vsub.f32 %v10513_v3, %v12996_v47 }
 0x2df   : > { %4154 = vmatmul.f32.gmra.mxu2 %v10475_v4  ;;  %v10483_v12 = vand.u32 4294901760, %v10475_v4  ;;  %v3846_v54 = vadd.f32 %v3845_v7, %v3815_v17  ;;  %v12995_v59 = vand.u32 4294901760, %v10519_v2  ;;  %v10566_v17 = vsub.f32 %v4517_v30, %v10545_v25 }
 0x2e0   : > { %4470 = vmatpush.msrb.mxu0 %v4374_v10  ;;  %v3881_v35 = vpop.f32.mrf.mxu2  ;;  %v10503_v20 = vsub.f32 %v4522_v44, %v10493_v14  ;;  %v3431_v10 = vadd.f32 %v10389_v31, %v3400_v29  ;;  %v13000_v51 = vand.u32 4294901760, %v10496_v36  ;;  %v10559_v44 = vand.u32 4294901760, %v4516_v5 }
 0x2e1   : > { %4199 = vmatmul.f32.gmra.mxu3 %v10483_v12  ;;  %v3988_v37 = vsub.f32 %v10475_v4, %v10483_v12  ;;  %v3882_v31 = vadd.f32 %v3881_v35, %v3846_v54  ;;  %v4596_v9 = vsub.f32 %v10519_v2, %v12995_v59  ;;  %v4514_v35 = vld [vmem:[#allocation4 + $0xc0] sm:$0xff]  ;;  %v3499_v54 = vadd.f32 %v10438_v23, %v3471_v56  ;;  %v4524_v56 = vld [vmem:[#allocation4 + $0x110] sm:$0xff] }
 0x2e2   : > { %v3786_v50 = vpop.f32.mrf.mxu3  ;;  %v3467_v57 = vadd.f32 %v10416_v34, %v3431_v10  ;;  %v12998_v53 = vand.u32 4294901760, %v10503_v20  ;;  %v4578_v48 = vsub.f32 %v10496_v36, %v13000_v51  ;;  %v10575_v1 = vsub.f32 %v4516_v5, %v10559_v44 }
 0x2e3   : > { %v10491_v61 = vand.u32 4294901760, %v3988_v37  ;;  %v3787_v8 = vadd.f32 %v3786_v50, %v3746_v32  ;;  %v10548_v32 = vsub.f32 %v4518_v52, %v10531_v33  ;;  %v4515_v50 = vld [vmem:[#allocation4 + $0xc8] sm:$0xff]  ;;  %v4597_v23 = vand.u32 4294901760, %v4596_v9 }
 0x2e4   : > { %v3495_v49 = vadd.f32 %v10430_v39, %v3467_v57  ;;  %v10534_v39 = vsub.f32 %v4519_v60, %v10524_v42  ;;  %v4584_v6 = vsub.f32 %v10503_v20, %v12998_v53  ;;  %v4579_v41 = vand.u32 4294901760, %v4578_v48 }
 0x2e5   : > { %3990 = vmatmul.f32.gmra.mxu0 %v10491_v61  ;;  %4309 = vmatmul.f32.vlgmr.msra.gmra.mxu1 %v10455_v11  ;;  %v3820_v34 = vadd.f32 %v3819_v63, %v3787_v8  ;;  %v12992_v10 = vand.u32 4294901760, %v10548_v32  ;;  %v4591_v60 = vand.u32 4294901760, %v4590_v62  ;;  %v10583_v63 = vand.u32 4294901760, %v4515_v50 }
 0x2e6   : > { %4740 = vmatpush.msra.mxu1 %v10488_v18  ;;  %v12994_v37 = vand.u32 4294901760, %v10534_v39  ;;  %v4585_v7 = vand.u32 4294901760, %v4584_v6  ;;  %v10589_v27 = vand.u32 4294901760, %v4514_v35 }
 0x2e7   : > { %v3852_v55 = vadd.f32 %v3851_v58, %v3820_v34  ;;  %v4608_v48 = vsub.f32 %v10548_v32, %v12992_v10  ;;  %v10600_v30 = vsub.f32 %v4515_v50, %v10583_v63  ;;  %v12989_v58 = vand.u32 4294901760, %v10575_v1  ;;  %v4511_v50 = vld [vmem:[#allocation4 + $0xa8] sm:$0xff] }
 0x2e8   : > { %4742 = vmatpush.msra.mxu1 %v10493_v14  ;;  %v3885_v43 = vpop.f32.mrf.mxu2  ;;  %v10606_v6 = vsub.f32 %v4514_v35, %v10589_v27 }
 0x2e9   : > { %v3886_v29 = vadd.f32 %v3885_v43, %v3852_v55  ;;  %v4512_v55 = vld [vmem:[#allocation4 + $0xb0] sm:$0xff]  ;;  %v4620_v9 = vsub.f32 %v10575_v1, %v12989_v58  ;;  %v4509_v58 = vld [vmem:[#allocation4 + $0x98] sm:$0xff] }
 0x2ea   : > { %v3909_v13 = vpop.f32.mrf.mxu3  ;;  %4744 = vmatpush.msra.mxu1 %v10500_v26  ;;  %v10632_v35 = vand.u32 4294901760, %v4512_v55  ;;  %v10686_v59 = vand.u32 4294901760, %v4509_v58 }
 0x2eb   : > { %v3910_v16 = vadd.f32 %v3909_v13, %v3882_v31  ;;  %v4602_v31 = vsub.f32 %v10534_v39, %v12994_v37  ;;  %v4525_v13 = vld [vmem:[#allocation4 + $0x118] sm:$0xff] }
 0x2ec   : > { %4746 = vmatpush.msra.mxu1 %v10509_v15 }
 0x2ed   : > { %v3917_v40 = vmax.f32 %v3495_v49, %v3910_v16  ;;  %4268 = vmatmul.f32.vlgmr.msra.gmra.mxu0 %v10455_v11  ;;  %4313 = vmatmul.f32.gmra.mxu1 %v10470_v19  ;;  %v12991_v49 = vand.u32 4294901760, %v10566_v17  ;;  %v4513_v16 = vld [vmem:[#allocation4 + $0xb8] sm:$0xff]  ;;  %v4603_v43 = vand.u32 4294901760, %v4602_v31 }
 0x2ee   : > { %4682 = vmatpush.msra.mxu0 %v10496_v36  ;;  %4748 = vmatpush.msra.mxu1 %v10524_v42 }
 0x2ef   : > { %v3940_v0 = vsel %vm3938_vm6, %v3917_v40, 0  ;;  %v4614_v62 = vsub.f32 %v10566_v17, %v12991_v49 }
 0x2f0   : > { %v10555_v28 = vand.u32 4294901760, %v3940_v0  ;;  %4685 = vmatpush.msra.mxu0 %v10503_v20  ;;  %4750 = vmatpush.msra.mxu1 %v10531_v33 }
 0x2f2   : > { %v10569_v46 = vsub.f32 %v3940_v0, %v10555_v28  ;;  %v3913_v22 = vpop.f32.mrf.mxu3  ;;  %4379 = vmatmul.f32.vlgmr.msra.gmra.mxu3 %v10555_v28  ;;  %4688 = vmatpush.msra.mxu0 %v10513_v3  ;;  %v10613_v0 = vand.u32 4294901760, %v4525_v13 }
 0x2f3   : > { %v3914_v8 = vadd.f32 %v3913_v22, %v3886_v29  ;;  %4580 = vmatpush.msra.mxu3 %v4579_v41  ;;  %4752 = vmatpush.msra.mxu1 %v10545_v25  ;;  %v10616_v41 = vand.u32 4294901760, %v4513_v16  ;;  %v12990_v22 = vand.u32 4294901760, %v10600_v30 }
 0x2f4   : > { %v10580_v57 = vand.u32 4294901760, %v10569_v46  ;;  %4691 = vmatpush.msra.mxu0 %v10519_v2 }
 0x2f5   : > { %v3919_v52 = vmax.f32 %v3499_v54, %v3914_v8  ;;  %4586 = vmatpush.msra.mxu3 %v4585_v7  ;;  %4754 = vmatpush.msra.mxu1 %v10559_v44  ;;  %v4609_v7 = vand.u32 4294901760, %v4608_v48  ;;  %v10635_v54 = vsub.f32 %v4513_v16, %v10616_v41  ;;  %v12993_v8 = vand.u32 4294901760, %v10606_v6 }
 0x2f6   : > { %4272 = vmatmul.f32.gmra.mxu0 %v10470_v19  ;;  %4499 = vmatmul.f32.vlgmr.msrb.gmra.mxu1 %v10555_v28  ;;  %v4338_v34 = vsub.f32 %v10569_v46, %v10580_v57  ;;  %v10649_v16 = vand.u32 4294901760, %v4511_v50  ;;  %v10652_v48 = vsub.f32 %v4512_v55, %v10632_v35 }
 0x2f7   : > { %v3943_v40 = vsel %vm3938_vm6, %v3919_v52, 0  ;;  %4592 = vmatpush.msra.mxu3 %v4591_v60  ;;  %4694 = vmatpush.msra.mxu0 %v10534_v39  ;;  %13074 = vst [vmem:[#allocation12_spill] sm:$0xff] %v10635_v54  ;;  %v4510_v60 = vld [vmem:[#allocation4 + $0xa0] sm:$0xff]  ;;  %v10643_v52 = vsub.f32 %v4525_v13, %v10613_v0  ;;  %v4632_v55 = vsub.f32 %v10606_v6, %v12993_v8  ;;  %v4508_v8 = vld [vmem:[#allocation4 + $0x90] sm:$0xff] }
 0x2f8   : > { %v10608_v5 = vand.u32 4294901760, %v3943_v40  ;;  %4756 = vmatpush.msra.mxu1 %v10583_v63  ;;  %v10611_v21 = vand.u32 4294901760, %v4338_v34  ;;  %v4615_v34 = vand.u32 4294901760, %v4614_v62  ;;  %v10662_v62 = vand.u32 4294901760, %v4510_v60 }
 0x2f9   : > { %4598 = vmatpush.msra.mxu3 %v4597_v23  ;;  %4697 = vmatpush.msra.mxu0 %v10548_v32  ;;  %v10645_v23 = vand.u32 4294901760, %v4524_v56  ;;  %v12999_v49 = vand.u32 4294901760, %v10643_v52  ;;  %v13001_v37 = vand.u32 4294901760, %v10652_v48 }
 0x2fa   : > { %v10622_v29 = vsub.f32 %v3943_v40, %v10608_v5  ;;  %4758 = vmatpush.msra.mxu1 %v10589_v27  ;;  %4340 = vmatmul.f32.vlgmr.msra.gmra.mxu2 %v10611_v21  ;;  %v4621_v40 = vand.u32 4294901760, %v4620_v9  ;;  %v10669_v9 = vsub.f32 %v4511_v50, %v10649_v16  ;;  %v10682_v50 = vsub.f32 %v4510_v60, %v10662_v62 }
 0x2fb   : > { %4383 = vmatmul.f32.gmra.mxu3 %v10608_v5  ;;  %4527 = vmatpush.msra.mxu2 %v10488_v18  ;;  %v10677_v10 = vsub.f32 %v4524_v56, %v10645_v23  ;;  %v4633_v56 = vand.u32 4294901760, %v4632_v55  ;;  %v10695_v60 = vand.u32 4294901760, %v4508_v8 }
 0x2fc   : > { %4604 = vmatpush.msra.mxu3 %v4603_v43  ;;  %4700 = vmatpush.msra.mxu0 %v10566_v17  ;;  %v10640_v31 = vand.u32 4294901760, %v10622_v29  ;;  %v4626_v43 = vsub.f32 %v10600_v30, %v12990_v22  ;;  %v4649_v47 = vand.u32 4294901760, %v10669_v9 }
 0x2fd   : > { %4760 = vmatpush.msra.mxu1 %v10616_v41  ;;  %4529 = vmatpush.msra.mxu2 %v10493_v14  ;;  %v13003_v55 = vand.u32 4294901760, %v10677_v10 }
 0x2fe   : > { %4610 = vmatpush.msra.mxu3 %v4609_v7  ;;  %4703 = vmatpush.msra.mxu0 %v10575_v1  ;;  %v4346_v13 = vsub.f32 %v10622_v29, %v10640_v31  ;;  %v12997_v7 = vand.u32 4294901760, %v10635_v54  ;;  %v4650_v51 = vsub.f32 %v10669_v9, %v4649_v47 }
 0x2ff   : > { %4762 = vmatpush.msra.mxu1 %v10632_v35  ;;  %4472 = vmatmul.f32.vlgmr.msrb.gmra.mxu0 %v10555_v28 }
 0x300   : > { %4503 = vmatmul.f32.gmra.mxu1 %v10608_v5  ;;  %4531 = vmatpush.msra.mxu2 %v10500_v26  ;;  %v10673_v22 = vand.u32 4294901760, %v4346_v13  ;;  %v4627_v13 = vand.u32 4294901760, %v4626_v43  ;;  %v10698_v43 = vsub.f32 %v4509_v58, %v10686_v59  ;;  %v10712_v58 = vsub.f32 %v4508_v8, %v10695_v60 }
 0x301   : > { %4616 = vmatpush.msra.mxu3 %v4615_v34  ;;  %4706 = vmatpush.msra.mxu0 %v10600_v30  ;;  %v4638_v34 = vsub.f32 %v10635_v54, %v12997_v7  ;;  %v4644_v7 = vsub.f32 %v10652_v48, %v13001_v37  ;;  %v4956_v8 = vsub.f32 %v10677_v10, %v13003_v55 }
 0x302   : > { %4764 = vmatpush.msra.mxu1 %v10649_v16  ;;  %4533 = vmatpush.msra.mxu2 %v10509_v15  ;;  %v4661_v37 = vand.u32 4294901760, %v10698_v43 }
 0x303   : > { %4622 = vmatpush.msra.mxu3 %v4621_v40  ;;  %4709 = vmatpush.msra.mxu0 %v10606_v6  ;;  %v4950_v40 = vsub.f32 %v10643_v52, %v12999_v49  ;;  %v4639_v49 = vand.u32 4294901760, %v4638_v34  ;;  %v4645_v53 = vand.u32 4294901760, %v4644_v7  ;;  %v13075_v34 = vand.u32 4294901760, %v10682_v50 }
 0x304   : > { %4766 = vmatpush.msra.mxu1 %v10662_v62  ;;  %4348 = vmatmul.f32.gmra.mxu2 %v10673_v22  ;;  %v4662_v7 = vsub.f32 %v10698_v43, %v4661_v37  ;;  %v4957_v55 = vand.u32 4294901760, %v4956_v8 }
 0x305   : > { %4439 = vmatmul.f32.vlgmr.msrb.gmra.mxu3 %v10580_v57  ;;  %4535 = vmatpush.msra.mxu2 %v10524_v42 }
 0x306   : > { %4628 = vmatpush.msra.mxu3 %v4627_v13  ;;  %4712 = vmatpush.msra.mxu0 %v10635_v54  ;;  %v4951_v13 = vand.u32 4294901760, %v4950_v40  ;;  %v4656_v54 = vsub.f32 %v10682_v50, %v13075_v34  ;;  %v4651_v40 = vand.u32 4294901760, %v4650_v51 }
 0x307   : > { %4768 = vmatpush.msra.mxu1 %v10686_v59  ;;  %4537 = vmatpush.msra.mxu2 %v10531_v33 }
 0x308   : > { %4634 = vmatpush.msra.mxu3 %v4633_v56  ;;  %4715 = vmatpush.msra.mxu0 %v10652_v48  ;;  %v4667_v56 = vand.u32 4294901760, %v10712_v58 }
 0x309   : > { %4770 = vmatpush.msra.mxu1 %v10695_v60  ;;  %4476 = vmatmul.f32.gmra.mxu0 %v10608_v5 }
 0x30a   : > { %4774 = vmatmul.f32.vlgmr.msra.gmra.mxu1 %v10464_v45  ;;  %4539 = vmatpush.msra.mxu2 %v10545_v25  ;;  %v4657_v45 = vand.u32 4294901760, %v4656_v54  ;;  %v4668_v51 = vsub.f32 %v10712_v58, %v4667_v56 }
 0x30b   : > { %4640 = vmatpush.msra.mxu3 %v4639_v49  ;;  %4718 = vmatpush.msra.mxu0 %v10669_v9  ;;  %v4663_v49 = vand.u32 4294901760, %v4662_v7 }
 0x30c   : > { %4541 = vmatpush.msra.mxu2 %v10559_v44  ;;  %4952 = vmatpush.msrb.mxu1 %v4951_v13  ;;  %v8549_v13 = vld [vmem:[%s12980_s5 + $0x68] sm:$0xff] }
 0x30d   : > { %4646 = vmatpush.msra.mxu3 %v4645_v53  ;;  %4721 = vmatpush.msra.mxu0 %v10682_v50  ;;  %v4669_v53 = vand.u32 4294901760, %v4668_v51  ;;  %v10939_v7 = vand.u32 4294901760, %v8549_v13 }
 0x30e   : > { %4409 = vmatmul.f32.vlgmr.msrb.gmra.mxu2 %v10569_v46  ;;  %4445 = vmatmul.f32.gmra.mxu3 %v10640_v31 }
 0x30f   : > { %4543 = vmatpush.msra.mxu2 %v10583_v63  ;;  %4652 = vmatpush.msra.mxu3 %v4651_v40 }
 0x310   : > { %4724 = vmatpush.msra.mxu0 %v10698_v43  ;;  %4958 = vmatpush.msrb.mxu1 %v4957_v55 }
 0x311   : > { %4545 = vmatpush.msra.mxu2 %v10589_v27  ;;  %4658 = vmatpush.msra.mxu3 %v4657_v45  ;;  %v8548_v45 = vld [vmem:[%s12980_s5 + $0x60] sm:$0xff] }
 0x312   : > { %4727 = vmatpush.msra.mxu0 %v10712_v58  ;;  %4780 = vmatmul.f32.gmra.mxu1 %v10483_v12  ;;  %v13078_v12 = vand.u32 4294901760, %v10513_v3 }
 0x313   : > { %4730 = vmatmul.f32.vlgmr.msra.gmra.mxu0 %v10458_v38  ;;  %4547 = vmatpush.msra.mxu2 %v10616_v41  ;;  %v13076_v38 = vand.u32 4294901760, %v10496_v36  ;;  %v13082_v36 = vand.u32 4294901760, %v10566_v17 }
 0x314   : > { %4664 = vmatpush.msra.mxu3 %v4663_v49  ;;  %4913 = vmatpush.msrb.mxu0 %v10613_v0 }
 0x315   : > { %4549 = vmatpush.msra.mxu2 %v10632_v35  ;;  %5014 = vmatpush.msra.mxu1 %v10613_v0 }
 0x316   : > { %4670 = vmatpush.msra.mxu3 %v4669_v53  ;;  %4414 = vmatmul.f32.gmra.mxu2 %v10622_v29 }
 0x317   : > { %4551 = vmatpush.msra.mxu2 %v10649_v16  ;;  %4672 = vmatmul.f32.vlgmr.msra.gmra.mxu3 %v10455_v11 }
 0x318   : > { %4858 = vmatpush.msrb.mxu3 %v10488_v18  ;;  %4915 = vmatpush.msrb.mxu0 %v10645_v23  ;;  %v13079_v18 = vand.u32 4294901760, %v10519_v2  ;;  %v13088_v2 = vand.u32 4294901760, %v10652_v48 }
 0x319   : > { %4553 = vmatpush.msra.mxu2 %v10662_v62  ;;  %5016 = vmatpush.msra.mxu1 %v10645_v23 }
 0x31a   : > { %4860 = vmatpush.msrb.mxu3 %v10493_v14  ;;  %4960 = vmatmul.f32.vlgmr.msrb.gmra.mxu1 %v10555_v28  ;;  %v13081_v14 = vand.u32 4294901760, %v10548_v32 }
 0x31b   : > { %4984 = vmatpush.msra.mxu0 %v10643_v52  ;;  %4555 = vmatpush.msra.mxu2 %v10686_v59 }
 0x31c   : > { %4735 = vmatmul.f32.gmra.mxu0 %v10475_v4  ;;  %4862 = vmatpush.msrb.mxu3 %v10500_v26  ;;  %v13077_v4 = vand.u32 4294901760, %v10503_v20  ;;  %v13083_v26 = vand.u32 4294901760, %v10575_v1  ;;  %v13085_v20 = vand.u32 4294901760, %v10606_v6 }
 0x31d   : > { %4987 = vmatpush.msra.mxu0 %v10677_v10  ;;  %4557 = vmatpush.msra.mxu2 %v10695_v60 }
 0x31e   : > { %4864 = vmatpush.msrb.mxu3 %v10509_v15  ;;  %4563 = vmatmul.f32.vlgmr.msra.gmra.mxu2 %v10472_v24  ;;  %v13080_v24 = vand.u32 4294901760, %v10534_v39  ;;  %v13086_v15 = vld [vmem:[#allocation12_spill] sm:$0xff] }
 0x31f   : > { %4787 = vmatpush.msrb.mxu2 %v13076_v38  ;;  %4676 = vmatmul.f32.gmra.mxu3 %v10470_v19  ;;  %v13087_v3 = vand.u32 4294901760, %v13086_v15  ;;  %v8546_v15 = vld [vmem:[%s12980_s5 + $0x50] sm:$0xff] }
 0x320   : > { %4866 = vmatpush.msrb.mxu3 %v10524_v42  ;;  %v13089_v42 = vmov %v13075_v34 }
 0x321   : > { %4791 = vmatpush.msrb.mxu2 %v13077_v4 }
 0x322   : > { %4868 = vmatpush.msrb.mxu3 %v10531_v33  ;;  %4964 = vmatmul.f32.gmra.mxu1 %v10608_v5  ;;  %v13091_v33 = vand.u32 4294901760, %v10677_v10 }
 0x323   : > { %4795 = vmatpush.msrb.mxu2 %v13078_v12  ;;  %v10954_v12 = vand.u32 4294901760, %v8548_v45 }
 0x324   : > { %4870 = vmatpush.msrb.mxu3 %v10545_v25  ;;  %4921 = vmatmul.f32.vlgmr.msrb.gmra.mxu0 %v10611_v21 }
 0x325   : > { %4799 = vmatpush.msrb.mxu2 %v13079_v18  ;;  %v10957_v18 = vsub.f32 %v8549_v13, %v10939_v7 }
 0x326   : > { %4872 = vmatpush.msrb.mxu3 %v10559_v44  ;;  %4571 = vmatmul.f32.gmra.mxu2 %v10491_v61  ;;  %v13084_v61 = vand.u32 4294901760, %v10600_v30 }
 0x327   : > { %4803 = vmatpush.msrb.mxu2 %v13080_v24  ;;  %v8547_v24 = vld [vmem:[%s12980_s5 + $0x58] sm:$0xff] }
 0x328   : > { %4874 = vmatpush.msrb.mxu3 %v10583_v63 }
 0x329   : > { %4807 = vmatpush.msrb.mxu2 %v13081_v14 }
 0x32a   : > { %4876 = vmatpush.msrb.mxu3 %v10589_v27  ;;  %5020 = vmatmul.f32.vlgmr.msra.gmra.mxu1 %v10580_v57 }
 0x32b   : > { %4811 = vmatpush.msrb.mxu2 %v13082_v36 }
 0x32c   : > { %4878 = vmatpush.msrb.mxu3 %v10616_v41  ;;  %4929 = vmatmul.f32.gmra.mxu0 %v10673_v22 }
 0x32d   : > { %4815 = vmatpush.msrb.mxu2 %v13083_v26  ;;  %v10968_v26 = vsub.f32 %v8548_v45, %v10954_v12 }
 0x32e   : > { %4880 = vmatpush.msrb.mxu3 %v10632_v35  ;;  %v8552_v35 = vld [vmem:[%s12980_s5 + $0x80] sm:$0xff] }
 0x32f   : > { %4819 = vmatpush.msrb.mxu2 %v13084_v61  ;;  %v10970_v61 = vand.u32 4294901760, %v8547_v24 }
 0x330   : > { %4882 = vmatpush.msrb.mxu3 %v10649_v16 }
 0x331   : > { %4823 = vmatpush.msrb.mxu2 %v13085_v20  ;;  %v13008_v20 = vand.u32 4294901760, %v10957_v18 }
 0x332   : > { %4884 = vmatpush.msrb.mxu3 %v10662_v62  ;;  %5026 = vmatmul.f32.gmra.mxu1 %v10640_v31  ;;  %v10892_v31 = vand.u32 4294901760, %v8552_v35  ;;  %v8550_v62 = vld [vmem:[%s12980_s5 + $0x70] sm:$0xff] }
 0x333   : > { %4827 = vmatpush.msrb.mxu2 %v13087_v3  ;;  %v10923_v58 = vand.u32 4294901760, %v8550_v62 }
 0x334   : > { %4886 = vmatpush.msrb.mxu3 %v10686_v59  ;;  %4990 = vmatmul.f32.vlgmr.msra.gmra.mxu0 %v10569_v46  ;;  %v10901_v16 = vsub.f32 %v8552_v35, %v10892_v31 }
 0x335   : > { %4831 = vmatpush.msrb.mxu2 %v13088_v2  ;;  %v10935_v40 = vsub.f32 %v8550_v62, %v10923_v58  ;;  %v13006_v2 = vand.u32 4294901760, %v10968_v26 }
 0x336   : > { %4888 = vmatpush.msrb.mxu3 %v10695_v60  ;;  %v5166_v43 = vand.u32 4294901760, %v10901_v16 }
 0x337   : > { %4890 = vmatmul.f32.vlgmr.msrb.gmra.mxu3 %v10455_v11  ;;  %4835 = vmatpush.msrb.mxu2 %v4649_v47  ;;  %v13090_v47 = vand.u32 4294901760, %v10643_v52  ;;  %v8551_v52 = vld [vmem:[%s12980_s5 + $0x78] sm:$0xff]  ;;  %v5178_v4 = vand.u32 4294901760, %v10935_v40  ;;  %v5191_v62 = vsub.f32 %v10968_v26, %v13006_v2 }
 0x338   : > { %5076 = vmatpush.msra.mxu3 %v10613_v0  ;;  %v8553_v0 = vld [vmem:[%s12980_s5 + $0x88] sm:$0xff]  ;;  %v10904_v48 = vand.u32 4294901760, %v8551_v52  ;;  %v5167_v34 = vsub.f32 %v10901_v16, %v5166_v43 }
 0x339   : > { %4839 = vmatpush.msrb.mxu2 %v13089_v42  ;;  %v10884_v22 = vand.u32 4294901760, %v8553_v0  ;;  %v5179_v36 = vsub.f32 %v10935_v40, %v5178_v4  ;;  %v10980_v42 = vsub.f32 %v8547_v24, %v10970_v61  ;;  %v5192_v45 = vand.u32 4294901760, %v5191_v62 }
 0x33a   : > { %5078 = vmatpush.msra.mxu3 %v10645_v23  ;;  %v10920_v55 = vsub.f32 %v8551_v52, %v10904_v48  ;;  %v5168_v53 = vand.u32 4294901760, %v5167_v34 }
 0x33b   : > { %4843 = vmatpush.msrb.mxu2 %v4661_v37  ;;  %v10890_v54 = vsub.f32 %v8553_v0, %v10884_v22  ;;  %5125 = vmatpush.msrb.mxu0 %v10884_v22  ;;  %v5180_v3 = vand.u32 4294901760, %v5179_v36  ;;  %v8545_v0 = vld [vmem:[%s12980_s5 + $0x48] sm:$0xff] }
 0x33c   : > { %4995 = vmatmul.f32.gmra.mxu0 %v10622_v29  ;;  %5265 = vmatpush.msrb.mxu3 %v10884_v22 }
 0x33d   : > { %4847 = vmatpush.msrb.mxu2 %v4667_v56  ;;  %v5160_v23 = vand.u32 4294901760, %v10890_v54  ;;  %5127 = vmatpush.msrb.mxu0 %v10892_v31  ;;  %v5172_v56 = vand.u32 4294901760, %v10920_v55 }
 0x33e   : > { %4849 = vmatmul.f32.vlgmr.msrb.gmra.mxu2 %v10455_v11  ;;  %5267 = vmatpush.msrb.mxu3 %v10892_v31 }
 0x33f   : > { %4894 = vmatmul.f32.gmra.mxu3 %v10470_v19  ;;  %5047 = vmatpush.msra.mxu2 %v13090_v47  ;;  %v5161_v60 = vsub.f32 %v10890_v54, %v5160_v23  ;;  %v5173_v38 = vsub.f32 %v10920_v55, %v5172_v56  ;;  %v10982_v47 = vand.u32 4294901760, %v8546_v15 }
 0x340   : > { %5269 = vmatpush.msrb.mxu3 %v10904_v48  ;;  %5129 = vmatpush.msrb.mxu0 %v10904_v48 }
 0x341   : > { %5051 = vmatpush.msra.mxu2 %v13091_v33  ;;  %v5162_v8 = vand.u32 4294901760, %v5161_v60  ;;  %v5174_v14 = vand.u32 4294901760, %v5173_v38  ;;  %v5185_v33 = vsub.f32 %v10957_v18, %v13008_v20  ;;  %v13005_v60 = vand.u32 4294901760, %v10980_v42 }
 0x342   : > { %5271 = vmatpush.msrb.mxu3 %v10923_v58  ;;  %5131 = vmatpush.msrb.mxu0 %v10923_v58  ;;  %v11000_v13 = vsub.f32 %v8546_v15, %v10982_v47 }
 0x343   : > { %5226 = vmatpush.msrb.mxu2 %v10890_v54  ;;  %5163 = vmatpush.msrb.mxu1 %v5162_v8  ;;  %v11002_v8 = vand.u32 4294901760, %v8545_v0  ;;  %v5186_v34 = vand.u32 4294901760, %v5185_v33 }
 0x344   : > { %5273 = vmatpush.msrb.mxu3 %v10939_v7  ;;  %5133 = vmatpush.msrb.mxu0 %v10939_v7  ;;  %v13004_v38 = vand.u32 4294901760, %v11000_v13 }
 0x345   : > { %5229 = vmatpush.msrb.mxu2 %v10901_v16  ;;  %5169 = vmatpush.msrb.mxu1 %v5168_v53  ;;  %v5197_v53 = vsub.f32 %v10980_v42, %v13005_v60  ;;  %v11012_v24 = vsub.f32 %v8545_v0, %v11002_v8  ;;  %v5098_v0 = vld [vmem:[%s12980_s5 + $0x40] sm:$0xff] }
 0x346   : > { %4853 = vmatmul.f32.gmra.mxu2 %v10470_v19  ;;  %5275 = vmatpush.msrb.mxu3 %v10954_v12  ;;  %v11028_v62 = vand.u32 4294901760, %v5098_v0 }
 0x347   : > { %5080 = vmatmul.f32.vlgmr.msra.gmra.mxu3 %v10555_v28  ;;  %5232 = vmatpush.msrb.mxu2 %v10920_v55  ;;  %v5198_v15 = vand.u32 4294901760, %v5197_v53  ;;  %v13007_v33 = vand.u32 4294901760, %v11012_v24  ;;  %v5094_v55 = vld [vmem:[%s12980_s5 + $0x20] sm:$0xff] }
 0x348   : > { %5175 = vmatpush.msrb.mxu1 %v5174_v14  ;;  %5135 = vmatpush.msrb.mxu0 %v10954_v12 }
 0x349   : > { %5235 = vmatpush.msrb.mxu2 %v10935_v40  ;;  %5277 = vmatpush.msrb.mxu3 %v10970_v61  ;;  %v5209_v53 = vsub.f32 %v11012_v24, %v13007_v33  ;;  %v5096_v33 = vld [vmem:[%s12980_s5 + $0x30] sm:$0xff] }
 0x34a   : > { %5181 = vmatpush.msrb.mxu1 %v5180_v3  ;;  %5137 = vmatpush.msrb.mxu0 %v10970_v61  ;;  %v5203_v3 = vsub.f32 %v11000_v13, %v13004_v38  ;;  %v5097_v38 = vld [vmem:[%s12980_s5 + $0x38] sm:$0xff] }
 0x34b   : > { %5238 = vmatpush.msrb.mxu2 %v10957_v18  ;;  %5279 = vmatpush.msrb.mxu3 %v10982_v47  ;;  %v11042_v60 = vand.u32 4294901760, %v5097_v38  ;;  %v5210_v2 = vand.u32 4294901760, %v5209_v53 }
 0x34c   : > { %5139 = vmatpush.msrb.mxu0 %v10982_v47  ;;  %5187 = vmatpush.msrb.mxu1 %v5186_v34  ;;  %v5204_v34 = vand.u32 4294901760, %v5203_v3 }
 0x34d   : > { %5241 = vmatpush.msrb.mxu2 %v10968_v26  ;;  %5281 = vmatpush.msrb.mxu3 %v11002_v8 }
 0x34e   : > { %5053 = vmatmul.f32.vlgmr.msra.gmra.mxu2 %v10555_v28  ;;  %5141 = vmatpush.msrb.mxu0 %v11002_v8 }
 0x34f   : > { %5084 = vmatmul.f32.gmra.mxu3 %v10608_v5  ;;  %5244 = vmatpush.msrb.mxu2 %v10980_v42 }
 0x350   : > { %5193 = vmatpush.msrb.mxu1 %v5192_v45  ;;  %5299 = vmatpush.msra.mxu0 %v5160_v23  ;;  %v11040_v45 = vsub.f32 %v5098_v0, %v11028_v62  ;;  %v11053_v23 = vand.u32 4294901760, %v5096_v33 }
 0x351   : > { %5247 = vmatpush.msrb.mxu2 %v11000_v13 }
 0x352   : > { %v10839_v11 = vpop.f32.mrf.mxu1  ;;  %5199 = vmatpush.msrb.mxu1 %v5198_v15  ;;  %5303 = vmatpush.msra.mxu0 %v5166_v43  ;;  %v5412_v54 = vand.u32 4294901760, %v11040_v45  ;;  %v11056_v15 = vsub.f32 %v5097_v38, %v11042_v60 }
 0x353   : > { %5250 = vmatpush.msrb.mxu2 %v11012_v24 }
 0x354   : > { %5205 = vmatpush.msrb.mxu1 %v5204_v34  ;;  %5307 = vmatpush.msra.mxu0 %v5172_v56  ;;  %v5413_v16 = vsub.f32 %v11040_v45, %v5412_v54  ;;  %v13009_v43 = vand.u32 4294901760, %v11056_v15  ;;  %v11073_v34 = vsub.f32 %v5096_v33, %v11053_v23 }
 0x355   : > { %5377 = vmatpush.msra.mxu2 %v11028_v62 }
 0x356   : > { %5057 = vmatmul.f32.gmra.mxu2 %v10608_v5  ;;  %5211 = vmatpush.msrb.mxu1 %v5210_v2  ;;  %v5414_v56 = vand.u32 4294901760, %v5413_v16  ;;  %v5419_v2 = vsub.f32 %v11056_v15, %v13009_v43  ;;  %v5424_v33 = vand.u32 4294901760, %v11073_v34 }
 0x357   : > { %5379 = vmatpush.msra.mxu2 %v11042_v60  ;;  %5311 = vmatpush.msra.mxu0 %v5178_v4  ;;  %v5093_v4 = vld [vmem:[%s12980_s5 + $0x18] sm:$0xff] }
 0x358   : > { %5345 = vmatpush.msra.mxu1 %v10884_v22  ;;  %5415 = vmatpush.msra.mxu3 %v5414_v56  ;;  %v5420_v16 = vand.u32 4294901760, %v5419_v2  ;;  %v5092_v56 = vld [vmem:[%s12980_s5 + $0x10] sm:$0xff] }
 0x359   : > { %5381 = vmatpush.msra.mxu2 %v11053_v23 }
 0x35a   : > { %v10837_v39 = vpop.f32.mrf.mxu0  ;;  %v10845_v32 = vpop.f32.mrf.mxu1  ;;  %5347 = vmatpush.msra.mxu1 %v10892_v31  ;;  %5421 = vmatpush.msra.mxu3 %v5420_v16 }
 0x35b   : > { %v10847_v44 = vpop.f32.mrf.mxu2  ;;  %v4093_v3 = vadd.f32 %v10839_v11, %v10837_v39  ;;  %v5095_v11 = vld [vmem:[%s12980_s5 + $0x28] sm:$0xff] }
 0x35c   : > { %v10843_v25 = vpop.f32.mrf.mxu3  ;;  %v11070_v38 = vand.u32 4294901760, %v5095_v11  ;;  %5349 = vmatpush.msra.mxu1 %v10904_v48  ;;  %v13093_v48 = vand.u32 4294901760, %v10968_v26  ;;  %v5091_v26 = vld [vmem:[%s12980_s5 + $0x8] sm:$0xff] }
 0x35d   : > { %v4151_v53 = vadd.f32 %v10847_v44, %v4093_v3  ;;  %v13092_v3 = vand.u32 4294901760, %v10957_v18 }
 0x35e   : > { %5383 = vmatpush.msra.mxu2 %v11070_v38  ;;  %v11095_v40 = vsub.f32 %v5095_v11, %v11070_v38  ;;  %5351 = vmatpush.msra.mxu1 %v10923_v58  ;;  %v13094_v58 = vand.u32 4294901760, %v10980_v42 }
 0x35f   : > { %5315 = vmatpush.msra.mxu0 %v13092_v3  ;;  %v4195_v31 = vadd.f32 %v10843_v25, %v4151_v53  ;;  %v11118_v3 = vand.u32 4294901760, %v5092_v56 }
 0x360   : > { %v13012_v43 = vand.u32 4294901760, %v11095_v40  ;;  %5353 = vmatpush.msra.mxu1 %v10939_v7 }
 0x361   : > { %5319 = vmatpush.msra.mxu0 %v13093_v48 }
 0x362   : > { %v10841_v59 = vpop.f32.mrf.mxu0  ;;  %v10853_v28 = vpop.f32.mrf.mxu1  ;;  %5355 = vmatpush.msra.mxu1 %v10954_v12 }
 0x363   : > { %v10855_v17 = vpop.f32.mrf.mxu2  ;;  %v4097_v44 = vadd.f32 %v10845_v32, %v10841_v59  ;;  %v5425_v59 = vsub.f32 %v11073_v34, %v5424_v33  ;;  %v11105_v32 = vand.u32 4294901760, %v5093_v4  ;;  %5323 = vmatpush.msra.mxu0 %v13094_v58 }
 0x364   : > { %v10851_v37 = vpop.f32.mrf.mxu3  ;;  %5357 = vmatpush.msra.mxu1 %v10970_v61 }
 0x365   : > { %v5426_v2 = vand.u32 4294901760, %v5425_v59  ;;  %v11121_v25 = vsub.f32 %v5093_v4, %v11105_v32 }
 0x366   : > { %5359 = vmatpush.msra.mxu1 %v10982_v47 }
 0x367   : > { %5427 = vmatpush.msra.mxu3 %v5426_v2 }
 0x368   : > { %5361 = vmatpush.msra.mxu1 %v11002_v8 }
 0x36a   : > { %v10849_v19 = vpop.f32.mrf.mxu0  ;;  %v10861_v1 = vpop.f32.mrf.mxu1 }
 0x373   : > { %v10857_v46 = vpop.f32.mrf.mxu0  ;;  %v10869_v30 = vpop.f32.mrf.mxu1 }
 0x375   : > { %v10859_v10 = vpop.f32.mrf.mxu3 }
 0x37c   : > { %v10865_v63 = vpop.f32.mrf.mxu0 }
 0x37d   : > { %v10863_v57 = vpop.f32.mrf.mxu2  ;;  %v10880_v41 = vpop.f32.mrf.mxu1 }
 0x37e   : > { %v10867_v27 = vpop.f32.mrf.mxu3 }
 0x386   : > { %v10873_v5 = vpop.f32.mrf.mxu0 }
 0x387   : > { %v10871_v6 = vpop.f32.mrf.mxu2  ;;  %v10945_v51 = vpop.f32.mrf.mxu1 }
 0x388   : > { %v10875_v21 = vpop.f32.mrf.mxu3 }
 0x38f   : > { %v11016_v14 = vpop.f32.mrf.mxu1 }
 0x390   : > { %v10911_v9 = vpop.f32.mrf.mxu0 }
 0x391   : > { %v10882_v29 = vpop.f32.mrf.mxu2  ;;  %v10913_v50 = vpop.f32.mrf.mxu3 }
 0x397   : > { %v11089_v22 = vpop.f32.mrf.mxu1 }
 0x399   : > { %v10947_v49 = vpop.f32.mrf.mxu2  ;;  %v10993_v35 = vpop.f32.mrf.mxu0 }
 0x39a   : > { %v4673_v52 = vpop.f32.mrf.mxu3 }
 0x39f   : > { %v4965_v12 = vpop.f32.mrf.mxu1 }
 0x3a1   : > { %v4564_v36 = vpop.f32.mrf.mxu2  ;;  %v11058_v0 = vpop.f32.mrf.mxu0 }
 0x3a2   : > { %v4677_v39 = vpop.f32.mrf.mxu3  ;;  %v4674_v20 = vadd.f32 %v4673_v52, %v4564_v36  ;;  %v11092_v36 = vand.u32 4294901760, %v5094_v55 }
 0x3a4   : > { %v4732_v11 = vadd.f32 %v10911_v9, %v4674_v20  ;;  %5385 = vmatpush.msra.mxu2 %v11092_v36  ;;  %v11113_v18 = vsub.f32 %v5094_v55, %v11092_v36  ;;  %v4156_v9 = vadd.f32 %v10855_v17, %v4097_v44  ;;  %v4270_v20 = vadd.f32 %v10849_v19, %v4195_v31 }
 0x3a5   : > { %v5431_v55 = vsub.f32 %v11095_v40, %v13012_v43  ;;  %v13011_v17 = vand.u32 4294901760, %v11121_v25  ;;  %v11137_v44 = vand.u32 4294901760, %v5091_v26  ;;  %v11140_v19 = vsub.f32 %v5092_v56, %v11118_v3  ;;  %v5090_v56 = vld [vmem:[%s12980_s5] sm:$0xff] }
 0x3a6   : > { %5387 = vmatpush.msra.mxu2 %v11105_v32  ;;  %v13010_v16 = vand.u32 4294901760, %v11113_v18  ;;  %v4776_v31 = vadd.f32 %v10945_v51, %v4732_v11  ;;  %v11157_v51 = vand.u32 4294901760, %v5090_v56  ;;  %v4201_v11 = vadd.f32 %v10851_v37, %v4156_v9 }
 0x3a7   : > { %v5432_v48 = vand.u32 4294901760, %v5431_v55  ;;  %v5443_v42 = vsub.f32 %v11121_v25, %v13011_v17  ;;  %v11160_v7 = vsub.f32 %v5091_v26, %v11137_v44  ;;  %v4311_v55 = vadd.f32 %v10853_v28, %v4270_v20 }
 0x3a8   : > { %v5437_v2 = vsub.f32 %v11113_v18, %v13010_v16  ;;  %5389 = vmatpush.msra.mxu2 %v11118_v3  ;;  %v4274_v37 = vadd.f32 %v10857_v46, %v4201_v11  ;;  %v11178_v9 = vsub.f32 %v5090_v56, %v11157_v51 }
 0x3a9   : > { %v4572_v52 = vpop.f32.mrf.mxu2  ;;  %v4930_v4 = vpop.f32.mrf.mxu0  ;;  %5433 = vmatpush.msra.mxu3 %v5432_v48  ;;  %v5444_v43 = vand.u32 4294901760, %v5443_v42  ;;  %v4342_v28 = vadd.f32 %v10863_v57, %v4311_v55 }
 0x3aa   : > { %v4678_v59 = vadd.f32 %v4677_v39, %v4572_v52  ;;  %v5448_v39 = vand.u32 4294901760, %v11140_v19  ;;  %v13095_v52 = vand.u32 4294901760, %v11000_v13  ;;  %v5438_v16 = vand.u32 4294901760, %v5437_v2  ;;  %5391 = vmatpush.msra.mxu2 %v11137_v44 }
 0x3ab   : > { %v5454_v13 = vand.u32 4294901760, %v11160_v7  ;;  %v5460_v46 = vand.u32 4294901760, %v11178_v9 }
 0x3ac   : > { %5327 = vmatpush.msra.mxu0 %v13095_v52  ;;  %v5449_v26 = vsub.f32 %v11140_v19, %v5448_v39  ;;  %v13096_v52 = vand.u32 4294901760, %v11012_v24  ;;  %5439 = vmatpush.msra.mxu3 %v5438_v16  ;;  %v4737_v20 = vadd.f32 %v10993_v35, %v4678_v59 }
 0x3ad   : > { %5393 = vmatpush.msra.mxu2 %v11157_v51  ;;  %v5455_v24 = vsub.f32 %v11160_v7, %v5454_v13  ;;  %v5461_v35 = vsub.f32 %v11178_v9, %v5460_v46 }
 0x3ae   : > { %5331 = vmatpush.msra.mxu0 %v13096_v52  ;;  %v5450_v48 = vand.u32 4294901760, %v5449_v26  ;;  %5445 = vmatpush.msra.mxu3 %v5444_v43  ;;  %v4782_v47 = vadd.f32 %v11016_v14, %v4737_v20 }
 0x3af   : > { %v5456_v61 = vand.u32 4294901760, %v5455_v24 }
 0x3b0   : > { %5451 = vmatpush.msra.mxu3 %v5450_v48 }
 0x3b1   : > { %v4991_v59 = vpop.f32.mrf.mxu0 }
 0x3b2   : > { %5457 = vmatpush.msra.mxu3 %v5456_v61 }
 0x3ba   : > { %v4891_v53 = vpop.f32.mrf.mxu3 }
 0x3c1   : > { %v4850_v58 = vpop.f32.mrf.mxu2 }
 0x3c2   : > { %v4851_v17 = vadd.f32 %v4850_v58, %v4776_v31  ;;  %v4895_v16 = vpop.f32.mrf.mxu3  ;;  %v5021_v58 = vpop.f32.mrf.mxu1 }
 0x3c4   : > { %v4892_v31 = vadd.f32 %v4891_v53, %v4851_v17  ;;  %v4315_v53 = vadd.f32 %v10861_v1, %v4274_v37  ;;  %v4381_v17 = vadd.f32 %v10859_v10, %v4342_v28 }
 0x3c6   : > { %v4923_v57 = vadd.f32 %v11058_v0, %v4892_v31  ;;  %v5462_v0 = vand.u32 4294901760, %v5461_v35  ;;  %v4350_v56 = vadd.f32 %v10871_v6, %v4315_v53  ;;  %v4411_v8 = vadd.f32 %v10882_v29, %v4381_v17  ;;  %v4996_v29 = vpop.f32.mrf.mxu0 }
 0x3c8   : > { %v4962_v43 = vadd.f32 %v11089_v22, %v4923_v57  ;;  %5463 = vmatpush.msra.mxu3 %v5462_v0  ;;  %v4441_v1 = vadd.f32 %v10875_v21, %v4411_v8  ;;  %v4385_v10 = vadd.f32 %v10867_v27, %v4350_v56  ;;  %v8562_v56 = vld [vmem:[%s12980_s5 + $0xd0] sm:$0xff] }
 0x3c9   : > { %v4854_v2 = vpop.f32.mrf.mxu2 }
 0x3ca   : > { %v4855_v42 = vadd.f32 %v4854_v2, %v4782_v47  ;;  %v4992_v55 = vadd.f32 %v4991_v59, %v4962_v43  ;;  %v4416_v22 = vadd.f32 %v10947_v49, %v4385_v10  ;;  %v5081_v37 = vpop.f32.mrf.mxu3  ;;  %v4474_v6 = vadd.f32 %v10865_v63, %v4441_v1  ;;  %v5027_v21 = vpop.f32.mrf.mxu1  ;;  %v8560_v10 = vld [vmem:[%s12980_s5 + $0xc0] sm:$0xff] }
 0x3cb   : > { %v11236_v1 = vand.u32 4294901760, %v8562_v56 }
 0x3cc   : > { %v4896_v11 = vadd.f32 %v4895_v16, %v4855_v42  ;;  %v5022_v26 = vadd.f32 %v5021_v58, %v4992_v55  ;;  %v4447_v31 = vadd.f32 %v10913_v50, %v4416_v22  ;;  %v4501_v57 = vadd.f32 %v10869_v30, %v4474_v6 }
 0x3cd   : > { %v11260_v6 = vsub.f32 %v8562_v56, %v11236_v1 }
 0x3ce   : > { %v4931_v14 = vadd.f32 %v4930_v4, %v4896_v11  ;;  %v4478_v27 = vadd.f32 %v10873_v5, %v4447_v31  ;;  %v8561_v11 = vld [vmem:[%s12980_s5 + $0xc8] sm:$0xff] }
 0x3d0   : > { %v4966_v52 = vadd.f32 %v4965_v12, %v4931_v14  ;;  %v4505_v35 = vadd.f32 %v10880_v41, %v4478_v27 }
 0x3d1   : > { %v5054_v28 = vpop.f32.mrf.mxu2 }
 0x3d2   : > { %v5055_v20 = vadd.f32 %v5054_v28, %v5022_v26  ;;  %v4997_v24 = vadd.f32 %v4996_v29, %v4966_v52  ;;  %v5085_v16 = vpop.f32.mrf.mxu3  ;;  %v11247_v26 = vand.u32 4294901760, %v8561_v11  ;;  %v13097_v52 = vand.u32 4294901760, %v11056_v15  ;;  %v8558_v29 = vld [vmem:[%s12980_s5 + $0xb0] sm:$0xff] }
 0x3d4   : > { %v5082_v48 = vadd.f32 %v5081_v37, %v5055_v20  ;;  %v5028_v49 = vadd.f32 %v5027_v21, %v4997_v24  ;;  %v8559_v37 = vld [vmem:[%s12980_s5 + $0xb8] sm:$0xff]  ;;  %v11262_v20 = vand.u32 4294901760, %v8560_v10  ;;  %v5677_v24 = vand.u32 4294901760, %v11260_v6  ;;  %v8557_v21 = vld [vmem:[%s12980_s5 + $0xa8] sm:$0xff] }
 0x3d5   : > { %v11274_v31 = vand.u32 4294901760, %v8559_v37 }
 0x3d6   : > { %v11205_v4 = vmax.f32 %v4501_v57, %v5082_v48  ;;  %v11285_v57 = vand.u32 4294901760, %v8558_v29 }
 0x3d7   : > { %v11295_v27 = vsub.f32 %v8559_v37, %v11274_v31 }
 0x3d8   : > { %v5367_v63 = vsel %vm5114_vm7, %v11205_v4, 0  ;;  %v5111_v30 = vrot.slane %v11205_v4, 1  ;;  %v6161_v41 = vrot.slane %v11205_v4, 4 }
 0x3d9   : > { %v5058_v12 = vpop.f32.mrf.mxu2  ;;  %v11212_v17 = vand.u32 4294901760, %v5367_v63 }
 0x3da   : > { %v5059_v61 = vadd.f32 %v5058_v12, %v5028_v49  ;;  %v8556_v49 = vld [vmem:[%s12980_s5 + $0xa0] sm:$0xff]  ;;  %v13099_v12 = vand.u32 4294901760, %v11113_v18 }
 0x3db   : > { %v11220_v2 = vsub.f32 %v5367_v63, %v11212_v17  ;;  %v8555_v63 = vld [vmem:[%s12980_s5 + $0x98] sm:$0xff] }
 0x3dc   : > { %v5086_v50 = vadd.f32 %v5085_v16, %v5059_v61  ;;  %v11312_v16 = vsub.f32 %v8558_v29, %v11285_v57 }
 0x3dd   : > { %v5396_v42 = vand.u32 4294901760, %v11220_v2 }
 0x3de   : > { %v11210_v53 = vmax.f32 %v4505_v35, %v5086_v50  ;;  %v11320_v35 = vand.u32 4294901760, %v8556_v49  ;;  %v5695_v50 = vand.u32 4294901760, %v11295_v27 }
 0x3e0   : > { %v5112_v5 = vrot.slane %v11210_v53, 1  ;;  %v6162_v43 = vrot.slane %v11210_v53, 4  ;;  %v5630_v56 = vrot.slane %v11210_v53, 2 }
 0x3e2   : > { %v5113_v47 = vsel %vm460_vm1, %v5111_v30, %v5112_v5  ;;  %v6163_v55 = vsel %vm475_vm0, %v6161_v41, %v6162_v43  ;;  %v8554_v30 = vld [vmem:[%s12980_s5 + $0x90] sm:$0xff]  ;;  %v5701_v43 = vand.u32 4294901760, %v11312_v16 }
 0x3e3   : > { %v5115_v59 = vsel %vm5114_vm7, %v5113_v47, 0  ;;  %v11245_v14 = vsel %vm5114_vm7, %v6163_v55, 0 }
 0x3e4   : > { %v11222_v0 = vand.u32 4294901760, %v5115_v59 }
 0x3e6   : > { %5213 = vmatmul.f32.vlgmr.msrb.gmra.mxu1 %v11222_v0  ;;  %v5143_v8 = vsub.f32 %v5115_v59, %v11222_v0  ;;  %v11350_v59 = vand.u32 4294901760, %v8554_v30 }
 0x3e7   : > { %5517 = vmatpush.msrb.mxu1 %v11028_v62 }
 0x3e8   : > { %5253 = vmatmul.f32.vlgmr.msrb.gmra.mxu2 %v5143_v8  ;;  %v5144_v58 = vand.u32 4294901760, %v5143_v8 }
 0x3e9   : > { %5519 = vmatpush.msrb.mxu1 %v11042_v60  ;;  %5551 = vmatpush.msrb.mxu2 %v5412_v54  ;;  %v5397_v54 = vsub.f32 %v11220_v2, %v5396_v42 }
 0x3ea   : > { %5285 = vmatmul.f32.vlgmr.msrb.gmra.mxu3 %v5144_v58  ;;  %v5145_v22 = vsub.f32 %v5143_v8, %v5144_v58  ;;  %v11375_v8 = vsub.f32 %v8554_v30, %v11350_v59 }
 0x3eb   : > { %5521 = vmatpush.msrb.mxu1 %v11053_v23  ;;  %5555 = vmatpush.msrb.mxu2 %v13097_v52  ;;  %v5398_v48 = vand.u32 4294901760, %v5397_v54 }
 0x3ec   : > { %5597 = vmatpush.msrb.mxu3 %v11028_v62  ;;  %v5146_v28 = vand.u32 4294901760, %v5145_v22  ;;  %v11272_v62 = vsub.f32 %v8561_v11, %v11247_v26  ;;  %v5629_v11 = vrot.slane %v11205_v4, 2 }
 0x3ed   : > { %5523 = vmatpush.msrb.mxu1 %v11070_v38  ;;  %5559 = vmatpush.msrb.mxu2 %v5424_v33  ;;  %v13098_v33 = vand.u32 4294901760, %v11095_v40 }
 0x3ee   : > { %5599 = vmatpush.msrb.mxu3 %v11042_v60  ;;  %5147 = vmatmul.f32.vlgmr.msrb.gmra.mxu0 %v5146_v28  ;;  %v11283_v60 = vsub.f32 %v8560_v10, %v11262_v20  ;;  %v8570_v10 = vld [vmem:[%s12980_s5 + $0x110] sm:$0xff]  ;;  %v5631_v22 = vsel %vm1491_vm3, %v5629_v11, %v5630_v56  ;;  %v8569_v28 = vld [vmem:[%s12980_s5 + $0x108] sm:$0xff] }
 0x3ef   : > { %5363 = vmatmul.f32.vlgmr.msra.gmra.mxu1 %v11222_v0  ;;  %5478 = vmatpush.msrb.mxu0 %v11040_v45  ;;  %v5683_v45 = vand.u32 4294901760, %v11272_v62  ;;  %v11407_v37 = vand.u32 4294901760, %v8570_v10 }
 0x3f0   : > { %5525 = vmatpush.msrb.mxu1 %v11092_v36  ;;  %5563 = vmatpush.msrb.mxu2 %v13098_v33  ;;  %v5689_v61 = vand.u32 4294901760, %v11283_v60 }
 0x3f1   : > { %5601 = vmatpush.msrb.mxu3 %v11053_v23  ;;  %5399 = vmatmul.f32.vlgmr.msra.gmra.mxu2 %v5398_v48  ;;  %v11303_v23 = vand.u32 4294901760, %v8557_v21 }
 0x3f2   : > { %5481 = vmatpush.msrb.mxu0 %v11056_v15  ;;  %5527 = vmatpush.msrb.mxu1 %v11105_v32  ;;  %v5678_v15 = vsub.f32 %v11260_v6, %v5677_v24  ;;  %v5690_v47 = vsub.f32 %v11283_v60, %v5689_v61 }
 0x3f3   : > { %5567 = vmatpush.msrb.mxu2 %v13099_v12  ;;  %5603 = vmatpush.msrb.mxu3 %v11070_v38  ;;  %v13100_v38 = vand.u32 4294901760, %v11121_v25  ;;  %v11335_v5 = vsub.f32 %v8557_v21, %v11303_v23  ;;  %v8568_v21 = vld [vmem:[%s12980_s5 + $0x100] sm:$0xff]  ;;  %v11433_v12 = vsub.f32 %v8570_v10, %v11407_v37 }
 0x3f4   : > { %5465 = vmatmul.f32.vlgmr.msra.gmra.mxu3 %v11212_v17  ;;  %5484 = vmatpush.msrb.mxu0 %v11073_v34  ;;  %v5684_v34 = vsub.f32 %v11272_v62, %v5683_v45  ;;  %v8564_v10 = vld [vmem:[%s12980_s5 + $0xe0] sm:$0xff] }
 0x3f5   : > { %5529 = vmatpush.msrb.mxu1 %v11118_v3  ;;  %5571 = vmatpush.msrb.mxu2 %v13100_v38  ;;  %v5896_v38 = vrot.slane %v11210_v53, 3  ;;  %v5895_v53 = vrot.slane %v11205_v4, 3 }
 0x3f6   : > { %5605 = vmatpush.msrb.mxu3 %v11092_v36  ;;  %5487 = vmatpush.msrb.mxu0 %v11095_v40  ;;  %v11337_v36 = vand.u32 4294901760, %v8555_v63  ;;  %v5679_v40 = vand.u32 4294901760, %v5678_v15  ;;  %v8567_v15 = vld [vmem:[%s12980_s5 + $0xf8] sm:$0xff] }
 0x3f7   : > { %5531 = vmatpush.msrb.mxu1 %v11137_v44  ;;  %5575 = vmatpush.msrb.mxu2 %v5448_v39  ;;  %v11348_v39 = vsub.f32 %v8556_v49, %v11320_v35  ;;  %v5897_v4 = vsel %vm2020_vm4, %v5895_v53, %v5896_v38 }
 0x3f8   : > { %5607 = vmatpush.msrb.mxu3 %v11105_v32  ;;  %5333 = vmatmul.f32.vlgmr.msra.gmra.mxu0 %v11222_v0  ;;  %v5685_v32 = vand.u32 4294901760, %v5684_v34  ;;  %v5696_v0 = vsub.f32 %v11295_v27, %v5695_v50  ;;  %v11363_v41 = vsub.f32 %v8555_v63, %v11337_v36  ;;  %v11440_v63 = vand.u32 4294901760, %v8568_v21 }
 0x3f9   : > { %5490 = vmatpush.msrb.mxu0 %v11113_v18  ;;  %5533 = vmatpush.msrb.mxu1 %v11157_v51  ;;  %v5707_v18 = vand.u32 4294901760, %v11335_v5 }
 0x3fa   : > { %5579 = vmatpush.msrb.mxu2 %v5454_v13  ;;  %5609 = vmatpush.msrb.mxu3 %v11118_v3  ;;  %v5691_v3 = vand.u32 4294901760, %v5690_v47  ;;  %v5702_v13 = vsub.f32 %v11312_v16, %v5701_v43  ;;  %v5719_v55 = vand.u32 4294901760, %v11363_v41  ;;  %v11465_v56 = vsub.f32 %v8568_v21, %v11440_v63 }
 0x3fb   : > { %5537 = vmatmul.f32.vlgmr.msrb.gmra.mxu1 %v5396_v42  ;;  %5493 = vmatpush.msrb.mxu0 %v11121_v25  ;;  %v5713_v25 = vand.u32 4294901760, %v11348_v39  ;;  %v8571_v42 = vld [vmem:[%s12980_s5 + $0x118] sm:$0xff] }
 0x3fc   : > { %5680 = vmatpush.msra.mxu1 %v5679_v40  ;;  %5583 = vmatpush.msrb.mxu2 %v5460_v46  ;;  %v5697_v46 = vand.u32 4294901760, %v5696_v0  ;;  %v5703_v58 = vand.u32 4294901760, %v5702_v13  ;;  %v11399_v52 = vand.u32 4294901760, %v8571_v42  ;;  %v5720_v54 = vsub.f32 %v11363_v41, %v5719_v55  ;;  %v8566_v40 = vld [vmem:[%s12980_s5 + $0xf0] sm:$0xff]  ;;  %v8565_v13 = vld [vmem:[%s12980_s5 + $0xe8] sm:$0xff] }
 0x3fd   : > { %5611 = vmatpush.msrb.mxu3 %v11137_v44  ;;  %5585 = vmatmul.f32.vlgmr.msrb.gmra.mxu2 %v11212_v17  ;;  %v5708_v44 = vsub.f32 %v11335_v5, %v5707_v18 }
 0x3fe   : > { %5686 = vmatpush.msra.mxu1 %v5685_v32  ;;  %5743 = vmatpush.msra.mxu2 %v11260_v6  ;;  %v11420_v33 = vsub.f32 %v8571_v42, %v11399_v52  ;;  %v11453_v32 = vand.u32 4294901760, %v8567_v15 }
 0x3ff   : > { %5496 = vmatpush.msrb.mxu0 %v11140_v19  ;;  %5613 = vmatpush.msrb.mxu3 %v11157_v51  ;;  %v5714_v19 = vsub.f32 %v11348_v39, %v5713_v25  ;;  %v5725_v51 = vand.u32 4294901760, %v11375_v8 }
 0x400   : > { %5615 = vmatmul.f32.vlgmr.msrb.gmra.mxu3 %v11212_v17  ;;  %5692 = vmatpush.msra.mxu1 %v5691_v3  ;;  %v5709_v17 = vand.u32 4294901760, %v5708_v44  ;;  %v5943_v30 = vand.u32 4294901760, %v11420_v33  ;;  %v5949_v3 = vand.u32 4294901760, %v11433_v12  ;;  %v11478_v44 = vsub.f32 %v8567_v15, %v11453_v32 }
 0x401   : > { %5746 = vmatpush.msra.mxu2 %v11272_v62  ;;  %5782 = vmatpush.msra.mxu3 %v11236_v1  ;;  %v5715_v29 = vand.u32 4294901760, %v5714_v19  ;;  %v5726_v48 = vsub.f32 %v11375_v8, %v5725_v51 }
 0x402   : > { %5499 = vmatpush.msrb.mxu0 %v11160_v7  ;;  %5698 = vmatpush.msra.mxu1 %v5697_v46  ;;  %v5632_v7 = vsel %vm5114_vm7, %v5631_v22, 0  ;;  %v11467_v46 = vand.u32 4294901760, %v8566_v40  ;;  %v5944_v42 = vsub.f32 %v11420_v33, %v5943_v30  ;;  %v5950_v22 = vsub.f32 %v11433_v12, %v5949_v3 }
 0x403   : > { %5749 = vmatpush.msra.mxu2 %v11283_v60  ;;  %5784 = vmatpush.msra.mxu3 %v11247_v26  ;;  %v11430_v49 = vand.u32 4294901760, %v5632_v7  ;;  %v5727_v34 = vand.u32 4294901760, %v5726_v48  ;;  %v11501_v48 = vand.u32 4294901760, %v8564_v10  ;;  %v5967_v21 = vand.u32 4294901760, %v11478_v44 }
 0x404   : > { %5502 = vmatpush.msrb.mxu0 %v11178_v9  ;;  %5704 = vmatpush.msra.mxu1 %v5703_v58  ;;  %v11427_v9 = vand.u32 4294901760, %v8569_v28  ;;  %v11480_v58 = vand.u32 4294901760, %v8565_v13  ;;  %v5951_v15 = vand.u32 4294901760, %v5950_v22 }
 0x405   : > { %5505 = vmatmul.f32.vlgmr.msrb.gmra.mxu0 %v11220_v2  ;;  %5752 = vmatpush.msra.mxu2 %v11295_v27  ;;  %v5721_v2 = vand.u32 4294901760, %v5720_v54  ;;  %v5660_v0 = vsub.f32 %v5632_v7, %v11430_v49  ;;  %v11494_v54 = vsub.f32 %v8566_v40, %v11467_v46  ;;  %v5898_v7 = vsel %vm5114_vm7, %v5897_v4, 0 }
 0x406   : > { %5642 = vmatpush.msra.mxu0 %v11236_v1  ;;  %5786 = vmatpush.msra.mxu3 %v11262_v20  ;;  %v11451_v47 = vsub.f32 %v8569_v28, %v11427_v9  ;;  %v8563_v28 = vld [vmem:[%s12980_s5 + $0xd8] sm:$0xff] }
 0x407   : > { %5710 = vmatpush.msra.mxu1 %v5709_v17  ;;  %5755 = vmatpush.msra.mxu2 %v11312_v16  ;;  %v5661_v19 = vand.u32 4294901760, %v5660_v0  ;;  %v5961_v17 = vand.u32 4294901760, %v11465_v56  ;;  %v5973_v53 = vand.u32 4294901760, %v11494_v54  ;;  %v8578_v16 = vld [vmem:[%s12980_s5 + $0x150] sm:$0xff] }
 0x408   : > { %5644 = vmatpush.msra.mxu0 %v11247_v26  ;;  %5788 = vmatpush.msra.mxu3 %v11274_v31  ;;  %v5955_v11 = vand.u32 4294901760, %v11451_v47 }
 0x409   : > { %5716 = vmatpush.msra.mxu1 %v5715_v29  ;;  %5758 = vmatpush.msra.mxu2 %v11335_v5  ;;  %v5945_v29 = vand.u32 4294901760, %v5944_v42  ;;  %v5662_v38 = vsub.f32 %v5660_v0, %v5661_v19  ;;  %v5962_v40 = vsub.f32 %v11465_v56, %v5961_v17  ;;  %v5974_v22 = vsub.f32 %v11494_v54, %v5973_v53  ;;  %v8577_v5 = vld [vmem:[%s12980_s5 + $0x148] sm:$0xff] }
 0x40a   : > { %5646 = vmatpush.msra.mxu0 %v11262_v20  ;;  %5790 = vmatpush.msra.mxu3 %v11285_v57 }
 0x40b   : > { %5722 = vmatpush.msra.mxu1 %v5721_v2  ;;  %5761 = vmatpush.msra.mxu2 %v11348_v39  ;;  %v11510_v2 = vsub.f32 %v8565_v13, %v11480_v58  ;;  %v11525_v13 = vsub.f32 %v8564_v10, %v11501_v48  ;;  %v5663_v42 = vand.u32 4294901760, %v5662_v38  ;;  %v5975_v6 = vand.u32 4294901760, %v5974_v22  ;;  %v8576_v39 = vld [vmem:[%s12980_s5 + $0x140] sm:$0xff] }
 0x40c   : > { %5648 = vmatpush.msra.mxu0 %v11274_v31  ;;  %5792 = vmatpush.msra.mxu3 %v11303_v23 }
 0x40d   : > { %5728 = vmatpush.msra.mxu1 %v5727_v34  ;;  %5764 = vmatpush.msra.mxu2 %v11363_v41  ;;  %v11514_v34 = vand.u32 4294901760, %v8563_v28  ;;  %v5979_v4 = vand.u32 4294901760, %v11510_v2 }
 0x40e   : > { %5650 = vmatpush.msra.mxu0 %v11285_v57  ;;  %5794 = vmatpush.msra.mxu3 %v11320_v35 }
 0x40f   : > { %5730 = vmatmul.f32.vlgmr.msra.gmra.mxu1 %v11430_v49  ;;  %5767 = vmatpush.msra.mxu2 %v11375_v8  ;;  %v11538_v10 = vsub.f32 %v8563_v28, %v11514_v34 }
 0x410   : > { %5862 = vmatpush.msrb.mxu1 %v11236_v1  ;;  %5652 = vmatpush.msra.mxu0 %v11303_v23  ;;  %v5956_v1 = vsub.f32 %v11451_v47, %v5955_v11 }
 0x411   : > { %5796 = vmatpush.msra.mxu3 %v11337_v36  ;;  %5770 = vmatmul.f32.vlgmr.msra.gmra.mxu2 %v5660_v0 }
 0x412   : > { %5864 = vmatpush.msrb.mxu1 %v11247_v26  ;;  %5908 = vmatpush.msrb.mxu2 %v11399_v52  ;;  %v11516_v26 = vand.u32 4294901760, %v5898_v7  ;;  %v5957_v0 = vand.u32 4294901760, %v5956_v1  ;;  %v5991_v1 = vand.u32 4294901760, %v11538_v10 }
 0x413   : > { %5654 = vmatpush.msra.mxu0 %v11320_v35  ;;  %5798 = vmatpush.msra.mxu3 %v11350_v59 }
 0x414   : > { %5802 = vmatmul.f32.vlgmr.msra.gmra.mxu3 %v5661_v19  ;;  %5866 = vmatpush.msrb.mxu1 %v11262_v20  ;;  %v5968_v20 = vsub.f32 %v11478_v44, %v5967_v21  ;;  %v11535_v19 = vsub.f32 %v5898_v7, %v11516_v26  ;;  %v5980_v7 = vsub.f32 %v11510_v2, %v5979_v4 }
 0x415   : > { %5910 = vmatpush.msrb.mxu2 %v11407_v37  ;;  %5946 = vmatpush.msrb.mxu3 %v5945_v29  ;;  %v5985_v29 = vand.u32 4294901760, %v11525_v13 }
 0x416   : > { %5656 = vmatpush.msra.mxu0 %v11337_v36  ;;  %5868 = vmatpush.msrb.mxu1 %v11274_v31  ;;  %v5963_v31 = vand.u32 4294901760, %v5962_v40  ;;  %v5969_v28 = vand.u32 4294901760, %v5968_v20 }
 0x417   : > { %5912 = vmatpush.msrb.mxu2 %v11427_v9  ;;  %5952 = vmatpush.msrb.mxu3 %v5951_v15  ;;  %v8572_v15 = vld [vmem:[%s12980_s5 + $0x120] sm:$0xff] }
 0x418   : > { %5658 = vmatpush.msra.mxu0 %v11350_v59  ;;  %5870 = vmatpush.msrb.mxu1 %v11285_v57  ;;  %v5927_v57 = vand.u32 4294901760, %v11535_v19  ;;  %v11704_v20 = vand.u32 4294901760, %v8572_v15 }
 0x419   : > { %5664 = vmatmul.f32.vlgmr.msra.gmra.mxu0 %v5663_v42  ;;  %5914 = vmatpush.msrb.mxu2 %v11440_v63 }
 0x41a   : > { %5816 = vmatpush.msrb.mxu0 %v5677_v24  ;;  %5958 = vmatpush.msrb.mxu3 %v5957_v0  ;;  %v5986_v24 = vsub.f32 %v11525_v13, %v5985_v29  ;;  %v5928_v62 = vsub.f32 %v11535_v19, %v5927_v57  ;;  %v11727_v22 = vsub.f32 %v8572_v15, %v11704_v20 }
 0x41b   : > { %5872 = vmatpush.msrb.mxu1 %v11303_v23  ;;  %5916 = vmatpush.msrb.mxu2 %v11453_v32  ;;  %v5981_v23 = vand.u32 4294901760, %v5980_v7 }
 0x41c   : > { %5820 = vmatpush.msrb.mxu0 %v5683_v45  ;;  %5964 = vmatpush.msrb.mxu3 %v5963_v31  ;;  %v5992_v45 = vsub.f32 %v11538_v10, %v5991_v1  ;;  %v5987_v60 = vand.u32 4294901760, %v5986_v24  ;;  %v5929_v27 = vand.u32 4294901760, %v5928_v62 }
 0x41d   : > { %5874 = vmatpush.msrb.mxu1 %v11320_v35  ;;  %5918 = vmatpush.msrb.mxu2 %v11467_v46 }
 0x41e   : > { %5824 = vmatpush.msrb.mxu0 %v5689_v61  ;;  %5970 = vmatpush.msrb.mxu3 %v5969_v28  ;;  %v8580_v61 = vld [vmem:[%s12980_s5 + $0x160] sm:$0xff]  ;;  %v5993_v35 = vand.u32 4294901760, %v5992_v45 }
 0x41f   : > { %5876 = vmatpush.msrb.mxu1 %v11337_v36  ;;  %5920 = vmatpush.msrb.mxu2 %v11480_v58  ;;  %v11590_v36 = vand.u32 4294901760, %v8580_v61 }
 0x420   : > { %5828 = vmatpush.msrb.mxu0 %v5695_v50  ;;  %5976 = vmatpush.msrb.mxu3 %v5975_v6  ;;  %v8579_v50 = vld [vmem:[%s12980_s5 + $0x158] sm:$0xff] }
 0x421   : > { %5878 = vmatpush.msrb.mxu1 %v11350_v59  ;;  %5922 = vmatpush.msrb.mxu2 %v11501_v48  ;;  %v11608_v59 = vsub.f32 %v8580_v61, %v11590_v36 }
 0x422   : > { %5832 = vmatpush.msrb.mxu0 %v5701_v43  ;;  %5982 = vmatpush.msrb.mxu3 %v5981_v23  ;;  %v11598_v43 = vand.u32 4294901760, %v8579_v50 }
 0x423   : > { %5880 = vmatmul.f32.vlgmr.msrb.gmra.mxu1 %v11430_v49  ;;  %5924 = vmatpush.msrb.mxu2 %v11514_v34  ;;  %v6209_v41 = vand.u32 4294901760, %v11608_v59 }
 0x424   : > { %6048 = vmatpush.msra.mxu1 %v11399_v52  ;;  %5836 = vmatpush.msrb.mxu0 %v5707_v18  ;;  %v11610_v18 = vand.u32 4294901760, %v8578_v16 }
 0x425   : > { %5988 = vmatpush.msrb.mxu3 %v5987_v60  ;;  %5930 = vmatmul.f32.vlgmr.msrb.gmra.mxu2 %v5929_v27 }
 0x426   : > { %6050 = vmatpush.msra.mxu1 %v11407_v37  ;;  %6082 = vmatpush.msra.mxu2 %v5943_v30  ;;  %v11624_v30 = vand.u32 4294901760, %v8577_v5 }
 0x427   : > { %5840 = vmatpush.msrb.mxu0 %v5713_v25  ;;  %5994 = vmatpush.msrb.mxu3 %v5993_v35  ;;  %v11622_v25 = vsub.f32 %v8579_v50, %v11598_v43 }
 0x428   : > { %5996 = vmatmul.f32.vlgmr.msrb.gmra.mxu3 %v11516_v26  ;;  %6052 = vmatpush.msra.mxu1 %v11427_v9 }
 0x429   : > { %6086 = vmatpush.msra.mxu2 %v5949_v3  ;;  %6128 = vmatpush.msra.mxu3 %v11399_v52  ;;  %v11636_v52 = vand.u32 4294901760, %v8576_v39  ;;  %v8575_v3 = vld [vmem:[%s12980_s5 + $0x138] sm:$0xff]  ;;  %v6215_v8 = vand.u32 4294901760, %v11622_v25 }
 0x42a   : > { %5844 = vmatpush.msrb.mxu0 %v5719_v55  ;;  %6054 = vmatpush.msra.mxu1 %v11440_v63  ;;  %v11634_v55 = vsub.f32 %v8578_v16, %v11610_v18 }
 0x42b   : > { %6090 = vmatpush.msra.mxu2 %v5955_v11  ;;  %6130 = vmatpush.msra.mxu3 %v11407_v37  ;;  %v8574_v37 = vld [vmem:[%s12980_s5 + $0x130] sm:$0xff]  ;;  %v11665_v11 = vsub.f32 %v8576_v39, %v11636_v52 }
 0x42c   : > { %5848 = vmatpush.msrb.mxu0 %v5725_v51  ;;  %6056 = vmatpush.msra.mxu1 %v11453_v32  ;;  %v11648_v51 = vsub.f32 %v8577_v5, %v11624_v30 }
 0x42d   : > { %5850 = vmatmul.f32.vlgmr.msrb.gmra.mxu0 %v11430_v49  ;;  %6094 = vmatpush.msra.mxu2 %v5961_v17  ;;  %v11656_v49 = vand.u32 4294901760, %v8575_v3  ;;  %v8573_v17 = vld [vmem:[%s12980_s5 + $0x128] sm:$0xff] }
 0x42e   : > { %6009 = vmatpush.msra.mxu0 %v11420_v33  ;;  %6132 = vmatpush.msra.mxu3 %v11427_v9  ;;  %v6210_v33 = vsub.f32 %v11608_v59, %v6209_v41  ;;  %v6221_v9 = vand.u32 4294901760, %v11634_v55 }
 0x42f   : > { %6058 = vmatpush.msra.mxu1 %v11467_v46  ;;  %6098 = vmatpush.msra.mxu2 %v5967_v21  ;;  %v6227_v21 = vand.u32 4294901760, %v11648_v51  ;;  %v11688_v38 = vsub.f32 %v8575_v3, %v11656_v49 }
 0x430   : > { %6012 = vmatpush.msra.mxu0 %v11433_v12  ;;  %6134 = vmatpush.msra.mxu3 %v11440_v63  ;;  %v11673_v12 = vand.u32 4294901760, %v8574_v37  ;;  %v6216_v63 = vsub.f32 %v11622_v25, %v6215_v8  ;;  %v6222_v40 = vsub.f32 %v11634_v55, %v6221_v9 }
 0x431   : > { %6060 = vmatpush.msra.mxu1 %v11480_v58  ;;  %6102 = vmatpush.msra.mxu2 %v5973_v53  ;;  %v6233_v53 = vand.u32 4294901760, %v11665_v11 }
 0x432   : > { %6015 = vmatpush.msra.mxu0 %v11451_v47  ;;  %6136 = vmatpush.msra.mxu3 %v11453_v32  ;;  %v11690_v47 = vand.u32 4294901760, %v8573_v17  ;;  %v6211_v32 = vand.u32 4294901760, %v6210_v33  ;;  %v11702_v0 = vsub.f32 %v8574_v37, %v11673_v12 }
 0x433   : > { %6062 = vmatpush.msra.mxu1 %v11501_v48  ;;  %6106 = vmatpush.msra.mxu2 %v5979_v4  ;;  %v6239_v4 = vand.u32 4294901760, %v11688_v38 }
 0x434   : > { %6018 = vmatpush.msra.mxu0 %v11465_v56  ;;  %6138 = vmatpush.msra.mxu3 %v11467_v46  ;;  %v6217_v56 = vand.u32 4294901760, %v6216_v63  ;;  %v6228_v46 = vsub.f32 %v11648_v51, %v6227_v21  ;;  %v11717_v42 = vsub.f32 %v8573_v17, %v11690_v47  ;;  %v6245_v31 = vand.u32 4294901760, %v11702_v0 }
 0x435   : > { %6064 = vmatpush.msra.mxu1 %v11514_v34  ;;  %6110 = vmatpush.msra.mxu2 %v5985_v29 }
 0x436   : > { %6021 = vmatpush.msra.mxu0 %v11478_v44  ;;  %6140 = vmatpush.msra.mxu3 %v11480_v58  ;;  %v6223_v44 = vand.u32 4294901760, %v6222_v40  ;;  %v6234_v58 = vsub.f32 %v11665_v11, %v6233_v53  ;;  %v6229_v29 = vand.u32 4294901760, %v6228_v46 }
 0x437   : > { %6068 = vmatmul.f32.vlgmr.msra.gmra.mxu1 %v5927_v57  ;;  %6114 = vmatpush.msra.mxu2 %v5991_v1  ;;  %v6191_v1 = vand.u32 4294901760, %v11245_v14 }
 0x438   : > { %6212 = vmatpush.msrb.mxu1 %v6211_v32  ;;  %6024 = vmatpush.msra.mxu0 %v11494_v54  ;;  %v6240_v54 = vsub.f32 %v11688_v38, %v6239_v4  ;;  %v6235_v28 = vand.u32 4294901760, %v6234_v58 }
 0x439   : > { %6142 = vmatpush.msra.mxu3 %v11501_v48  ;;  %6116 = vmatmul.f32.vlgmr.msra.gmra.mxu2 %v11516_v26  ;;  %v6251_v48 = vand.u32 4294901760, %v11717_v42  ;;  %v6192_v6 = vsub.f32 %v11245_v14, %v6191_v1 }
 0x43a   : > { %6218 = vmatpush.msrb.mxu1 %v6217_v56  ;;  %6275 = vmatpush.msrb.mxu2 %v11608_v59 }
 0x43b   : > { %6027 = vmatpush.msra.mxu0 %v11510_v2  ;;  %6144 = vmatpush.msra.mxu3 %v11514_v34  ;;  %v6246_v2 = vsub.f32 %v11702_v0, %v6245_v31  ;;  %v6257_v34 = vand.u32 4294901760, %v11727_v22  ;;  %v6252_v7 = vsub.f32 %v11717_v42, %v6251_v48  ;;  %v6193_v24 = vand.u32 4294901760, %v6192_v6 }
 0x43c   : > { %6146 = vmatmul.f32.vlgmr.msra.gmra.mxu3 %v11516_v26  ;;  %6224 = vmatpush.msrb.mxu1 %v6223_v44  ;;  %v6241_v26 = vand.u32 4294901760, %v6240_v54 }
 0x43d   : > { %6278 = vmatpush.msrb.mxu2 %v11622_v25  ;;  %6314 = vmatpush.msrb.mxu3 %v11590_v36  ;;  %v6247_v57 = vand.u32 4294901760, %v6246_v2  ;;  %v6194_v14 = vsub.f32 %v6192_v6, %v6193_v24 }
 0x43e   : > { %6030 = vmatpush.msra.mxu0 %v11525_v13  ;;  %6230 = vmatpush.msrb.mxu1 %v6229_v29  ;;  %v6258_v13 = vsub.f32 %v11727_v22, %v6257_v34 }
 0x43f   : > { %6281 = vmatpush.msrb.mxu2 %v11634_v55  ;;  %6316 = vmatpush.msrb.mxu3 %v11598_v43  ;;  %v6195_v23 = vand.u32 4294901760, %v6194_v14 }
 0x440   : > { %6033 = vmatpush.msra.mxu0 %v11538_v10  ;;  %6236 = vmatpush.msrb.mxu1 %v6235_v28  ;;  %v6253_v10 = vand.u32 4294901760, %v6252_v7 }
 0x441   : > { %6036 = vmatmul.f32.vlgmr.msra.gmra.mxu0 %v11535_v19  ;;  %6284 = vmatpush.msrb.mxu2 %v11648_v51  ;;  %v6259_v19 = vand.u32 4294901760, %v6258_v13 }
 0x442   : > { %6174 = vmatpush.msrb.mxu0 %v11590_v36  ;;  %6318 = vmatpush.msrb.mxu3 %v11610_v18 }
 0x443   : > { %6242 = vmatpush.msrb.mxu1 %v6241_v26  ;;  %6287 = vmatpush.msrb.mxu2 %v11665_v11 }
 0x444   : > { %6176 = vmatpush.msrb.mxu0 %v11598_v43  ;;  %6320 = vmatpush.msrb.mxu3 %v11624_v30 }
 0x445   : > { %6248 = vmatpush.msrb.mxu1 %v6247_v57  ;;  %6290 = vmatpush.msrb.mxu2 %v11688_v38 }
 0x446   : > { %6178 = vmatpush.msrb.mxu0 %v11610_v18  ;;  %6322 = vmatpush.msrb.mxu3 %v11636_v52 }
 0x447   : > { %6254 = vmatpush.msrb.mxu1 %v6253_v10  ;;  %6293 = vmatpush.msrb.mxu2 %v11702_v0 }
 0x448   : > { %6180 = vmatpush.msrb.mxu0 %v11624_v30  ;;  %6324 = vmatpush.msrb.mxu3 %v11656_v49 }
 0x449   : > { %6260 = vmatpush.msrb.mxu1 %v6259_v19  ;;  %6296 = vmatpush.msrb.mxu2 %v11717_v42 }
 0x44a   : > { %6182 = vmatpush.msrb.mxu0 %v11636_v52  ;;  %6326 = vmatpush.msrb.mxu3 %v11673_v12 }
 0x44b   : > { %6262 = vmatmul.f32.vlgmr.msrb.gmra.mxu1 %v6191_v1  ;;  %6299 = vmatpush.msrb.mxu2 %v11727_v22 }
 0x44c   : > { %6394 = vmatpush.msra.mxu1 %v11590_v36  ;;  %6184 = vmatpush.msrb.mxu0 %v11656_v49 }
 0x44d   : > { %6328 = vmatpush.msrb.mxu3 %v11690_v47  ;;  %6302 = vmatmul.f32.vlgmr.msrb.gmra.mxu2 %v6192_v6 }
 0x44e   : > { %6396 = vmatpush.msra.mxu1 %v11598_v43  ;;  %6186 = vmatpush.msrb.mxu0 %v11673_v12 }
 0x44f   : > { %6330 = vmatpush.msrb.mxu3 %v11704_v20 }
 0x450   : > { %6334 = vmatmul.f32.vlgmr.msrb.gmra.mxu3 %v6193_v24  ;;  %6398 = vmatpush.msra.mxu1 %v11610_v18 }
 0x451   : > { %6188 = vmatpush.msrb.mxu0 %v11690_v47 }
 0x452   : > { %6400 = vmatpush.msra.mxu1 %v11624_v30 }
 0x453   : > { %6190 = vmatpush.msrb.mxu0 %v11704_v20 }
 0x454   : > { %6196 = vmatmul.f32.vlgmr.msrb.gmra.mxu0 %v6195_v23  ;;  %6402 = vmatpush.msra.mxu1 %v11636_v52  ;;  %v8644_v23 = vld [vmem:[%s12981_s6] ss:$0 sm:$0xff] }
 0x455   : > { %6348 = vmatpush.msra.mxu0 %v6209_v41 }
 0x456   : > { %6404 = vmatpush.msra.mxu1 %v11656_v49 }
 0x457   : > { %6352 = vmatpush.msra.mxu0 %v6215_v8 }
 0x458   : > { %6406 = vmatpush.msra.mxu1 %v11673_v12 }
 0x459   : > { %6356 = vmatpush.msra.mxu0 %v6221_v9 }
 0x45a   : > { %6408 = vmatpush.msra.mxu1 %v11690_v47 }
 0x45b   : > { %6360 = vmatpush.msra.mxu0 %v6227_v21 }
 0x45c   : > { %6410 = vmatpush.msra.mxu1 %v11704_v20 }
 0x45d   : > { %6364 = vmatpush.msra.mxu0 %v6233_v53  ;;  %6412 = vmatmul.f32.vlgmr.msra.gmra.mxu1 %v6191_v1  ;;  %v6423_v53 = vld [vmem:[%s12982_s7] sm:$0xf] }
 0x45e   : > { %v6426_v44 = vsel %vm6424_vm8, %v6423_v53, 0 }
 0x45f   : > { %6368 = vmatpush.msra.mxu0 %v6239_v4  ;;  %v11809_v22 = vand.u32 4294901760, %v6426_v44 }
 0x461   : > { %6372 = vmatpush.msra.mxu0 %v6245_v31 }
 0x463   : > { %6376 = vmatpush.msra.mxu0 %v6251_v48  ;;  %v5214_v45 = vpop.f32.mrf.mxu1 }
 0x465   : > { %6380 = vmatpush.msra.mxu0 %v6257_v34  ;;  %v11812_v34 = vsub.f32 %v6426_v44, %v11809_v22 }
 0x466   : > { %6382 = vmatmul.f32.vlgmr.msra.gmra.mxu0 %v6191_v1 }
 0x467   : > { %v6447_v6 = vand.u32 4294901760, %v11812_v34 }
 0x46b   : > { %v5148_v62 = vpop.f32.mrf.mxu0  ;;  %v5254_v60 = vpop.f32.mrf.mxu2 }
 0x46c   : > { %v5364_v35 = vpop.f32.mrf.mxu1  ;;  %v5215_v5 = vadd.f32 %v5214_v45, %v5148_v62  ;;  %v8581_v62 = vld [vmem:[%s12982_s7 + $0x4] sm:$0xf] }
 0x46d   : > { %v5286_v61 = vpop.f32.mrf.mxu3 }
 0x46e   : > { %v5255_v18 = vadd.f32 %v5254_v60, %v5215_v5  ;;  %v6577_v60 = vsel %vm6424_vm8, %v8581_v62, 0 }
 0x470   : > { %v5287_v41 = vadd.f32 %v5286_v61, %v5255_v18  ;;  %v6448_v61 = vsub.f32 %v11812_v34, %v6447_v6 }
 0x474   : > { %v5400_v50 = vpop.f32.mrf.mxu2 }
 0x475   : > { %v5334_v27 = vpop.f32.mrf.mxu0 }
 0x476   : > { %v5335_v55 = vadd.f32 %v5334_v27, %v5287_v41  ;;  %v11823_v27 = vand.u32 4294901760, %v6577_v60 }
 0x477   : > { %v5466_v36 = vpop.f32.mrf.mxu3 }
 0x478   : > { %v5538_v43 = vpop.f32.mrf.mxu1  ;;  %v5365_v8 = vadd.f32 %v5364_v35, %v5335_v55 }
 0x47a   : > { %v5401_v49 = vadd.f32 %v5400_v50, %v5365_v8  ;;  %v11826_v50 = vsub.f32 %v6577_v60, %v11823_v27 }
 0x47c   : > { %v5467_v11 = vadd.f32 %v5466_v36, %v5401_v49 }
 0x480   : > { %v5586_v59 = vpop.f32.mrf.mxu2 }
 0x482   : > { %v5506_v16 = vpop.f32.mrf.mxu0 }
 0x483   : > { %v5616_v25 = vpop.f32.mrf.mxu3  ;;  %v5507_v15 = vadd.f32 %v5506_v16, %v5467_v11  ;;  %v6449_v16 = vand.u32 4294901760, %v6448_v61 }
 0x485   : > { %v5539_v0 = vadd.f32 %v5538_v43, %v5507_v15  ;;  %v6598_v43 = vand.u32 4294901760, %v11826_v50 }
 0x487   : > { %v5587_v29 = vadd.f32 %v5586_v59, %v5539_v0  ;;  %v6599_v59 = vsub.f32 %v11826_v50, %v6598_v43  ;;  %v6734_v0 = vld [vmem:[%s12983_s8 + $0x40] sm:$0xff] }
 0x489   : > { %v5617_v26 = vadd.f32 %v5616_v25, %v5587_v29  ;;  %v6741_v25 = vld [vmem:[%s12983_s8 + $0x78] sm:$0xff] }
 0x48a   : > { %v11835_v41 = vand.u32 4294901760, %v6741_v25 }
 0x48c   : > { %v5731_v30 = vpop.f32.mrf.mxu1 }
 0x494   : > { %v5771_v52 = vpop.f32.mrf.mxu2 }
 0x496   : > { %v5665_v39 = vpop.f32.mrf.mxu0 }
 0x497   : > { %v5803_v51 = vpop.f32.mrf.mxu3  ;;  %v5732_v63 = vadd.f32 %v5731_v30, %v5665_v39  ;;  %v6600_v39 = vand.u32 4294901760, %v6599_v59 }
 0x499   : > { %v5772_v47 = vadd.f32 %v5771_v52, %v5732_v63  ;;  %v11838_v52 = vsub.f32 %v6741_v25, %v11835_v41 }
 0x49b   : > { %v5804_v46 = vadd.f32 %v5803_v51, %v5772_v47  ;;  %v6739_v51 = vld [vmem:[%s12983_s8 + $0x68] sm:$0xff]  ;;  %v6785_v15 = vand.u32 4294901760, %v11838_v52 }
 0x49c   : > { %v11851_v49 = vand.u32 4294901760, %v6739_v51  ;;  %v6735_v47 = vld [vmem:[%s12983_s8 + $0x48] sm:$0xff] }
 0x49e   : > { %v11870_v63 = vsub.f32 %v6739_v51, %v11851_v49  ;;  %v6730_v51 = vld [vmem:[%s12983_s8 + $0x20] sm:$0xff] }
 0x4a0   : > { %v5881_v37 = vpop.f32.mrf.mxu1 }
 0x4a8   : > { %v5931_v33 = vpop.f32.mrf.mxu2 }
 0x4aa   : > { %v5851_v3 = vpop.f32.mrf.mxu0 }
 0x4ab   : > { %v5997_v17 = vpop.f32.mrf.mxu3  ;;  %v5852_v58 = vadd.f32 %v5851_v3, %v5804_v46  ;;  %v6740_v3 = vld [vmem:[%s12983_s8 + $0x70] sm:$0xff]  ;;  %v11900_v46 = vand.u32 4294901760, %v6735_v47 }
 0x4ac   : > { %v5998_v21 = vadd.f32 %v5997_v17, %v5931_v33  ;;  %v6738_v33 = vld [vmem:[%s12983_s8 + $0x60] sm:$0xff] }
 0x4ad   : > { %v5882_v28 = vadd.f32 %v5881_v37, %v5852_v58  ;;  %v11847_v37 = vand.u32 4294901760, %v6740_v3  ;;  %v11864_v17 = vand.u32 4294901760, %v6738_v33 }
 0x4af   : > { %v5884_v1 = vadd.f32 %v5882_v28, %v5617_v26  ;;  %v11860_v11 = vsub.f32 %v6740_v3, %v11847_v37 }
 0x4b4   : > { %v6069_v12 = vpop.f32.mrf.mxu1 }
 0x4bc   : > { %v6117_v38 = vpop.f32.mrf.mxu2 }
 0x4be   : > { %v6037_v9 = vpop.f32.mrf.mxu0 }
 0x4bf   : > { %v6038_v32 = vadd.f32 %v6037_v9, %v5998_v21  ;;  %v6147_v20 = vpop.f32.mrf.mxu3  ;;  %v6737_v9 = vld [vmem:[%s12983_s8 + $0x58] sm:$0xff] }
 0x4c0   : > { %v11874_v21 = vand.u32 4294901760, %v6737_v9 }
 0x4c1   : > { %v6070_v4 = vadd.f32 %v6069_v12, %v6038_v32  ;;  %v6736_v12 = vld [vmem:[%s12983_s8 + $0x50] sm:$0xff]  ;;  %v6791_v32 = vand.u32 4294901760, %v11860_v11 }
 0x4c2   : > { %v11890_v53 = vsub.f32 %v6737_v9, %v11874_v21  ;;  %v6729_v9 = vld [vmem:[%s12983_s8 + $0x18] sm:$0xff] }
 0x4c3   : > { %v6118_v54 = vadd.f32 %v6117_v38, %v6070_v4  ;;  %v11879_v38 = vand.u32 4294901760, %v6736_v12  ;;  %v6792_v44 = vsub.f32 %v11860_v11, %v6791_v32 }
 0x4c4   : > { %v6809_v29 = vand.u32 4294901760, %v11890_v53 }
 0x4c5   : > { %v6148_v7 = vadd.f32 %v6147_v20, %v6118_v54  ;;  %v6786_v20 = vsub.f32 %v11838_v52, %v6785_v15  ;;  %v11905_v4 = vsub.f32 %v6736_v12, %v11879_v38  ;;  %v6732_v54 = vld [vmem:[%s12983_s8 + $0x30] sm:$0xff] }
 0x4c7   : > { %v6150_v24 = vadd.f32 %v6148_v7, %v5884_v1  ;;  %v6815_v26 = vand.u32 4294901760, %v11905_v4  ;;  %v6731_v7 = vld [vmem:[%s12983_s8 + $0x28] sm:$0xff] }
 0x4c8   : > { %v6263_v56 = vpop.f32.mrf.mxu1 }
 0x4c9   : > { %v6816_v62 = vsub.f32 %v11905_v4, %v6815_v26 }
 0x4d0   : > { %v6303_v31 = vpop.f32.mrf.mxu2 }
 0x4d1   : > { %v6197_v40 = vpop.f32.mrf.mxu0 }
 0x4d2   : > { %v6264_v42 = vadd.f32 %v6263_v56, %v6197_v40  ;;  %v11886_v40 = vsub.f32 %v6738_v33, %v11864_v17  ;;  %v6797_v56 = vand.u32 4294901760, %v11870_v63  ;;  %v12010_v33 = vand.u32 4294901760, %v6730_v51 }
 0x4d3   : > { %v6335_v2 = vpop.f32.mrf.mxu3 }
 0x4d4   : > { %v6304_v48 = vadd.f32 %v6303_v31, %v6264_v42  ;;  %v6733_v42 = vld [vmem:[%s12983_s8 + $0x38] sm:$0xff]  ;;  %v6803_v58 = vand.u32 4294901760, %v11886_v40  ;;  %v11916_v31 = vand.u32 4294901760, %v6734_v0  ;;  %v6798_v28 = vsub.f32 %v11870_v63, %v6797_v56 }
 0x4d5   : > { %v12016_v12 = vsub.f32 %v6730_v51, %v12010_v33 }
 0x4d6   : > { %v6336_v57 = vadd.f32 %v6335_v2, %v6304_v48  ;;  %v6787_v48 = vand.u32 4294901760, %v6786_v20  ;;  %v11929_v2 = vsub.f32 %v6735_v47, %v11900_v46  ;;  %v11944_v1 = vsub.f32 %v6734_v0, %v11916_v31  ;;  %v6728_v0 = vld [vmem:[%s12983_s8 + $0x10] sm:$0xff] }
 0x4d7   : > { %v12018_v47 = vand.u32 4294901760, %v6729_v9  ;;  %v6851_v20 = vand.u32 4294901760, %v12016_v12 }
 0x4da   : > { %v6413_v19 = vpop.f32.mrf.mxu1 }
 0x4e3   : > { %v6383_v13 = vpop.f32.mrf.mxu0 }
 0x4e4   : > { %v6384_v10 = vadd.f32 %v6383_v13, %v6336_v57  ;;  %v6793_v57 = vand.u32 4294901760, %v6792_v44  ;;  %v6804_v13 = vsub.f32 %v11886_v40, %v6803_v58  ;;  %v12030_v44 = vand.u32 4294901760, %v6728_v0 }
 0x4e6   : > { %v6414_v14 = vadd.f32 %v6413_v19, %v6384_v10  ;;  %v11946_v10 = vand.u32 4294901760, %v6732_v54  ;;  %v6810_v19 = vsub.f32 %v11890_v53, %v6809_v29 }
 0x4e8   : > { %v6416_v45 = vadd.f32 %v6414_v14, %v6150_v24  ;;  %v6821_v24 = vand.u32 4294901760, %v11929_v2  ;;  %v11968_v60 = vsub.f32 %v6732_v54, %v11946_v10  ;;  %v6811_v61 = vand.u32 4294901760, %v6810_v19  ;;  %v6727_v54 = vld [vmem:[%s12983_s8 + $0x8] sm:$0xff] }
 0x4ea   : > { %v6421_v35 = vadd.f32 %v8644_v23, %v6416_v45  ;;  %v11958_v23 = vand.u32 4294901760, %v6731_v7  ;;  %v6827_v45 = vand.u32 4294901760, %v11944_v1  ;;  %v6839_v59 = vand.u32 4294901760, %v11968_v60 }
 0x4ec   : > { %v6422_v36 = vmax.f32 %v6421_v35, 0.0 }
 0x4ee   : > { %v6443_v5 = vand.u32 4294901760, %v6422_v36 }
 0x4f0   : > { %6444 = vmatpush.msra.mxu2 %v6443_v5  ;;  %6595 = vmatpush.msrb.mxu0 %v6443_v5  ;;  %v6470_v18 = vsub.f32 %v6422_v36, %v6443_v5  ;;  %v11978_v36 = vsub.f32 %v6731_v7, %v11958_v23  ;;  %v12042_v7 = vsub.f32 %v6728_v0, %v12030_v44 }
 0x4f1   : > { %6450 = vmatmul.f32.vlgmr.msra.gmra.mxu2 %v6449_v16  ;;  %6601 = vmatmul.f32.vlgmr.msrb.gmra.mxu0 %v6600_v39  ;;  %v6817_v16 = vand.u32 4294901760, %v6816_v62 }
 0x4f2   : > { %6497 = vmatpush.msrb.mxu2 %v6470_v18  ;;  %v6471_v30 = vand.u32 4294901760, %v6470_v18  ;;  %v6845_v25 = vand.u32 4294901760, %v11978_v36 }
 0x4f4   : > { %6546 = vmatpush.msra.mxu2 %v6471_v30  ;;  %6697 = vmatpush.msra.mxu0 %v6471_v30  ;;  %v6472_v55 = vsub.f32 %v6470_v18, %v6471_v30 }
 0x4f6   : > { %v6473_v8 = vand.u32 4294901760, %v6472_v55  ;;  %6886 = vmatpush.msrb.mxu0 %v11838_v52  ;;  %v6846_v55 = vsub.f32 %v11978_v36, %v6845_v25 }
 0x4f8   : > { %6474 = vmatpush.msra.mxu3 %v6473_v8  ;;  %6625 = vmatpush.msrb.mxu1 %v6473_v8  ;;  %v6847_v8 = vand.u32 4294901760, %v6846_v55 }
 0x4f9   : > { %6476 = vmatmul.f32.vlgmr.msra.gmra.mxu3 %v11809_v22  ;;  %6500 = vmatmul.f32.vlgmr.msrb.gmra.mxu2 %v11812_v34  ;;  %v11931_v34 = vand.u32 4294901760, %v6733_v42 }
 0x4fa   : > { %6520 = vmatpush.msrb.mxu3 %v6443_v5  ;;  %6648 = vmatpush.msrb.mxu2 %v6470_v18 }
 0x4fb   : > { %6719 = vmatpush.msra.mxu1 %v6443_v5  ;;  %6699 = vmatmul.f32.vlgmr.msra.gmra.mxu0 %v11823_v27  ;;  %v11956_v14 = vsub.f32 %v6733_v42, %v11931_v34  ;;  %v12027_v42 = vsub.f32 %v6729_v9, %v12018_v47  ;;  %v8595_v9 = vld [vmem:[%s12983_s8 + $0xe8] sm:$0xff] }
 0x4fc   : > { %6568 = vmatpush.msra.mxu3 %v6443_v5  ;;  %6627 = vmatmul.f32.vlgmr.msrb.gmra.mxu1 %v11823_v27  ;;  %v12107_v0 = vand.u32 4294901760, %v8595_v9 }
 0x4fd   : > { %6889 = vmatpush.msrb.mxu0 %v11860_v11  ;;  %6939 = vmatpush.msrb.mxu1 %v11835_v41  ;;  %v6833_v35 = vand.u32 4294901760, %v11956_v14 }
 0x4ff   : > { %6892 = vmatpush.msrb.mxu0 %v11870_v63  ;;  %6941 = vmatpush.msrb.mxu1 %v11847_v37  ;;  %v6834_v39 = vsub.f32 %v11956_v14, %v6833_v35 }
 0x501   : > { %6524 = vmatmul.f32.vlgmr.msrb.gmra.mxu3 %v6447_v6  ;;  %6548 = vmatmul.f32.vlgmr.msra.gmra.mxu2 %v11809_v22  ;;  %v6799_v6 = vand.u32 4294901760, %v6798_v28  ;;  %v6857_v28 = vand.u32 4294901760, %v12027_v42 }
 0x502   : > { %6671 = vmatpush.msrb.mxu3 %v6443_v5  ;;  %6743 = vmatpush.msra.mxu2 %v11835_v41  ;;  %v6828_v5 = vsub.f32 %v11944_v1, %v6827_v45 }
 0x503   : > { %6895 = vmatpush.msrb.mxu0 %v11886_v40  ;;  %6943 = vmatpush.msrb.mxu1 %v11851_v49  ;;  %v8593_v40 = vld [vmem:[%s12983_s8 + $0xd8] sm:$0xff] }
 0x504   : > { %6721 = vmatmul.f32.vlgmr.msra.gmra.mxu1 %v11823_v27  ;;  %6745 = vmatpush.msra.mxu2 %v11847_v37  ;;  %v6822_v27 = vsub.f32 %v11929_v2, %v6821_v24  ;;  %v6829_v30 = vand.u32 4294901760, %v6828_v5 }
 0x505   : > { %6898 = vmatpush.msrb.mxu0 %v11890_v53  ;;  %6945 = vmatpush.msrb.mxu1 %v11864_v17  ;;  %v8592_v53 = vld [vmem:[%s12983_s8 + $0xd0] sm:$0xff] }
 0x506   : > { %6747 = vmatpush.msra.mxu2 %v11851_v49  ;;  %v6823_v18 = vand.u32 4294901760, %v6822_v27 }
 0x507   : > { %6901 = vmatpush.msrb.mxu0 %v11905_v4  ;;  %6947 = vmatpush.msrb.mxu1 %v11874_v21  ;;  %v8591_v4 = vld [vmem:[%s12983_s8 + $0xc8] sm:$0xff] }
 0x508   : > { %6749 = vmatpush.msra.mxu2 %v11864_v17 }
 0x509   : > { %6570 = vmatmul.f32.vlgmr.msra.gmra.mxu3 %v11809_v22  ;;  %6651 = vmatmul.f32.vlgmr.msrb.gmra.mxu2 %v11826_v50  ;;  %v6805_v22 = vand.u32 4294901760, %v6804_v13  ;;  %v6840_v50 = vsub.f32 %v11968_v60, %v6839_v59  ;;  %v6726_v13 = vld [vmem:[%s12983_s8] sm:$0xff] }
 0x50a   : > { %6788 = vmatpush.msra.mxu3 %v6787_v48  ;;  %6904 = vmatpush.msrb.mxu0 %v11929_v2  ;;  %v6852_v48 = vsub.f32 %v12016_v12, %v6851_v20  ;;  %v8590_v2 = vld [vmem:[%s12983_s8 + $0xc0] sm:$0xff] }
 0x50b   : > { %6949 = vmatpush.msrb.mxu1 %v11879_v38  ;;  %6751 = vmatpush.msra.mxu2 %v11874_v21  ;;  %v6841_v3 = vand.u32 4294901760, %v6840_v50  ;;  %v8597_v50 = vld [vmem:[%s12983_s8 + $0xf8] sm:$0xff] }
 0x50c   : > { %6794 = vmatpush.msra.mxu3 %v6793_v57  ;;  %6907 = vmatpush.msrb.mxu0 %v11944_v1  ;;  %v12045_v57 = vand.u32 4294901760, %v6727_v54  ;;  %v6853_v19 = vand.u32 4294901760, %v6852_v48  ;;  %v12084_v55 = vand.u32 4294901760, %v8597_v50  ;;  %v8594_v48 = vld [vmem:[%s12983_s8 + $0xe0] sm:$0xff]  ;;  %v8589_v1 = vld [vmem:[%s12983_s8 + $0xb8] sm:$0xff] }
 0x50d   : > { %6951 = vmatpush.msrb.mxu1 %v11900_v46  ;;  %6753 = vmatpush.msra.mxu2 %v11879_v38 }
 0x50e   : > { %6800 = vmatpush.msra.mxu3 %v6799_v6  ;;  %6910 = vmatpush.msrb.mxu0 %v11956_v14  ;;  %v6858_v6 = vsub.f32 %v12027_v42, %v6857_v28  ;;  %v12057_v62 = vsub.f32 %v6727_v54, %v12045_v57  ;;  %v8588_v14 = vld [vmem:[%s12983_s8 + $0xb0] sm:$0xff] }
 0x50f   : > { %6953 = vmatpush.msrb.mxu1 %v11916_v31  ;;  %6755 = vmatpush.msra.mxu2 %v11900_v46 }
 0x510   : > { %6806 = vmatpush.msra.mxu3 %v6805_v22  ;;  %6913 = vmatpush.msrb.mxu0 %v11968_v60  ;;  %v6863_v22 = vand.u32 4294901760, %v12042_v7  ;;  %v6859_v27 = vand.u32 4294901760, %v6858_v6  ;;  %v6869_v5 = vand.u32 4294901760, %v12057_v62  ;;  %v8586_v60 = vld [vmem:[%s12983_s8 + $0xa0] sm:$0xff] }
 0x511   : > { %6675 = vmatmul.f32.vlgmr.msrb.gmra.mxu3 %v6598_v43  ;;  %6955 = vmatpush.msrb.mxu1 %v11931_v34  ;;  %v6835_v43 = vand.u32 4294901760, %v6834_v39 }
 0x512   : > { %6812 = vmatpush.msra.mxu3 %v6811_v61  ;;  %6757 = vmatpush.msra.mxu2 %v11916_v31  ;;  %v12061_v61 = vand.u32 4294901760, %v6726_v13 }
 0x513   : > { %6916 = vmatpush.msrb.mxu0 %v11978_v36  ;;  %6957 = vmatpush.msrb.mxu1 %v11946_v10 }
 0x514   : > { %6818 = vmatpush.msra.mxu3 %v6817_v16  ;;  %6759 = vmatpush.msra.mxu2 %v11931_v34  ;;  %v6864_v16 = vsub.f32 %v12042_v7, %v6863_v22 }
 0x515   : > { %6959 = vmatpush.msrb.mxu1 %v11958_v23  ;;  %6919 = vmatpush.msrb.mxu0 %v12016_v12 }
 0x516   : > { %6824 = vmatpush.msra.mxu3 %v6823_v18  ;;  %6761 = vmatpush.msra.mxu2 %v11946_v10  ;;  %v12070_v18 = vsub.f32 %v6726_v13, %v12061_v61  ;;  %v6865_v39 = vand.u32 4294901760, %v6864_v16  ;;  %v12122_v13 = vand.u32 4294901760, %v8594_v48  ;;  %v12138_v16 = vand.u32 4294901760, %v8593_v40 }
 0x517   : > { %6961 = vmatpush.msrb.mxu1 %v12010_v33  ;;  %6922 = vmatpush.msrb.mxu0 %v12027_v42 }
 0x518   : > { %6830 = vmatpush.msra.mxu3 %v6829_v30  ;;  %6763 = vmatpush.msra.mxu2 %v11958_v23  ;;  %v6870_v30 = vsub.f32 %v12057_v62, %v6869_v5 }
 0x519   : > { %6963 = vmatpush.msrb.mxu1 %v12018_v47  ;;  %6925 = vmatpush.msrb.mxu0 %v12042_v7  ;;  %v8582_v7 = vld [vmem:[%s12983_s8 + $0x80] sm:$0xff] }
 0x51a   : > { %6836 = vmatpush.msra.mxu3 %v6835_v43  ;;  %6765 = vmatpush.msra.mxu2 %v12010_v33  ;;  %v6875_v43 = vand.u32 4294901760, %v12070_v18 }
 0x51b   : > { %6965 = vmatpush.msrb.mxu1 %v12030_v44  ;;  %6928 = vmatpush.msrb.mxu0 %v12057_v62 }
 0x51c   : > { %6842 = vmatpush.msra.mxu3 %v6841_v3  ;;  %6767 = vmatpush.msra.mxu2 %v12018_v47  ;;  %v6871_v3 = vand.u32 4294901760, %v6870_v30  ;;  %v6876_v52 = vsub.f32 %v12070_v18, %v6875_v43  ;;  %v12153_v30 = vand.u32 4294901760, %v8592_v53 }
 0x51d   : > { %6967 = vmatpush.msrb.mxu1 %v12045_v57  ;;  %6931 = vmatpush.msrb.mxu0 %v12070_v18 }
 0x51e   : > { %6848 = vmatpush.msra.mxu3 %v6847_v8  ;;  %6769 = vmatpush.msra.mxu2 %v12030_v44  ;;  %v8596_v8 = vld [vmem:[%s12983_s8 + $0xf0] sm:$0xff]  ;;  %v6877_v11 = vand.u32 4294901760, %v6876_v52  ;;  %v12170_v52 = vsub.f32 %v8592_v53, %v12153_v30  ;;  %v12215_v53 = vand.u32 4294901760, %v8588_v14 }
 0x51f   : > { %6969 = vmatpush.msrb.mxu1 %v12061_v61  ;;  %7101 = vmatpush.msra.mxu0 %v12084_v55  ;;  %v12098_v51 = vand.u32 4294901760, %v8596_v8 }
 0x520   : > { %6771 = vmatpush.msra.mxu2 %v12045_v57  ;;  %6854 = vmatpush.msra.mxu3 %v6853_v19  ;;  %v12125_v19 = vsub.f32 %v8595_v9, %v12107_v0  ;;  %v12186_v9 = vand.u32 4294901760, %v8590_v2 }
 0x521   : > { %7103 = vmatpush.msra.mxu0 %v12098_v51  ;;  %v12110_v54 = vsub.f32 %v8596_v8, %v12098_v51  ;;  %v12167_v8 = vand.u32 4294901760, %v8591_v4 }
 0x522   : > { %6773 = vmatpush.msra.mxu2 %v12061_v61  ;;  %6860 = vmatpush.msra.mxu3 %v6859_v27  ;;  %v7155_v27 = vand.u32 4294901760, %v12125_v19 }
 0x523   : > { %7105 = vmatpush.msra.mxu0 %v12107_v0 }
 0x524   : > { %6980 = vmatpush.msrb.mxu2 %v6785_v15  ;;  %6866 = vmatpush.msra.mxu3 %v6865_v39  ;;  %v12096_v15 = vsub.f32 %v8597_v50, %v12084_v55  ;;  %v7156_v39 = vsub.f32 %v12125_v19, %v7155_v27 }
 0x525   : > { %7107 = vmatpush.msra.mxu0 %v12122_v13 }
 0x526   : > { %6984 = vmatpush.msrb.mxu2 %v6791_v32  ;;  %6872 = vmatpush.msra.mxu3 %v6871_v3  ;;  %v7143_v32 = vand.u32 4294901760, %v12096_v15 }
 0x527   : > { %7109 = vmatpush.msra.mxu0 %v12138_v16 }
 0x528   : > { %6988 = vmatpush.msrb.mxu2 %v6797_v56  ;;  %6878 = vmatpush.msra.mxu3 %v6877_v11  ;;  %v7144_v63 = vsub.f32 %v12096_v15, %v7143_v32  ;;  %v7149_v56 = vand.u32 4294901760, %v12110_v54  ;;  %v12189_v11 = vsub.f32 %v8591_v4, %v12167_v8 }
 0x529   : > { %7111 = vmatpush.msra.mxu0 %v12153_v30 }
 0x52a   : > { %6992 = vmatpush.msrb.mxu2 %v6803_v58  ;;  %7047 = vmatpush.msrb.mxu3 %v11835_v41  ;;  %v7145_v58 = vand.u32 4294901760, %v7144_v63  ;;  %v7150_v6 = vsub.f32 %v12110_v54, %v7149_v56  ;;  %v12142_v41 = vsub.f32 %v8594_v48, %v12122_v13 }
 0x52b   : > { %7113 = vmatpush.msra.mxu0 %v12167_v8 }
 0x52c   : > { %6996 = vmatpush.msrb.mxu2 %v6809_v29  ;;  %7049 = vmatpush.msrb.mxu3 %v11847_v37  ;;  %v7151_v29 = vand.u32 4294901760, %v7150_v6  ;;  %v12156_v37 = vsub.f32 %v8593_v40, %v12138_v16  ;;  %v7161_v50 = vand.u32 4294901760, %v12142_v41  ;;  %v7179_v40 = vand.u32 4294901760, %v12189_v11 }
 0x52d   : > { %7146 = vmatpush.msra.mxu1 %v7145_v58  ;;  %7115 = vmatpush.msra.mxu0 %v12186_v9  ;;  %v12202_v58 = vand.u32 4294901760, %v8589_v1 }
 0x52e   : > { %7000 = vmatpush.msrb.mxu2 %v6815_v26  ;;  %7051 = vmatpush.msrb.mxu3 %v11851_v49  ;;  %v7157_v26 = vand.u32 4294901760, %v7156_v39  ;;  %v7167_v3 = vand.u32 4294901760, %v12156_v37  ;;  %v7162_v49 = vsub.f32 %v12142_v41, %v7161_v50  ;;  %v7180_v6 = vsub.f32 %v12189_v11, %v7179_v40  ;;  %v8587_v39 = vld [vmem:[%s12983_s8 + $0xa8] sm:$0xff] }
 0x52f   : > { %7152 = vmatpush.msra.mxu1 %v7151_v29  ;;  %7117 = vmatpush.msra.mxu0 %v12202_v58  ;;  %v12218_v29 = vsub.f32 %v8589_v1, %v12202_v58 }
 0x530   : > { %7004 = vmatpush.msrb.mxu2 %v6821_v24  ;;  %7053 = vmatpush.msrb.mxu3 %v11864_v17  ;;  %v7168_v24 = vsub.f32 %v12156_v37, %v7167_v3  ;;  %v7173_v17 = vand.u32 4294901760, %v12170_v52  ;;  %v7163_v48 = vand.u32 4294901760, %v7162_v49  ;;  %v7181_v4 = vand.u32 4294901760, %v7180_v6 }
 0x531   : > { %7158 = vmatpush.msra.mxu1 %v7157_v26  ;;  %7119 = vmatpush.msra.mxu0 %v12215_v53  ;;  %v13020_v26 = vand.u32 4294901760, %v12218_v29  ;;  %v12229_v49 = vand.u32 4294901760, %v8587_v39 }
 0x532   : > { %7008 = vmatpush.msrb.mxu2 %v6827_v45  ;;  %7055 = vmatpush.msrb.mxu3 %v11874_v21  ;;  %v7169_v45 = vand.u32 4294901760, %v7168_v24  ;;  %v7174_v63 = vsub.f32 %v12170_v52, %v7173_v17  ;;  %v12206_v21 = vsub.f32 %v8590_v2, %v12186_v9  ;;  %v12232_v2 = vsub.f32 %v8588_v14, %v12215_v53  ;;  %v8584_v14 = vld [vmem:[%s12983_s8 + $0x90] sm:$0xff] }
 0x533   : > { %7164 = vmatpush.msra.mxu1 %v7163_v48  ;;  %7121 = vmatpush.msra.mxu0 %v12229_v49  ;;  %v8585_v48 = vld [vmem:[%s12983_s8 + $0x98] sm:$0xff] }
 0x534   : > { %7012 = vmatpush.msrb.mxu2 %v6833_v35  ;;  %7057 = vmatpush.msrb.mxu3 %v11879_v38  ;;  %v7175_v35 = vand.u32 4294901760, %v7174_v63  ;;  %v13021_v38 = vand.u32 4294901760, %v12206_v21  ;;  %v13019_v36 = vand.u32 4294901760, %v12232_v2 }
 0x535   : > { %7170 = vmatpush.msra.mxu1 %v7169_v45 }
 0x536   : > { %7016 = vmatpush.msrb.mxu2 %v6839_v59  ;;  %7059 = vmatpush.msrb.mxu3 %v11900_v46  ;;  %v7186_v46 = vsub.f32 %v12206_v21, %v13021_v38  ;;  %v7192_v59 = vsub.f32 %v12218_v29, %v13020_v26  ;;  %v7198_v63 = vsub.f32 %v12232_v2, %v13019_v36 }
 0x537   : > { %7176 = vmatpush.msra.mxu1 %v7175_v35 }
 0x538   : > { %7020 = vmatpush.msrb.mxu2 %v6845_v25  ;;  %7061 = vmatpush.msrb.mxu3 %v11916_v31  ;;  %v12248_v25 = vand.u32 4294901760, %v8586_v60  ;;  %v12251_v31 = vsub.f32 %v8587_v39, %v12229_v49  ;;  %v7187_v24 = vand.u32 4294901760, %v7186_v46  ;;  %v7193_v45 = vand.u32 4294901760, %v7192_v59 }
 0x539   : > { %7182 = vmatpush.msra.mxu1 %v7181_v4  ;;  %v7199_v35 = vand.u32 4294901760, %v7198_v63  ;;  %v12281_v39 = vand.u32 4294901760, %v8584_v14 }
 0x53a   : > { %7024 = vmatpush.msrb.mxu2 %v6851_v20  ;;  %7063 = vmatpush.msrb.mxu3 %v11931_v34  ;;  %v13018_v12 = vand.u32 4294901760, %v12251_v31  ;;  %v12266_v20 = vand.u32 4294901760, %v8585_v48  ;;  %v12272_v34 = vsub.f32 %v8586_v60, %v12248_v25 }
 0x53b   : > { %7123 = vmatpush.msra.mxu0 %v12248_v25  ;;  %7188 = vmatpush.msra.mxu1 %v7187_v24  ;;  %v12298_v59 = vsub.f32 %v8584_v14, %v12281_v39 }
 0x53c   : > { %7028 = vmatpush.msrb.mxu2 %v6857_v28  ;;  %7065 = vmatpush.msrb.mxu3 %v11946_v10  ;;  %v7204_v6 = vsub.f32 %v12251_v31, %v13018_v12  ;;  %v12284_v42 = vsub.f32 %v8585_v48, %v12266_v20  ;;  %v13016_v10 = vand.u32 4294901760, %v12272_v34  ;;  %v8583_v28 = vld [vmem:[%s12983_s8 + $0x88] sm:$0xff] }
 0x53d   : > { %7125 = vmatpush.msra.mxu0 %v12266_v20  ;;  %7194 = vmatpush.msra.mxu1 %v7193_v45  ;;  %v12295_v60 = vand.u32 4294901760, %v8583_v28  ;;  %v13014_v62 = vand.u32 4294901760, %v12298_v59 }
 0x53e   : > { %7032 = vmatpush.msrb.mxu2 %v6863_v22  ;;  %7067 = vmatpush.msrb.mxu3 %v11958_v23  ;;  %v7205_v4 = vand.u32 4294901760, %v7204_v6  ;;  %v13015_v46 = vand.u32 4294901760, %v12284_v42  ;;  %v7210_v23 = vsub.f32 %v12272_v34, %v13016_v10 }
 0x53f   : > { %7127 = vmatpush.msra.mxu0 %v12281_v39  ;;  %7200 = vmatpush.msra.mxu1 %v7199_v35  ;;  %v12320_v24 = vsub.f32 %v8583_v28, %v12295_v60  ;;  %v7222_v63 = vsub.f32 %v12298_v59, %v13014_v62 }
 0x540   : > { %7036 = vmatpush.msrb.mxu2 %v6869_v5  ;;  %7069 = vmatpush.msrb.mxu3 %v12010_v33  ;;  %v7216_v22 = vsub.f32 %v12284_v42, %v13015_v46  ;;  %v12314_v5 = vand.u32 4294901760, %v8582_v7  ;;  %v7211_v33 = vand.u32 4294901760, %v7210_v23 }
 0x541   : > { %7129 = vmatpush.msra.mxu0 %v12295_v60  ;;  %7206 = vmatpush.msra.mxu1 %v7205_v4 }
 0x542   : > { %7040 = vmatpush.msrb.mxu2 %v6875_v43  ;;  %7071 = vmatpush.msrb.mxu3 %v12018_v47  ;;  %v7217_v45 = vand.u32 4294901760, %v7216_v22  ;;  %v12327_v14 = vsub.f32 %v8582_v7, %v12314_v5  ;;  %v13013_v47 = vand.u32 4294901760, %v12320_v24  ;;  %v7223_v43 = vand.u32 4294901760, %v7222_v63 }
 0x543   : > { %7131 = vmatpush.msra.mxu0 %v12314_v5  ;;  %7212 = vmatpush.msra.mxu1 %v7211_v33 }
 0x544   : > { %7073 = vmatpush.msrb.mxu3 %v12030_v44  ;;  %v13017_v35 = vand.u32 4294901760, %v12327_v14  ;;  %v7228_v6 = vsub.f32 %v12320_v24, %v13013_v47 }
 0x545   : > { %7218 = vmatpush.msra.mxu1 %v7217_v45 }
 0x546   : > { %7075 = vmatpush.msrb.mxu3 %v12045_v57  ;;  %v7234_v28 = vsub.f32 %v12327_v14, %v13017_v35  ;;  %v7229_v44 = vand.u32 4294901760, %v7228_v6 }
 0x547   : > { %7224 = vmatpush.msra.mxu1 %v7223_v43 }
 0x548   : > { %7077 = vmatpush.msrb.mxu3 %v12061_v61  ;;  %v7235_v4 = vand.u32 4294901760, %v7234_v28 }
 0x549   : > { %7230 = vmatpush.msra.mxu1 %v7229_v44 }
 0x54b   : > { %7236 = vmatpush.msra.mxu1 %v7235_v4 }
 0x56e   : > { %v6602_v22 = vpop.f32.mrf.mxu0 }
 0x574   : > { %v12259_v1 = vpop.f32.mrf.mxu2 }
 0x578   : > { %v6700_v12 = vpop.f32.mrf.mxu0 }
 0x579   : > { %v6628_v33 = vpop.f32.mrf.mxu1 }
 0x57a   : > { %v6629_v63 = vadd.f32 %v6628_v33, %v6602_v22 }
 0x57c   : > { %v6477_v48 = vpop.f32.mrf.mxu3  ;;  %v6501_v18 = vpop.f32.mrf.mxu2 }
 0x57d   : > { %v6478_v45 = vadd.f32 %v6477_v48, %v12259_v1 }
 0x57f   : > { %v6502_v62 = vadd.f32 %v6501_v18, %v6478_v45 }
 0x581   : > { %v6722_v43 = vpop.f32.mrf.mxu1 }
 0x584   : > { %v6525_v23 = vpop.f32.mrf.mxu3  ;;  %v6549_v7 = vpop.f32.mrf.mxu2 }
 0x585   : > { %v6526_v46 = vadd.f32 %v6525_v23, %v6502_v62 }
 0x587   : > { %v6550_v6 = vadd.f32 %v6549_v7, %v6526_v46 }
 0x58c   : > { %v6571_v57 = vpop.f32.mrf.mxu3  ;;  %v6652_v47 = vpop.f32.mrf.mxu2 }
 0x58d   : > { %v6653_v10 = vadd.f32 %v6652_v47, %v6629_v63  ;;  %v6572_v44 = vadd.f32 %v6571_v57, %v6550_v6  ;;  %v7449_v63 = vld [vmem:[#allocation6 + $0x38] sm:$0xff] }
 0x594   : > { %v6676_v35 = vpop.f32.mrf.mxu3 }
 0x595   : > { %v6677_v61 = vadd.f32 %v6676_v35, %v6653_v10 }
 0x597   : > { %v6701_v28 = vadd.f32 %v6700_v12, %v6677_v61  ;;  %v12534_v61 = vand.u32 4294901760, %v7449_v63 }
 0x599   : > { %v6723_v36 = vadd.f32 %v6722_v43, %v6701_v28  ;;  %v7448_v28 = vld [vmem:[#allocation6 + $0x30] sm:$0xff] }
 0x59b   : > { %v6725_v4 = vmax.f32 %v6572_v44, %v6723_v36  ;;  %v12543_v44 = vsub.f32 %v7449_v63, %v12534_v61 }
 0x59d   : > { %v12341_v26 = vand.u32 4294901760, %v6725_v4 }
 0x59f   : > { %v12344_v38 = vsub.f32 %v6725_v4, %v12341_v26  ;;  %6880 = vmatmul.f32.vlgmr.msra.gmra.mxu3 %v12341_v26  ;;  %v12545_v4 = vand.u32 4294901760, %v7448_v28 }
 0x5a0   : > { %7297 = vmatpush.msra.mxu3 %v12084_v55 }
 0x5a1   : > { %6934 = vmatmul.f32.vlgmr.msrb.gmra.mxu0 %v12344_v38  ;;  %v12350_v1 = vand.u32 4294901760, %v12344_v38 }
 0x5a2   : > { %7299 = vmatpush.msra.mxu3 %v12098_v51  ;;  %7338 = vmatpush.msrb.mxu0 %v7143_v32  ;;  %v13104_v32 = vand.u32 4294901760, %v12251_v31 }
 0x5a3   : > { %6973 = vmatmul.f32.vlgmr.msrb.gmra.mxu1 %v12350_v1  ;;  %v6777_v36 = vsub.f32 %v12344_v38, %v12350_v1 }
 0x5a4   : > { %7301 = vmatpush.msra.mxu3 %v12107_v0  ;;  %7342 = vmatpush.msrb.mxu0 %v7149_v56  ;;  %v13107_v56 = vand.u32 4294901760, %v12298_v59 }
 0x5a5   : > { %7405 = vmatpush.msrb.mxu1 %v12084_v55  ;;  %v6778_v12 = vand.u32 4294901760, %v6777_v36  ;;  %v13101_v55 = vand.u32 4294901760, %v12206_v21  ;;  %v7447_v36 = vld [vmem:[#allocation6 + $0x28] sm:$0xff] }
 0x5a6   : > { %7303 = vmatpush.msra.mxu3 %v12122_v13  ;;  %7346 = vmatpush.msrb.mxu0 %v7155_v27  ;;  %v7458_v27 = vld [vmem:[#allocation6 + $0x78] sm:$0xff] }
 0x5a7   : > { %7407 = vmatpush.msrb.mxu1 %v12098_v51  ;;  %6779 = vmatmul.f32.vlgmr.msra.gmra.mxu2 %v6778_v12  ;;  %v13103_v51 = vand.u32 4294901760, %v12232_v2 }
 0x5a8   : > { %7079 = vmatmul.f32.vlgmr.msrb.gmra.mxu3 %v12341_v26  ;;  %7244 = vmatpush.msra.mxu2 %v12096_v15  ;;  %v13102_v15 = vand.u32 4294901760, %v12218_v29 }
 0x5a9   : > { %7305 = vmatpush.msra.mxu3 %v12138_v16  ;;  %7350 = vmatpush.msrb.mxu0 %v7161_v50  ;;  %v7456_v50 = vld [vmem:[#allocation6 + $0x68] sm:$0xff] }
 0x5aa   : > { %7409 = vmatpush.msrb.mxu1 %v12107_v0  ;;  %7137 = vmatmul.f32.vlgmr.msra.gmra.mxu0 %v6778_v12  ;;  %v13105_v0 = vand.u32 4294901760, %v12272_v34  ;;  %v7746_v12 = vand.u32 4294901760, %v12543_v44 }
 0x5ab   : > { %7247 = vmatpush.msra.mxu2 %v12110_v54  ;;  %7307 = vmatpush.msra.mxu3 %v12153_v30  ;;  %v13106_v54 = vand.u32 4294901760, %v12284_v42 }
 0x5ac   : > { %7354 = vmatpush.msrb.mxu0 %v7167_v3  ;;  %7411 = vmatpush.msrb.mxu1 %v12122_v13  ;;  %v13108_v13 = vand.u32 4294901760, %v12320_v24 }
 0x5ad   : > { %7238 = vmatmul.f32.vlgmr.msra.gmra.mxu1 %v12341_v26  ;;  %7250 = vmatpush.msra.mxu2 %v12125_v19  ;;  %v13109_v19 = vand.u32 4294901760, %v12327_v14 }
 0x5ae   : > { %7309 = vmatpush.msra.mxu3 %v12167_v8  ;;  %7358 = vmatpush.msrb.mxu0 %v7173_v17  ;;  %v7455_v17 = vld [vmem:[#allocation6 + $0x60] sm:$0xff] }
 0x5af   : > { %7413 = vmatpush.msrb.mxu1 %v12138_v16  ;;  %7253 = vmatpush.msra.mxu2 %v12142_v41  ;;  %v12441_v16 = vand.u32 4294901760, %v7458_v27  ;;  %v7457_v41 = vld [vmem:[#allocation6 + $0x70] sm:$0xff] }
 0x5b0   : > { %7311 = vmatpush.msra.mxu3 %v12186_v9  ;;  %7362 = vmatpush.msrb.mxu0 %v7179_v40 }
 0x5b1   : > { %7415 = vmatpush.msrb.mxu1 %v12153_v30  ;;  %7042 = vmatmul.f32.vlgmr.msrb.gmra.mxu2 %v12341_v26  ;;  %v12444_v30 = vsub.f32 %v7458_v27, %v12441_v16 }
 0x5b2   : > { %7256 = vmatpush.msra.mxu2 %v12156_v37  ;;  %7313 = vmatpush.msra.mxu3 %v12202_v58  ;;  %v12446_v37 = vand.u32 4294901760, %v7457_v41 }
 0x5b3   : > { %7366 = vmatpush.msrb.mxu0 %v13101_v55  ;;  %7417 = vmatpush.msrb.mxu1 %v12167_v8  ;;  %v7507_v3 = vand.u32 4294901760, %v12444_v30  ;;  %v12551_v55 = vand.u32 4294901760, %v7447_v36 }
 0x5b4   : > { %7259 = vmatpush.msra.mxu2 %v12170_v52  ;;  %7315 = vmatpush.msra.mxu3 %v12215_v53  ;;  %v12452_v8 = vsub.f32 %v7457_v41, %v12446_v37  ;;  %v12455_v52 = vand.u32 4294901760, %v7456_v50 }
 0x5b5   : > { %7370 = vmatpush.msrb.mxu0 %v13102_v15  ;;  %7419 = vmatpush.msrb.mxu1 %v12186_v9  ;;  %v7508_v9 = vsub.f32 %v12444_v30, %v7507_v3  ;;  %v12554_v15 = vsub.f32 %v7448_v28, %v12545_v4 }
 0x5b6   : > { %7262 = vmatpush.msra.mxu2 %v12189_v11  ;;  %7317 = vmatpush.msra.mxu3 %v12229_v49  ;;  %v7513_v11 = vand.u32 4294901760, %v12452_v8  ;;  %v12464_v40 = vsub.f32 %v7456_v50, %v12455_v52 }
 0x5b7   : > { %7374 = vmatpush.msrb.mxu0 %v13103_v51  ;;  %7421 = vmatpush.msrb.mxu1 %v12202_v58  ;;  %v12467_v58 = vand.u32 4294901760, %v7455_v17  ;;  %v7446_v51 = vld [vmem:[#allocation6 + $0x20] sm:$0xff] }
 0x5b8   : > { %7265 = vmatpush.msra.mxu2 %v12206_v21  ;;  %7319 = vmatpush.msra.mxu3 %v12248_v25  ;;  %v7454_v21 = vld [vmem:[#allocation6 + $0x58] sm:$0xff] }
 0x5b9   : > { %7378 = vmatpush.msrb.mxu0 %v13104_v32  ;;  %7423 = vmatpush.msrb.mxu1 %v12215_v53  ;;  %v7509_v53 = vand.u32 4294901760, %v7508_v9  ;;  %v7747_v32 = vsub.f32 %v12543_v44, %v7746_v12 }
 0x5ba   : > { %7268 = vmatpush.msra.mxu2 %v12218_v29  ;;  %7321 = vmatpush.msra.mxu3 %v12266_v20  ;;  %v7514_v29 = vsub.f32 %v12452_v8, %v7513_v11 }
 0x5bb   : > { %7382 = vmatpush.msrb.mxu0 %v13105_v0  ;;  %7425 = vmatpush.msrb.mxu1 %v12229_v49  ;;  %v12480_v49 = vand.u32 4294901760, %v7454_v21  ;;  %v7752_v0 = vand.u32 4294901760, %v12554_v15 }
 0x5bc   : > { %7271 = vmatpush.msra.mxu2 %v12232_v2  ;;  %7323 = vmatpush.msra.mxu3 %v12281_v39  ;;  %v7453_v2 = vld [vmem:[#allocation6 + $0x50] sm:$0xff] }
 0x5bd   : > { %7386 = vmatpush.msrb.mxu0 %v13106_v54  ;;  %7427 = vmatpush.msrb.mxu1 %v12248_v25  ;;  %v7515_v25 = vand.u32 4294901760, %v7514_v29  ;;  %v12563_v54 = vand.u32 4294901760, %v7446_v51  ;;  %v7753_v27 = vsub.f32 %v12554_v15, %v7752_v0 }
 0x5be   : > { %7274 = vmatpush.msra.mxu2 %v12251_v31  ;;  %7325 = vmatpush.msra.mxu3 %v12295_v60 }
 0x5bf   : > { %7390 = vmatpush.msrb.mxu0 %v13107_v56  ;;  %7429 = vmatpush.msrb.mxu1 %v12266_v20  ;;  %v12566_v56 = vsub.f32 %v7447_v36, %v12551_v55  ;;  %v12580_v50 = vsub.f32 %v7446_v51, %v12563_v54 }
 0x5c0   : > { %7277 = vmatpush.msra.mxu2 %v12272_v34  ;;  %7327 = vmatpush.msra.mxu3 %v12314_v5  ;;  %v12488_v34 = vand.u32 4294901760, %v7453_v2 }
 0x5c1   : > { %7394 = vmatpush.msrb.mxu0 %v13108_v13  ;;  %7431 = vmatpush.msrb.mxu1 %v12281_v39  ;;  %v12491_v39 = vsub.f32 %v7454_v21, %v12480_v49  ;;  %v7445_v13 = vld [vmem:[#allocation6 + $0x18] sm:$0xff]  ;;  %v7758_v41 = vand.u32 4294901760, %v12566_v56 }
 0x5c2   : > { %7331 = vmatmul.f32.vlgmr.msra.gmra.mxu3 %v12350_v1  ;;  %7280 = vmatpush.msra.mxu2 %v12284_v42  ;;  %v7452_v42 = vld [vmem:[#allocation6 + $0x48] sm:$0xff] }
 0x5c3   : > { %7398 = vmatpush.msrb.mxu0 %v13109_v19  ;;  %7433 = vmatpush.msrb.mxu1 %v12295_v60  ;;  %v12499_v60 = vsub.f32 %v7453_v2, %v12488_v34  ;;  %v7531_v62 = vand.u32 4294901760, %v12491_v39  ;;  %v7748_v19 = vand.u32 4294901760, %v7747_v32 }
 0x5c4   : > { %7400 = vmatmul.f32.vlgmr.msrb.gmra.mxu0 %v12341_v26  ;;  %7283 = vmatpush.msra.mxu2 %v12298_v59  ;;  %v12501_v59 = vand.u32 4294901760, %v7452_v42 }
 0x5c5   : > { %7435 = vmatpush.msrb.mxu1 %v12314_v5  ;;  %7568 = vmatpush.msra.mxu0 %v12444_v30  ;;  %v7451_v5 = vld [vmem:[#allocation6 + $0x40] sm:$0xff]  ;;  %v7537_v48 = vand.u32 4294901760, %v12499_v60  ;;  %v7532_v18 = vsub.f32 %v12491_v39, %v7531_v62  ;;  %v12576_v30 = vand.u32 4294901760, %v7445_v13 }
 0x5c6   : > { %7437 = vmatmul.f32.vlgmr.msrb.gmra.mxu1 %v12341_v26  ;;  %7286 = vmatpush.msra.mxu2 %v12320_v24  ;;  %v12476_v26 = vsub.f32 %v7455_v17, %v12467_v58  ;;  %v12510_v47 = vand.u32 4294901760, %v7451_v5 }
 0x5c7   : > { %7605 = vmatpush.msra.mxu1 %v12441_v16  ;;  %7571 = vmatpush.msra.mxu0 %v12452_v8  ;;  %v7538_v35 = vsub.f32 %v12499_v60, %v7537_v48  ;;  %v7533_v22 = vand.u32 4294901760, %v7532_v18  ;;  %v7759_v8 = vsub.f32 %v12566_v56, %v7758_v41  ;;  %v12591_v9 = vsub.f32 %v7445_v13, %v12576_v30 }
 0x5c8   : > { %7289 = vmatpush.msra.mxu2 %v12327_v14  ;;  %7510 = vmatpush.msrb.mxu3 %v7509_v53  ;;  %v7525_v20 = vand.u32 4294901760, %v12476_v26  ;;  %v12508_v14 = vsub.f32 %v7452_v42, %v12501_v59  ;;  %v12523_v7 = vsub.f32 %v7451_v5, %v12510_v47 }
 0x5c9   : > { %7292 = vmatmul.f32.vlgmr.msra.gmra.mxu2 %v12344_v38  ;;  %7607 = vmatpush.msra.mxu1 %v12446_v37  ;;  %v7519_v38 = vand.u32 4294901760, %v12464_v40  ;;  %v7539_v57 = vand.u32 4294901760, %v7538_v35  ;;  %v7770_v21 = vand.u32 4294901760, %v12591_v9 }
 0x5ca   : > { %7473 = vmatpush.msrb.mxu2 %v12441_v16  ;;  %7574 = vmatpush.msra.mxu0 %v12464_v40  ;;  %v7526_v46 = vsub.f32 %v12476_v26, %v7525_v20  ;;  %v7543_v23 = vand.u32 4294901760, %v12508_v14  ;;  %v7549_v45 = vand.u32 4294901760, %v12523_v7 }
 0x5cb   : > { %7609 = vmatpush.msra.mxu1 %v12455_v52  ;;  %v7520_v31 = vsub.f32 %v12464_v40, %v7519_v38  ;;  %7516 = vmatpush.msrb.mxu3 %v7515_v25  ;;  %v7760_v40 = vand.u32 4294901760, %v7759_v8 }
 0x5cc   : > { %7475 = vmatpush.msrb.mxu2 %v12446_v37  ;;  %7577 = vmatpush.msra.mxu0 %v12476_v26  ;;  %v7527_v24 = vand.u32 4294901760, %v7526_v46  ;;  %v7544_v33 = vsub.f32 %v12508_v14, %v7543_v23  ;;  %v7550_v6 = vsub.f32 %v12523_v7, %v7549_v45  ;;  %v7771_v26 = vsub.f32 %v12591_v9, %v7770_v21 }
 0x5cd   : > { %7611 = vmatpush.msra.mxu1 %v12467_v58  ;;  %v7521_v10 = vand.u32 4294901760, %v7520_v31 }
 0x5ce   : > { %7477 = vmatpush.msrb.mxu2 %v12455_v52  ;;  %7580 = vmatpush.msra.mxu0 %v12491_v39  ;;  %v7545_v43 = vand.u32 4294901760, %v7544_v33  ;;  %v7551_v1 = vand.u32 4294901760, %v7550_v6 }
 0x5cf   : > { %7613 = vmatpush.msra.mxu1 %v12480_v49  ;;  %7522 = vmatpush.msrb.mxu3 %v7521_v10 }
 0x5d0   : > { %7479 = vmatpush.msrb.mxu2 %v12467_v58  ;;  %7583 = vmatpush.msra.mxu0 %v12499_v60 }
 0x5d1   : > { %7615 = vmatpush.msra.mxu1 %v12488_v34  ;;  %7528 = vmatpush.msrb.mxu3 %v7527_v24 }
 0x5d2   : > { %7481 = vmatpush.msrb.mxu2 %v12480_v49  ;;  %7586 = vmatpush.msra.mxu0 %v12508_v14 }
 0x5d3   : > { %7617 = vmatpush.msra.mxu1 %v12501_v59  ;;  %7534 = vmatpush.msrb.mxu3 %v7533_v22 }
 0x5d4   : > { %7483 = vmatpush.msrb.mxu2 %v12488_v34  ;;  %7589 = vmatpush.msra.mxu0 %v12523_v7 }
 0x5d5   : > { %7619 = vmatpush.msra.mxu1 %v12510_v47  ;;  %7540 = vmatpush.msrb.mxu3 %v7539_v57 }
 0x5d6   : > { %7485 = vmatpush.msrb.mxu2 %v12501_v59  ;;  %7712 = vmatpush.msrb.mxu0 %v12534_v61 }
 0x5d7   : > { %7546 = vmatpush.msrb.mxu3 %v7545_v43  ;;  %7749 = vmatpush.msrb.mxu1 %v7748_v19 }
 0x5d8   : > { %7487 = vmatpush.msrb.mxu2 %v12510_v47  ;;  %7714 = vmatpush.msrb.mxu0 %v12545_v4 }
 0x5d9   : > { %7552 = vmatpush.msrb.mxu3 %v7551_v1 }
 0x5da   : > { %7638 = vmatpush.msra.mxu2 %v7507_v3  ;;  %7716 = vmatpush.msrb.mxu0 %v12551_v55  ;;  %v7754_v3 = vand.u32 4294901760, %v7753_v27 }
 0x5db   : > { %7681 = vmatpush.msra.mxu3 %v12441_v16  ;;  %v7444_v16 = vld [vmem:[#allocation6 + $0x10] sm:$0xff] }
 0x5dc   : > { %7642 = vmatpush.msra.mxu2 %v7513_v11  ;;  %7718 = vmatpush.msrb.mxu0 %v12563_v54  ;;  %v12588_v17 = vand.u32 4294901760, %v7444_v16  ;;  %v7443_v11 = vld [vmem:[#allocation6 + $0x8] sm:$0xff] }
 0x5dd   : > { %7683 = vmatpush.msra.mxu3 %v12446_v37  ;;  %v7764_v37 = vand.u32 4294901760, %v12580_v50  ;;  %7755 = vmatpush.msrb.mxu1 %v7754_v3  ;;  %v12599_v53 = vand.u32 4294901760, %v7443_v11  ;;  %v7948_v3 = vld [vmem:[#allocation6 + $0xb8] sm:$0xff] }
 0x5de   : > { %7646 = vmatpush.msra.mxu2 %v7519_v38  ;;  %7720 = vmatpush.msrb.mxu0 %v12576_v30  ;;  %v12602_v29 = vsub.f32 %v7444_v16, %v12588_v17  ;;  %v7442_v38 = vld [vmem:[#allocation6] sm:$0xff] }
 0x5df   : > { %7685 = vmatpush.msra.mxu3 %v12455_v52  ;;  %v7765_v52 = vsub.f32 %v12580_v50, %v7764_v37  ;;  %7761 = vmatpush.msrb.mxu1 %v7760_v40  ;;  %v12615_v25 = vand.u32 4294901760, %v7442_v38 }
 0x5e0   : > { %7650 = vmatpush.msra.mxu2 %v7525_v20  ;;  %7722 = vmatpush.msrb.mxu0 %v12588_v17  ;;  %v7776_v2 = vand.u32 4294901760, %v12602_v29  ;;  %v7772_v20 = vand.u32 4294901760, %v7771_v26  ;;  %v7947_v26 = vld [vmem:[#allocation6 + $0xb0] sm:$0xff] }
 0x5e1   : > { %7687 = vmatpush.msra.mxu3 %v12467_v58  ;;  %v12618_v58 = vsub.f32 %v7443_v11, %v12599_v53  ;;  %v7766_v31 = vand.u32 4294901760, %v7765_v52  ;;  %v12629_v10 = vsub.f32 %v7442_v38, %v12615_v25  ;;  %v12654_v38 = vand.u32 4294901760, %v7948_v3 }
 0x5e2   : > { %7654 = vmatpush.msra.mxu2 %v7531_v62  ;;  %7724 = vmatpush.msrb.mxu0 %v12599_v53  ;;  %v7777_v39 = vsub.f32 %v12602_v29, %v7776_v2 }
 0x5e3   : > { %7689 = vmatpush.msra.mxu3 %v12480_v49  ;;  %v7782_v42 = vand.u32 4294901760, %v12618_v58  ;;  %7767 = vmatpush.msrb.mxu1 %v7766_v31  ;;  %v7788_v62 = vand.u32 4294901760, %v12629_v10 }
 0x5e4   : > { %7658 = vmatpush.msra.mxu2 %v7537_v48  ;;  %7726 = vmatpush.msrb.mxu0 %v12615_v25  ;;  %v7778_v46 = vand.u32 4294901760, %v7777_v39  ;;  %v12660_v39 = vand.u32 4294901760, %v7947_v26 }
 0x5e5   : > { %7691 = vmatpush.msra.mxu3 %v12488_v34  ;;  %v7783_v60 = vsub.f32 %v12618_v58, %v7782_v42  ;;  %7773 = vmatpush.msrb.mxu1 %v7772_v20  ;;  %v7789_v48 = vsub.f32 %v12629_v10, %v7788_v62 }
 0x5e6   : > { %7662 = vmatpush.msra.mxu2 %v7543_v23 }
 0x5e7   : > { %7693 = vmatpush.msra.mxu3 %v12501_v59  ;;  %v7784_v24 = vand.u32 4294901760, %v7783_v60  ;;  %7779 = vmatpush.msrb.mxu1 %v7778_v46  ;;  %v7790_v18 = vand.u32 4294901760, %v7789_v48  ;;  %v12663_v60 = vsub.f32 %v7948_v3, %v12654_v38 }
 0x5e8   : > { %7666 = vmatpush.msra.mxu2 %v7549_v45 }
 0x5e9   : > { %7695 = vmatpush.msra.mxu3 %v12510_v47  ;;  %7785 = vmatpush.msrb.mxu1 %v7784_v24 }
 0x5eb   : > { %7791 = vmatpush.msrb.mxu1 %v7790_v18  ;;  %v7944_v18 = vld [vmem:[#allocation6 + $0x98] sm:$0xff] }
 0x61e   : > { %v6935_v34 = vpop.f32.mrf.mxu0 }
 0x620   : > { %v6974_v14 = vpop.f32.mrf.mxu1 }
 0x622   : > { %v6881_v5 = vpop.f32.mrf.mxu3 }
 0x627   : > { %v7138_v22 = vpop.f32.mrf.mxu0 }
 0x62a   : > { %v6780_v49 = vpop.f32.mrf.mxu2  ;;  %v7239_v59 = vpop.f32.mrf.mxu1 }
 0x62b   : > { %v6882_v23 = vadd.f32 %v6881_v5, %v6780_v49  ;;  %v7080_v7 = vpop.f32.mrf.mxu3  ;;  %v7240_v33 = vadd.f32 %v7239_v59, %v7138_v22  ;;  %v7946_v49 = vld [vmem:[#allocation6 + $0xa8] sm:$0xff]  ;;  %v7945_v5 = vld [vmem:[#allocation6 + $0xa0] sm:$0xff]  ;;  %v7943_v22 = vld [vmem:[#allocation6 + $0x90] sm:$0xff] }
 0x62c   : > { %v12668_v48 = vand.u32 4294901760, %v7946_v49 }
 0x62d   : > { %v6936_v57 = vadd.f32 %v6935_v34, %v6882_v23  ;;  %v12681_v23 = vand.u32 4294901760, %v7945_v5 }
 0x62f   : > { %v6975_v63 = vadd.f32 %v6974_v14, %v6936_v57  ;;  %v12677_v14 = vsub.f32 %v7947_v26, %v12660_v39  ;;  %v7942_v57 = vld [vmem:[#allocation6 + $0x88] sm:$0xff]  ;;  %v8195_v26 = vld [vmem:[#allocation6 + $0xe0] sm:$0xff] }
 0x631   : > { %v8001_v59 = vand.u32 4294901760, %v12677_v14 }
 0x634   : > { %v7043_v35 = vpop.f32.mrf.mxu2 }
 0x635   : > { %v7044_v28 = vadd.f32 %v7043_v35, %v6975_v63  ;;  %v7995_v35 = vand.u32 4294901760, %v12663_v60  ;;  %v12719_v63 = vand.u32 4294901760, %v7942_v57 }
 0x637   : > { %v7081_v32 = vadd.f32 %v7080_v7, %v7044_v28  ;;  %v12690_v7 = vand.u32 4294901760, %v7944_v18  ;;  %v12742_v28 = vsub.f32 %v7942_v57, %v12719_v63  ;;  %v8192_v57 = vld [vmem:[#allocation6 + $0xc8] sm:$0xff] }
 0x641   : > { %v7401_v47 = vpop.f32.mrf.mxu0 }
 0x643   : > { %v7438_v51 = vpop.f32.mrf.mxu1 }
 0x645   : > { %v7332_v6 = vpop.f32.mrf.mxu3 }
 0x64c   : > { %v7293_v45 = vpop.f32.mrf.mxu2 }
 0x64d   : > { %v7294_v43 = vadd.f32 %v7293_v45, %v7240_v33  ;;  %v7941_v45 = vld [vmem:[#allocation6 + $0x80] sm:$0xff] }
 0x64f   : > { %v7333_v1 = vadd.f32 %v7332_v6, %v7294_v43 }
 0x651   : > { %v7402_v36 = vadd.f32 %v7401_v47, %v7333_v1  ;;  %v8198_v47 = vld [vmem:[#allocation6 + $0xf8] sm:$0xff] }
 0x653   : > { %v7439_v13 = vadd.f32 %v7438_v51, %v7402_v36  ;;  %v8031_v36 = vand.u32 4294901760, %v12742_v28 }
 0x655   : > { %v12641_v19 = vmax.f32 %v7081_v32, %v7439_v13  ;;  %v8197_v32 = vld [vmem:[#allocation6 + $0xf0] sm:$0xff]  ;;  %v12772_v13 = vand.u32 4294901760, %v8198_v47 }
 0x657   : > { %v7701_v27 = vsel %vm7461_vm9, %v12641_v19, 0  ;;  %v7460_v16 = vrot.slane %v12641_v19, 1 }
 0x658   : > { %v12646_v8 = vand.u32 4294901760, %v7701_v27 }
 0x659   : > { %v7462_v11 = vsel %vm7461_vm9, %v7460_v16, 0  ;;  %v8196_v16 = vld [vmem:[#allocation6 + $0xe8] sm:$0xff] }
 0x65a   : > { %v12649_v40 = vand.u32 4294901760, %v7462_v11  ;;  %v12652_v52 = vsub.f32 %v7701_v27, %v12646_v8  ;;  %v12780_v27 = vand.u32 4294901760, %v8197_v32 }
 0x65c   : > { %7554 = vmatmul.f32.vlgmr.msrb.gmra.mxu3 %v12649_v40  ;;  %v7489_v31 = vsub.f32 %v7462_v11, %v12649_v40  ;;  %v7729_v20 = vand.u32 4294901760, %v12652_v52 }
 0x65d   : > { %7844 = vmatpush.msrb.mxu3 %v12534_v61 }
 0x65e   : > { %7592 = vmatmul.f32.vlgmr.msra.gmra.mxu0 %v7489_v31  ;;  %v7490_v46 = vand.u32 4294901760, %v7489_v31  ;;  %v7730_v34 = vsub.f32 %v12652_v52, %v7729_v20 }
 0x65f   : > { %7846 = vmatpush.msrb.mxu3 %v12545_v4  ;;  %7877 = vmatpush.msra.mxu0 %v7746_v12 }
 0x660   : > { %7623 = vmatmul.f32.vlgmr.msra.gmra.mxu1 %v7490_v46  ;;  %v7491_v24 = vsub.f32 %v7489_v31, %v7490_v46  ;;  %v8194_v46 = vld [vmem:[#allocation6 + $0xd8] sm:$0xff] }
 0x661   : > { %7848 = vmatpush.msrb.mxu3 %v12551_v55  ;;  %7881 = vmatpush.msra.mxu0 %v7752_v0  ;;  %v12688_v0 = vsub.f32 %v7946_v49, %v12668_v48  ;;  %v12800_v49 = vsub.f32 %v8197_v32, %v12780_v27 }
 0x662   : > { %7920 = vmatpush.msra.mxu1 %v12534_v61  ;;  %v7492_v12 = vand.u32 4294901760, %v7491_v24  ;;  %v7731_v61 = vand.u32 4294901760, %v7730_v34  ;;  %v8193_v34 = vld [vmem:[#allocation6 + $0xd0] sm:$0xff] }
 0x663   : > { %7850 = vmatpush.msrb.mxu3 %v12563_v54  ;;  %7885 = vmatpush.msra.mxu0 %v7758_v41  ;;  %v12702_v41 = vsub.f32 %v7945_v5, %v12681_v23  ;;  %v8007_v33 = vand.u32 4294901760, %v12688_v0  ;;  %v12804_v5 = vand.u32 4294901760, %v8195_v26 }
 0x664   : > { %7922 = vmatpush.msra.mxu1 %v12545_v4  ;;  %7493 = vmatmul.f32.vlgmr.msrb.gmra.mxu2 %v7492_v12  ;;  %v7996_v4 = vsub.f32 %v12663_v60, %v7995_v35 }
 0x665   : > { %7697 = vmatmul.f32.vlgmr.msra.gmra.mxu3 %v12649_v40  ;;  %7807 = vmatpush.msrb.mxu2 %v12543_v44  ;;  %v12705_v44 = vand.u32 4294901760, %v7943_v22  ;;  %v8013_v43 = vand.u32 4294901760, %v12702_v41 }
 0x666   : > { %7852 = vmatpush.msrb.mxu3 %v12576_v30  ;;  %7889 = vmatpush.msra.mxu0 %v7764_v37  ;;  %v12711_v37 = vsub.f32 %v7944_v18, %v12690_v7  ;;  %v8199_v18 = vrot.slane %v12641_v19, 3 }
 0x667   : > { %7924 = vmatpush.msra.mxu1 %v12551_v55  ;;  %7732 = vmatmul.f32.vlgmr.msrb.gmra.mxu0 %v7731_v61  ;;  %v8002_v55 = vsub.f32 %v12677_v14, %v8001_v59  ;;  %v8251_v61 = vand.u32 4294901760, %v12800_v49 }
 0x668   : > { %7810 = vmatpush.msrb.mxu2 %v12554_v15  ;;  %7854 = vmatpush.msrb.mxu3 %v12588_v17  ;;  %v7997_v15 = vand.u32 4294901760, %v7996_v4  ;;  %v8019_v6 = vand.u32 4294901760, %v12711_v37  ;;  %v12824_v4 = vand.u32 4294901760, %v8193_v34 }
 0x669   : > { %7893 = vmatpush.msra.mxu0 %v7770_v21  ;;  %7926 = vmatpush.msra.mxu1 %v12563_v54  ;;  %v12728_v54 = vsub.f32 %v7943_v22, %v12705_v44  ;;  %v12730_v21 = vand.u32 4294901760, %v7941_v45  ;;  %v12814_v22 = vand.u32 4294901760, %v8194_v46 }
 0x66a   : > { %7793 = vmatmul.f32.vlgmr.msrb.gmra.mxu1 %v12646_v8  ;;  %7813 = vmatpush.msrb.mxu2 %v12566_v56  ;;  %v8008_v56 = vsub.f32 %v12688_v0, %v8007_v33  ;;  %v8020_v1 = vsub.f32 %v12711_v37, %v8019_v6 }
 0x66b   : > { %7856 = vmatpush.msrb.mxu3 %v12599_v53  ;;  %7897 = vmatpush.msra.mxu0 %v7776_v2  ;;  %v8003_v2 = vand.u32 4294901760, %v8002_v55 }
 0x66c   : > { %7928 = vmatpush.msra.mxu1 %v12576_v30  ;;  %7816 = vmatpush.msrb.mxu2 %v12580_v50  ;;  %v8014_v30 = vsub.f32 %v12702_v41, %v8013_v43  ;;  %v8025_v50 = vand.u32 4294901760, %v12728_v54 }
 0x66d   : > { %7858 = vmatpush.msrb.mxu3 %v12615_v25  ;;  %7901 = vmatpush.msra.mxu0 %v7782_v42  ;;  %v12753_v42 = vsub.f32 %v7941_v45, %v12730_v21 }
 0x66e   : > { %7930 = vmatpush.msra.mxu1 %v12588_v17  ;;  %7668 = vmatmul.f32.vlgmr.msra.gmra.mxu2 %v12649_v40  ;;  %v8009_v17 = vand.u32 4294901760, %v8008_v56  ;;  %v8015_v51 = vand.u32 4294901760, %v8014_v30  ;;  %v12790_v40 = vsub.f32 %v8198_v47, %v12772_v13  ;;  %v8191_v56 = vld [vmem:[#allocation6 + $0xc0] sm:$0xff] }
 0x66f   : > { %7998 = vmatpush.msra.mxu3 %v7997_v15  ;;  %7819 = vmatpush.msrb.mxu2 %v12591_v9  ;;  %v7949_v9 = vrot.slane %v12641_v19, 2  ;;  %v12822_v19 = vsub.f32 %v8195_v26, %v12804_v5  ;;  %v12834_v15 = vsub.f32 %v8194_v46, %v12814_v22  ;;  %v12851_v32 = vand.u32 4294901760, %v8191_v56 }
 0x670   : > { %7862 = vmatmul.f32.vlgmr.msrb.gmra.mxu3 %v7729_v20  ;;  %7905 = vmatpush.msra.mxu0 %v7788_v62  ;;  %v8026_v62 = vsub.f32 %v12728_v54, %v8025_v50  ;;  %v8245_v24 = vand.u32 4294901760, %v12790_v40 }
 0x671   : > { %7932 = vmatpush.msra.mxu1 %v12599_v53  ;;  %8004 = vmatpush.msra.mxu3 %v8003_v2  ;;  %v8037_v53 = vand.u32 4294901760, %v12753_v42  ;;  %v7950_v3 = vsel %vm7461_vm9, %v7949_v9, 0  ;;  %v8200_v2 = vsel %vm7461_vm9, %v8199_v18, 0  ;;  %v8263_v47 = vand.u32 4294901760, %v12822_v19 }
 0x672   : > { %8056 = vmatpush.msrb.mxu0 %v12663_v60  ;;  %7822 = vmatpush.msrb.mxu2 %v12602_v29  ;;  %v8021_v29 = vand.u32 4294901760, %v8020_v1  ;;  %v8027_v11 = vand.u32 4294901760, %v8026_v62  ;;  %v12797_v20 = vand.u32 4294901760, %v7950_v3  ;;  %v8246_v45 = vsub.f32 %v12790_v40, %v8245_v24 }
 0x673   : > { %7907 = vmatmul.f32.vlgmr.msra.gmra.mxu0 %v12646_v8  ;;  %7934 = vmatpush.msra.mxu1 %v12615_v25  ;;  %v8032_v25 = vsub.f32 %v12742_v28, %v8031_v36  ;;  %v12842_v1 = vand.u32 4294901760, %v8192_v57  ;;  %v12853_v62 = vand.u32 4294901760, %v8200_v2  ;;  %v12876_v26 = vsub.f32 %v8191_v56, %v12851_v32 }
 0x674   : > { %8010 = vmatpush.msra.mxu3 %v8009_v17  ;;  %8059 = vmatpush.msrb.mxu0 %v12677_v14  ;;  %v8252_v17 = vsub.f32 %v12800_v49, %v8251_v61  ;;  %v8247_v9 = vand.u32 4294901760, %v8246_v45 }
 0x675   : > { %8093 = vmatpush.msrb.mxu1 %v12654_v38  ;;  %7825 = vmatpush.msrb.mxu2 %v12618_v58  ;;  %v8038_v58 = vsub.f32 %v12753_v42, %v8037_v53  ;;  %v8033_v31 = vand.u32 4294901760, %v8032_v25 }
 0x676   : > { %7936 = vmatmul.f32.vlgmr.msra.gmra.mxu1 %v12646_v8  ;;  %8016 = vmatpush.msra.mxu3 %v8015_v51  ;;  %v12793_v8 = vand.u32 4294901760, %v8196_v16  ;;  %v12848_v51 = vsub.f32 %v8193_v34, %v12824_v4  ;;  %v8253_v25 = vand.u32 4294901760, %v8252_v17 }
 0x677   : > { %8062 = vmatpush.msrb.mxu0 %v12688_v0  ;;  %8095 = vmatpush.msrb.mxu1 %v12660_v39 }
 0x678   : > { %7828 = vmatpush.msrb.mxu2 %v12629_v10  ;;  %8022 = vmatpush.msra.mxu3 %v8021_v29  ;;  %v8039_v10 = vand.u32 4294901760, %v8038_v58  ;;  %v12812_v12 = vsub.f32 %v8196_v16, %v12793_v8  ;;  %v8269_v29 = vand.u32 4294901760, %v12834_v15  ;;  %v12873_v58 = vsub.f32 %v8200_v2, %v12853_v62 }
 0x679   : > { %8065 = vmatpush.msrb.mxu0 %v12702_v41  ;;  %8097 = vmatpush.msrb.mxu1 %v12668_v48 }
 0x67a   : > { %7961 = vmatpush.msra.mxu2 %v12654_v38  ;;  %8028 = vmatpush.msra.mxu3 %v8027_v11  ;;  %v8257_v55 = vand.u32 4294901760, %v12812_v12  ;;  %v8275_v11 = vand.u32 4294901760, %v12848_v51  ;;  %v8228_v18 = vand.u32 4294901760, %v12873_v58 }
 0x67b   : > { %7831 = vmatmul.f32.vlgmr.msrb.gmra.mxu2 %v12652_v52  ;;  %8068 = vmatpush.msrb.mxu0 %v12711_v37  ;;  %v7977_v52 = vsub.f32 %v7950_v3, %v12797_v20  ;;  %v12864_v3 = vsub.f32 %v8192_v57, %v12842_v1 }
 0x67c   : > { %7963 = vmatpush.msra.mxu2 %v12660_v39  ;;  %8099 = vmatpush.msrb.mxu1 %v12681_v23  ;;  %v8229_v60 = vsub.f32 %v12873_v58, %v8228_v18 }
 0x67d   : > { %8034 = vmatpush.msra.mxu3 %v8033_v31  ;;  %8071 = vmatpush.msrb.mxu0 %v12728_v54  ;;  %v7978_v30 = vand.u32 4294901760, %v7977_v52  ;;  %v8270_v31 = vsub.f32 %v12834_v15, %v8269_v29 }
 0x67e   : > { %7965 = vmatpush.msra.mxu2 %v12668_v48  ;;  %8101 = vmatpush.msrb.mxu1 %v12690_v7 }
 0x67f   : > { %8040 = vmatpush.msra.mxu3 %v8039_v10  ;;  %8074 = vmatpush.msrb.mxu0 %v12742_v28  ;;  %v7979_v16 = vsub.f32 %v7977_v52, %v7978_v30  ;;  %v8281_v10 = vand.u32 4294901760, %v12864_v3  ;;  %v8271_v57 = vand.u32 4294901760, %v8270_v31 }
 0x680   : > { %7967 = vmatpush.msra.mxu2 %v12681_v23  ;;  %8103 = vmatpush.msrb.mxu1 %v12705_v44 }
 0x681   : > { %8042 = vmatmul.f32.vlgmr.msra.gmra.mxu3 %v12797_v20  ;;  %8077 = vmatpush.msrb.mxu0 %v12753_v42  ;;  %v7980_v46 = vand.u32 4294901760, %v7979_v16 }
 0x682   : > { %7969 = vmatpush.msra.mxu2 %v12690_v7  ;;  %8169 = vmatpush.msrb.mxu3 %v12654_v38  ;;  %v8258_v38 = vsub.f32 %v12812_v12, %v8257_v55 }
 0x683   : > { %8105 = vmatpush.msrb.mxu1 %v12719_v63  ;;  %8080 = vmatmul.f32.vlgmr.msrb.gmra.mxu0 %v7977_v52  ;;  %v8287_v52 = vand.u32 4294901760, %v12876_v26 }
 0x684   : > { %8171 = vmatpush.msrb.mxu3 %v12660_v39  ;;  %8211 = vmatpush.msra.mxu0 %v12772_v13  ;;  %v8264_v39 = vsub.f32 %v12822_v19, %v8263_v47 }
 0x685   : > { %7971 = vmatpush.msra.mxu2 %v12705_v44  ;;  %8107 = vmatpush.msrb.mxu1 %v12730_v21 }
 0x686   : > { %8111 = vmatmul.f32.vlgmr.msrb.gmra.mxu1 %v7978_v30  ;;  %8173 = vmatpush.msrb.mxu3 %v12668_v48  ;;  %v8259_v48 = vand.u32 4294901760, %v8258_v38  ;;  %v8265_v34 = vand.u32 4294901760, %v8264_v39 }
 0x687   : > { %8213 = vmatpush.msra.mxu0 %v12780_v27  ;;  %8248 = vmatpush.msra.mxu1 %v8247_v9 }
 0x688   : > { %7973 = vmatpush.msra.mxu2 %v12719_v63  ;;  %8175 = vmatpush.msrb.mxu3 %v12681_v23  ;;  %v8276_v23 = vsub.f32 %v12848_v51, %v8275_v11 }
 0x689   : > { %8215 = vmatpush.msra.mxu0 %v12793_v8  ;;  %8254 = vmatpush.msra.mxu1 %v8253_v25 }
 0x68a   : > { %7975 = vmatpush.msra.mxu2 %v12730_v21  ;;  %8177 = vmatpush.msrb.mxu3 %v12690_v7  ;;  %v8282_v7 = vsub.f32 %v12864_v3, %v8281_v10  ;;  %v8277_v45 = vand.u32 4294901760, %v8276_v23 }
 0x68b   : > { %7981 = vmatmul.f32.vlgmr.msra.gmra.mxu2 %v7980_v46  ;;  %8217 = vmatpush.msra.mxu0 %v12804_v5 }
 0x68c   : > { %8126 = vmatpush.msrb.mxu2 %v7995_v35  ;;  %8260 = vmatpush.msra.mxu1 %v8259_v48  ;;  %v8288_v35 = vsub.f32 %v12876_v26, %v8287_v52  ;;  %v8283_v14 = vand.u32 4294901760, %v8282_v7 }
 0x68d   : > { %8179 = vmatpush.msrb.mxu3 %v12705_v44  ;;  %8219 = vmatpush.msra.mxu0 %v12814_v22 }
 0x68e   : > { %8130 = vmatpush.msrb.mxu2 %v8001_v59  ;;  %8266 = vmatpush.msra.mxu1 %v8265_v34  ;;  %v8230_v59 = vand.u32 4294901760, %v8229_v60  ;;  %v8289_v44 = vand.u32 4294901760, %v8288_v35 }
 0x68f   : > { %8181 = vmatpush.msrb.mxu3 %v12719_v63  ;;  %8221 = vmatpush.msra.mxu0 %v12824_v4 }
 0x690   : > { %8134 = vmatpush.msrb.mxu2 %v8007_v33  ;;  %8272 = vmatpush.msra.mxu1 %v8271_v57 }
 0x691   : > { %8183 = vmatpush.msrb.mxu3 %v12730_v21  ;;  %8223 = vmatpush.msra.mxu0 %v12842_v1 }
 0x692   : > { %8138 = vmatpush.msrb.mxu2 %v8013_v43  ;;  %8278 = vmatpush.msra.mxu1 %v8277_v45 }
 0x693   : > { %8185 = vmatmul.f32.vlgmr.msrb.gmra.mxu3 %v12797_v20  ;;  %8225 = vmatpush.msra.mxu0 %v12851_v32 }
 0x694   : > { %8343 = vmatpush.msra.mxu3 %v12772_v13  ;;  %8142 = vmatpush.msrb.mxu2 %v8019_v6 }
 0x695   : > { %8284 = vmatpush.msra.mxu1 %v8283_v14  ;;  %8231 = vmatmul.f32.vlgmr.msra.gmra.mxu0 %v8230_v59 }
 0x696   : > { %8345 = vmatpush.msra.mxu3 %v12780_v27  ;;  %8376 = vmatpush.msrb.mxu0 %v8245_v24 }
 0x697   : > { %8146 = vmatpush.msrb.mxu2 %v8025_v50  ;;  %8290 = vmatpush.msra.mxu1 %v8289_v44 }
 0x698   : > { %8292 = vmatmul.f32.vlgmr.msra.gmra.mxu1 %v12853_v62  ;;  %8347 = vmatpush.msra.mxu3 %v12793_v8 }
 0x699   : > { %8380 = vmatpush.msrb.mxu0 %v8251_v61  ;;  %8419 = vmatpush.msrb.mxu1 %v12772_v13 }
 0x69a   : > { %8150 = vmatpush.msrb.mxu2 %v8031_v36  ;;  %8349 = vmatpush.msra.mxu3 %v12804_v5 }
 0x69b   : > { %8384 = vmatpush.msrb.mxu0 %v8257_v55  ;;  %8421 = vmatpush.msrb.mxu1 %v12780_v27 }
 0x69c   : > { %8154 = vmatpush.msrb.mxu2 %v8037_v53  ;;  %8351 = vmatpush.msra.mxu3 %v12814_v22 }
 0x69d   : > { %8156 = vmatmul.f32.vlgmr.msrb.gmra.mxu2 %v12797_v20  ;;  %8388 = vmatpush.msrb.mxu0 %v8263_v47 }
 0x69e   : > { %8306 = vmatpush.msra.mxu2 %v12790_v40  ;;  %8423 = vmatpush.msrb.mxu1 %v12793_v8 }
 0x69f   : > { %8353 = vmatpush.msra.mxu3 %v12824_v4  ;;  %8392 = vmatpush.msrb.mxu0 %v8269_v29 }
 0x6a0   : > { %8309 = vmatpush.msra.mxu2 %v12800_v49  ;;  %8425 = vmatpush.msrb.mxu1 %v12804_v5 }
 0x6a1   : > { %8355 = vmatpush.msra.mxu3 %v12842_v1  ;;  %8396 = vmatpush.msrb.mxu0 %v8275_v11 }
 0x6a2   : > { %8312 = vmatpush.msra.mxu2 %v12812_v12  ;;  %8427 = vmatpush.msrb.mxu1 %v12814_v22 }
 0x6a3   : > { %8357 = vmatpush.msra.mxu3 %v12851_v32  ;;  %8400 = vmatpush.msrb.mxu0 %v8281_v10 }
 0x6a4   : > { %8315 = vmatpush.msra.mxu2 %v12822_v19  ;;  %8429 = vmatpush.msrb.mxu1 %v12824_v4 }
 0x6a5   : > { %8361 = vmatmul.f32.vlgmr.msra.gmra.mxu3 %v8228_v18  ;;  %8404 = vmatpush.msrb.mxu0 %v8287_v52 }
 0x6a6   : > { %8318 = vmatpush.msra.mxu2 %v12834_v15  ;;  %8431 = vmatpush.msrb.mxu1 %v12842_v1 }
 0x6a7   : > { %8406 = vmatmul.f32.vlgmr.msrb.gmra.mxu0 %v12853_v62 }
 0x6a8   : > { %8321 = vmatpush.msra.mxu2 %v12848_v51  ;;  %8433 = vmatpush.msrb.mxu1 %v12851_v32 }
 0x6a9   : > { %8435 = vmatmul.f32.vlgmr.msrb.gmra.mxu1 %v12853_v62 }
 0x6aa   : > { %8324 = vmatpush.msra.mxu2 %v12864_v3 }
 0x6ac   : > { %8327 = vmatpush.msra.mxu2 %v12876_v26 }
 0x6ad   : > { %8330 = vmatmul.f32.vlgmr.msra.gmra.mxu2 %v12873_v58  ;;  %v8440_v58 = vld [vmem:[%s12985_s10] sm:$0x1] }
 0x6db   : > { %v7593_v33 = vpop.f32.mrf.mxu0 }
 0x6dd   : > { %v7624_v37 = vpop.f32.mrf.mxu1 }
 0x6df   : > { %v7555_v41 = vpop.f32.mrf.mxu3 }
 0x6e4   : > { %v7733_v21 = vpop.f32.mrf.mxu0 }
 0x6e7   : > { %v7494_v0 = vpop.f32.mrf.mxu2  ;;  %v7794_v6 = vpop.f32.mrf.mxu1 }
 0x6e8   : > { %v7556_v43 = vadd.f32 %v7555_v41, %v7494_v0  ;;  %v7698_v54 = vpop.f32.mrf.mxu3 }
 0x6ea   : > { %v7594_v28 = vadd.f32 %v7593_v33, %v7556_v43 }
 0x6ec   : > { %v7625_v50 = vadd.f32 %v7624_v37, %v7594_v28 }
 0x6f0   : > { %v7908_v13 = vpop.f32.mrf.mxu0 }
 0x6f1   : > { %v7669_v63 = vpop.f32.mrf.mxu2 }
 0x6f2   : > { %v7670_v36 = vadd.f32 %v7669_v63, %v7625_v50 }
 0x6f3   : > { %v7863_v53 = vpop.f32.mrf.mxu3  ;;  %v7937_v27 = vpop.f32.mrf.mxu1 }
 0x6f4   : > { %v7699_v40 = vadd.f32 %v7698_v54, %v7670_v36 }
 0x6f6   : > { %v7734_v20 = vadd.f32 %v7733_v21, %v7699_v40 }
 0x6f8   : > { %v7795_v12 = vadd.f32 %v7794_v6, %v7734_v20 }
 0x6fe   : > { %v7832_v42 = vpop.f32.mrf.mxu2 }
 0x6ff   : > { %v7833_v19 = vadd.f32 %v7832_v42, %v7795_v12 }
 0x700   : > { %v8081_v5 = vpop.f32.mrf.mxu0 }
 0x701   : > { %v7864_v2 = vadd.f32 %v7863_v53, %v7833_v19 }
 0x703   : > { %v8112_v24 = vpop.f32.mrf.mxu1  ;;  %v7909_v51 = vadd.f32 %v7908_v13, %v7864_v2 }
 0x704   : > { %v8043_v49 = vpop.f32.mrf.mxu3 }
 0x705   : > { %v7938_v25 = vadd.f32 %v7937_v27, %v7909_v51 }
 0x70e   : > { %v7982_v8 = vpop.f32.mrf.mxu2 }
 0x70f   : > { %v8044_v22 = vadd.f32 %v8043_v49, %v7982_v8 }
 0x711   : > { %v8082_v4 = vadd.f32 %v8081_v5, %v8044_v22 }
 0x712   : > { %v8232_v15 = vpop.f32.mrf.mxu0 }
 0x713   : > { %v8113_v30 = vadd.f32 %v8112_v24, %v8082_v4 }
 0x715   : > { %v8293_v56 = vpop.f32.mrf.mxu1 }
 0x716   : > { %v8186_v55 = vpop.f32.mrf.mxu3  ;;  %v8294_v17 = vadd.f32 %v8293_v56, %v8232_v15 }
 0x720   : > { %v8157_v61 = vpop.f32.mrf.mxu2 }
 0x721   : > { %v8158_v1 = vadd.f32 %v8157_v61, %v8113_v30 }
 0x723   : > { %v8187_v62 = vadd.f32 %v8186_v55, %v8158_v1 }
 0x724   : > { %v8407_v29 = vpop.f32.mrf.mxu0 }
 0x725   : > { %v8189_v39 = vadd.f32 %v8187_v62, %v7938_v25 }
 0x726   : > { %v8436_v3 = vpop.f32.mrf.mxu1 }
 0x728   : > { %v8362_v32 = vpop.f32.mrf.mxu3 }
 0x730   : > { %v8331_v47 = vpop.f32.mrf.mxu2 }
 0x731   : > { %v8332_v9 = vadd.f32 %v8331_v47, %v8294_v17 }
 0x733   : > { %v8363_v38 = vadd.f32 %v8362_v32, %v8332_v9 }
 0x735   : > { %v8408_v16 = vadd.f32 %v8407_v29, %v8363_v38 }
 0x737   : > { %v8437_v11 = vadd.f32 %v8436_v3, %v8408_v16 }
 0x739   : > { %v8439_v26 = vadd.f32 %v8437_v11, %v8189_v39 }
 0x73b   : > { %v8441_v48 = vadd.f32 %v8440_v58, %v8439_v26 }
 0x73d   : > { %v8442_v31 = vmax.f32 %v8441_v48, 0.0 }
 0x73f   : > { %v8443_v46 = vperm.slane %v8442_v31, 0 }
 0x741   : > { %8444 = vst [vmem:[%s434_s13] sm:$0xff] %v8443_v46 }
 0x742 PF: > { %s23_s17 = sadd.s32 1, %s8753_s17  }
 0x743   : > { %p20_p7 = scmp.ge.s32.totalorder %s23_s17, 4  }
 0x745   :  { %22 = sbr.rel (!%p20_p7) target bundleno = 2 (0x2), region = 122 }
 0x74a   :  { %8464 = vsyncpa [#allocation3], 1 }
 0x74b   :  { %8466 = vsyncpa [#allocation3 + $0x1], 1 }
 0x74c   :  { %8467 = vsyncpa [#allocation5], 1 }

</bundles_post_ra>
